<compile_context>
chip_gen: v7x
topology: tpu7x:2x2x1
jax: 0.10.0
libtpu: 0.0.40
codegen_flags: <defaults>
</compile_context>

<pallas_src>
import functools

import jax
import jax.numpy as jnp
from jax.experimental import pallas as pl
from jax.experimental.pallas import tpu as pltpu


def _round_up(x, m):
    return (x + m - 1) // m * m


def _lssi_kernel(xa_ref, xb_ref, w1_ref, b1_ref, wh_ref, bh_ref, wlt_ref, blt_ref,
                 o_ref, *, n_layers, taps, compute_dtype):
    # xa_ref : (1, TL, C)        x tile for this grid step (already shifted by cl//2-left)
    # xb_ref : (1, TL, C)        the *next* x tile; its first taps-1 rows are the halo
    # w1_ref : (taps*C, H)       fused first-layer weights (im2col layout)
    # b1_ref : (1, H)
    # wh_ref : (n_layers, H, H)  1x1 hidden convs
    # bh_ref : (n_layers, H)
    # wlt_ref: (3, H)            last 1x1 conv, transposed for lane-dense output
    # blt_ref: (3, 1)
    # o_ref  : (1, 3, TL)        channel-major output tile
    tl = xa_ref.shape[1]

    xa = xa_ref[0]                                    # (TL, C)
    if taps > 1:
        halo = xb_ref[0, :taps - 1, :]                # (taps-1, C)
        win = jnp.concatenate([xa, halo], axis=0)     # (TL+taps-1, C)
        # im2col: fuse the `taps` shifted matmuls into a single MXU matmul with
        # contraction dim taps*C instead of C.
        xcol = jnp.concatenate([win[k:k + tl] for k in range(taps)], axis=1)
    else:
        xcol = xa

    h = jnp.dot(xcol, w1_ref[...], preferred_element_type=jnp.float32)   # (TL, H) f32
    h = jnp.maximum(h + b1_ref[0], 0.0)

    for i in range(n_layers):                         # unrolled; broadcasts emitted once
        h = jnp.dot(h.astype(compute_dtype), wh_ref[i],
                    preferred_element_type=jnp.float32) + bh_ref[i]
        h = jnp.maximum(h, 0.0)

    # Final 1x1 conv, computed as (3,H) @ (TL,H)^T so the result is channel-major
    # (3, TL) and the HBM store is lane-dense (no 3-wide masked stores).
    out = jax.lax.dot_general(
        wlt_ref[...], h.astype(compute_dtype),
        dimension_numbers=(((1,), (1,)), ((), ())),
        preferred_element_type=jnp.float32)           # (3, TL) f32
    o_ref[0] = (out + blt_ref[...]).astype(o_ref.dtype)


def splice_point_identifier(x, params, *, cl, left, right, tile_l=512, use_bf16=True):
    """x: (N, L, C_in) float32, channels-last. Returns (N, L - cl, 3) float32."""
    w1, b1, wh, bh, wl, bl = params
    N, L, C = x.shape
    K, _, H = w1.shape
    n_layers = wh.shape[0]
    assert cl % 2 == 0 and K == left + right + 1 and max(left, right) <= cl // 2
    L_out = L - cl
    assert L_out > 0
    start0 = cl // 2 - left        # first original index used by clipped output pos 0

    # L tile: multiple of 128 (lane-dense output stores), ~512 rows to keep the MXU
    # pipeline full, capped so tiny inputs don't over-pad.
    TL = min(_round_up(tile_l, 128), _round_up(L_out, 128))
    assert K - 1 <= TL
    T = pl.cdiv(L_out, TL)
    L_out_pad = T * TL
    L_pad = (T + 1) * TL           # ensures the "next tile" halo block always exists

    compute_dtype = jnp.bfloat16 if use_bf16 else jnp.float32

    # Shift away the constant left offset and zero-pad on the right; padded rows only
    # feed output positions >= L_out, which are sliced off below.
    x_shift = x[:, start0:, :]
    take = min(x_shift.shape[1], L_pad)
    x_pad = jnp.pad(x_shift[:, :take, :], ((0, 0), (0, L_pad - take), (0, 0)))
    x_pad = x_pad.astype(compute_dtype)

    w1col = jnp.reshape(w1, (K * C, H)).astype(compute_dtype)   # im2col weight layout
    wh_c = wh.astype(compute_dtype)
    wlt = jnp.transpose(wl).astype(compute_dtype)               # (3, H)
    b1r = jnp.reshape(b1, (1, H)).astype(jnp.float32)
    bhr = bh.astype(jnp.float32)
    blt = jnp.reshape(bl, (3, 1)).astype(jnp.float32)

    kernel = functools.partial(_lssi_kernel, n_layers=n_layers, taps=K,
                               compute_dtype=compute_dtype)

    wbytes = 2 if use_bf16 else 4
    flops = 2 * N * L_out_pad * (K * C * H + n_layers * H * H + H * 3)
    bytes_accessed = int(2 * N * L_pad * C * wbytes            # x streamed twice (tile + halo)
                         + N * 3 * L_out_pad * 4               # output
                         + (w1col.size + wh_c.size + wlt.size) * wbytes
                         + (b1r.size + bhr.size + blt.size) * 4)

    out = pl.pallas_call(
        kernel,
        out_shape=jax.ShapeDtypeStruct((N, 3, L_out_pad), jnp.float32),
        grid=(N, T),
        in_specs=[
            pl.BlockSpec((1, TL, C), lambda n, t: (n, t, 0)),       # x tile
            pl.BlockSpec((1, TL, C), lambda n, t: (n, t + 1, 0)),   # halo source (next tile)
            pl.BlockSpec((K * C, H), lambda n, t: (0, 0)),
            pl.BlockSpec((1, H), lambda n, t: (0, 0)),
            pl.BlockSpec((n_layers, H, H), lambda n, t: (0, 0, 0)),
            pl.BlockSpec((n_layers, H), lambda n, t: (0, 0)),
            pl.BlockSpec((3, H), lambda n, t: (0, 0)),
            pl.BlockSpec((3, 1), lambda n, t: (0, 0)),
        ],
        out_specs=pl.BlockSpec((1, 3, TL), lambda n, t: (n, 0, t)),
        compiler_params=pltpu.CompilerParams(
            dimension_semantics=("parallel", "parallel"),
            vmem_limit_bytes=32 * 1024 * 1024,
        ),
        cost_estimate=pl.CostEstimate(flops=flops, transcendentals=0,
                                      bytes_accessed=bytes_accessed),
    )(x_pad, x_pad, w1col, b1r, wh_c, bhr, wlt, blt)

    # Back to the module's (N, L - cl, 3) layout.
    return jnp.transpose(out[:, :, :L_out], (0, 2, 1))


def reference(x, params, *, cl, left, right):
    """Pure-JAX f32 reference with identical math (channels-last)."""
    w1, b1, wh, bh, wl, bl = params
    N, L, _ = x.shape
    K, _, H = w1.shape
    L_out = L - cl
    s0 = cl // 2 - left
    h = jnp.zeros((N, L_out, H), jnp.float32)
    for k in range(K):
        h = h + jnp.einsum('nlc,ch->nlh', x[:, s0 + k:s0 + k + L_out, :], w1[k])
    h = jax.nn.relu(h + b1)
    for i in range(wh.shape[0]):
        h = jax.nn.relu(jnp.einsum('nlh,hg->nlg', h, wh[i]) + bh[i])
    return jnp.einsum('nlh,ho->nlo', h, wl) + bl


def init_params(key, *, c_in, hidden, n_layers, kernel_size):
    """Deterministic synthetic parameters (channels-last matmul layout).

    PyTorch Conv1d weight (out, in, k) maps to w1[k, in, out]; 1x1 conv weights
    (out, in, 1) map to (in, out) matrices."""
    ks = jax.random.split(key, 6)
    w1 = 0.1 * jax.random.normal(ks[0], (kernel_size, c_in, hidden), jnp.float32)
    b1 = 0.1 * jax.random.normal(ks[1], (hidden,), jnp.float32)
    wh = 0.1 * jax.random.normal(ks[2], (n_layers, hidden, hidden), jnp.float32)
    bh = 0.1 * jax.random.normal(ks[3], (n_layers, hidden), jnp.float32)
    wl = 0.1 * jax.random.normal(ks[4], (hidden, 3), jnp.float32)
    bl = 0.1 * jax.random.normal(ks[5], (3,), jnp.float32)
    return (w1, b1, wh, bh, wl, bl)


if __name__ == "__main__":
    # Small config consistent with the module: cl even, max(left,right) <= cl // 2.
    N = 2            # batch
    L = 1034         # sequence length -> L_out = 1024 = 2 tiles of 512 (exercises L tiling)
    C_IN = 4         # starting_channels (one-hot RNA)
    HIDDEN = 32      # hidden_size
    N_LAYERS = 3
    CL = 10
    LEFT, RIGHT = 2, 4          # asymmetric_cl
    K = LEFT + RIGHT + 1

    key = jax.random.PRNGKey(0)
    kx, kp = jax.random.split(key)
    x = jax.random.normal(kx, (N, L, C_IN), jnp.float32)   # (N, L, C) channels-last input
    params = init_params(kp, c_in=C_IN, hidden=HIDDEN, n_layers=N_LAYERS, kernel_size=K)

    out = splice_point_identifier(x, params, cl=CL, left=LEFT, right=RIGHT)
    out = jax.block_until_ready(out)

    ref = reference(x, params, cl=CL, left=LEFT, right=RIGHT)
    assert out.shape == (N, L - CL, 3), out.shape
    max_err = float(jnp.max(jnp.abs(out - ref)))
    # bf16 matmul operands with f32 accumulation -> loosened tolerance vs f32 reference.
    assert jnp.allclose(out, ref, atol=3e-2, rtol=3e-2), max_err

    print("KERNEL_OK")
</pallas_src>

<mosaic_0001>
module attributes {stable_mosaic.version = 11 : i64} {
  func.func @_lssi_kernel(%arg0: i32, %arg1: i32, %arg2: memref<1x512x4xbf16, #tpu.memory_space<vmem>>, %arg3: memref<1x512x4xbf16, #tpu.memory_space<vmem>>, %arg4: memref<28x32xbf16, #tpu.memory_space<vmem>>, %arg5: memref<1x32xf32, #tpu.memory_space<vmem>>, %arg6: memref<3x32x32xbf16, #tpu.memory_space<vmem>>, %arg7: memref<3x32xf32, #tpu.memory_space<vmem>>, %arg8: memref<3x32xbf16, #tpu.memory_space<vmem>>, %arg9: memref<3x1xf32, #tpu.memory_space<vmem>>, %arg10: memref<1x3x512xf32, #tpu.memory_space<vmem>>) attributes {dimension_semantics = [#tpu.dimension_semantics<parallel>, #tpu.dimension_semantics<parallel>], iteration_bounds = array<i64: 2, 2>, scalar_prefetch = 0 : i64, scratch_operands = 0 : i64, tpu.core_type = #tpu.core_type<tc>, window_params = [{transform_indices = @transform_0, window_bounds = array<i64: 1, 512, 4>}, {transform_indices = @transform_1, window_bounds = array<i64: 1, 512, 4>}, {pipeline_mode = #tpu.pipeline_mode<synchronous>, transform_indices = @transform_2, window_bounds = array<i64: 28, 32>}, {pipeline_mode = #tpu.pipeline_mode<synchronous>, transform_indices = @transform_3, window_bounds = array<i64: 1, 32>}, {pipeline_mode = #tpu.pipeline_mode<synchronous>, transform_indices = @transform_4, window_bounds = array<i64: 3, 32, 32>}, {pipeline_mode = #tpu.pipeline_mode<synchronous>, transform_indices = @transform_5, window_bounds = array<i64: 3, 32>}, {pipeline_mode = #tpu.pipeline_mode<synchronous>, transform_indices = @transform_6, window_bounds = array<i64: 3, 32>}, {pipeline_mode = #tpu.pipeline_mode<synchronous>, transform_indices = @transform_7, window_bounds = array<i64: 3, 1>}, {transform_indices = @transform_8, window_bounds = array<i64: 1, 3, 512>}]} {
    %c0 = arith.constant 0 : index
    %c0_0 = arith.constant 0 : index
    %c0_1 = arith.constant 0 : index
    %0 = vector.load %arg2[%c0, %c0_0, %c0_1] : memref<1x512x4xbf16, #tpu.memory_space<vmem>>, vector<1x512x4xbf16>
    %1 = vector.shape_cast %0 : vector<1x512x4xbf16> to vector<512x4xbf16>
    %c0_2 = arith.constant 0 : index
    %c0_3 = arith.constant 0 : index
    %c0_4 = arith.constant 0 : index
    %2 = vector.load %arg3[%c0_2, %c0_3, %c0_4] : memref<1x512x4xbf16, #tpu.memory_space<vmem>>, vector<1x6x4xbf16>
    %3 = vector.shape_cast %2 : vector<1x6x4xbf16> to vector<6x4xbf16>
    %4 = tpu.concatenate %1, %3 in 0 : vector<512x4xbf16>, vector<6x4xbf16> -> vector<518x4xbf16>
    %5 = vector.extract_strided_slice %4 {offsets = [0, 0], sizes = [512, 4], strides = [1, 1]} : vector<518x4xbf16> to vector<512x4xbf16>
    %6 = vector.extract_strided_slice %4 {offsets = [1, 0], sizes = [512, 4], strides = [1, 1]} : vector<518x4xbf16> to vector<512x4xbf16>
    %7 = vector.extract_strided_slice %4 {offsets = [2, 0], sizes = [512, 4], strides = [1, 1]} : vector<518x4xbf16> to vector<512x4xbf16>
    %8 = vector.extract_strided_slice %4 {offsets = [3, 0], sizes = [512, 4], strides = [1, 1]} : vector<518x4xbf16> to vector<512x4xbf16>
    %9 = vector.extract_strided_slice %4 {offsets = [4, 0], sizes = [512, 4], strides = [1, 1]} : vector<518x4xbf16> to vector<512x4xbf16>
    %10 = vector.extract_strided_slice %4 {offsets = [5, 0], sizes = [512, 4], strides = [1, 1]} : vector<518x4xbf16> to vector<512x4xbf16>
    %11 = vector.extract_strided_slice %4 {offsets = [6, 0], sizes = [512, 4], strides = [1, 1]} : vector<518x4xbf16> to vector<512x4xbf16>
    %12 = tpu.concatenate %5, %6, %7, %8, %9, %10, %11 in 1 : vector<512x4xbf16>, vector<512x4xbf16>, vector<512x4xbf16>, vector<512x4xbf16>, vector<512x4xbf16>, vector<512x4xbf16>, vector<512x4xbf16> -> vector<512x28xbf16>
    %c0_5 = arith.constant 0 : index
    %c0_6 = arith.constant 0 : index
    %13 = vector.load %arg4[%c0_5, %c0_6] : memref<28x32xbf16, #tpu.memory_space<vmem>>, vector<28x32xbf16>
    %cst = arith.constant dense<0.000000e+00> : vector<512x32xf32>
    %14 = tpu.matmul %12, %13, %cst {dimension_numbers = #tpu.dot_dimension_numbers<[1], [0], [0], [1], [0, 0, 1, 1], [], []>} : vector<512x28xbf16>, vector<28x32xbf16>, vector<512x32xf32> -> vector<512x32xf32>
    %c0_7 = arith.constant 0 : index
    %c0_8 = arith.constant 0 : index
    %15 = vector.load %arg5[%c0_7, %c0_8] : memref<1x32xf32, #tpu.memory_space<vmem>>, vector<1x32xf32>
    %16 = vector.shape_cast %15 : vector<1x32xf32> to vector<32xf32>
    %17 = vector.shape_cast %16 : vector<32xf32> to vector<1x32xf32>
    %18 = vector.broadcast %17 : vector<1x32xf32> to vector<512x32xf32>
    %19 = arith.addf %14, %18 : vector<512x32xf32>
    %cst_9 = arith.constant 0.000000e+00 : f32
    %20 = vector.broadcast %cst_9 : f32 to vector<512x32xf32>
    %21 = arith.maximumf %19, %20 : vector<512x32xf32>
    %22 = arith.truncf %21 : vector<512x32xf32> to vector<512x32xbf16>
    %c0_10 = arith.constant 0 : index
    %c0_11 = arith.constant 0 : index
    %c0_12 = arith.constant 0 : index
    %23 = vector.load %arg6[%c0_10, %c0_11, %c0_12] : memref<3x32x32xbf16, #tpu.memory_space<vmem>>, vector<1x32x32xbf16>
    %24 = vector.shape_cast %23 : vector<1x32x32xbf16> to vector<32x32xbf16>
    %cst_13 = arith.constant dense<0.000000e+00> : vector<512x32xf32>
    %25 = tpu.matmul %22, %24, %cst_13 {dimension_numbers = #tpu.dot_dimension_numbers<[1], [0], [0], [1], [0, 0, 1, 1], [], []>} : vector<512x32xbf16>, vector<32x32xbf16>, vector<512x32xf32> -> vector<512x32xf32>
    %c0_14 = arith.constant 0 : index
    %c0_15 = arith.constant 0 : index
    %26 = vector.load %arg7[%c0_14, %c0_15] : memref<3x32xf32, #tpu.memory_space<vmem>>, vector<1x32xf32>
    %27 = vector.shape_cast %26 : vector<1x32xf32> to vector<32xf32>
    %28 = vector.shape_cast %27 : vector<32xf32> to vector<1x32xf32>
    %29 = vector.broadcast %28 : vector<1x32xf32> to vector<512x32xf32>
    %30 = arith.addf %25, %29 : vector<512x32xf32>
    %cst_16 = arith.constant 0.000000e+00 : f32
    %31 = vector.broadcast %cst_16 : f32 to vector<512x32xf32>
    %32 = arith.maximumf %30, %31 : vector<512x32xf32>
    %33 = arith.truncf %32 : vector<512x32xf32> to vector<512x32xbf16>
    %c1 = arith.constant 1 : index
    %c0_17 = arith.constant 0 : index
    %c0_18 = arith.constant 0 : index
    %34 = vector.load %arg6[%c1, %c0_17, %c0_18] : memref<3x32x32xbf16, #tpu.memory_space<vmem>>, vector<1x32x32xbf16>
    %35 = vector.shape_cast %34 : vector<1x32x32xbf16> to vector<32x32xbf16>
    %cst_19 = arith.constant dense<0.000000e+00> : vector<512x32xf32>
    %36 = tpu.matmul %33, %35, %cst_19 {dimension_numbers = #tpu.dot_dimension_numbers<[1], [0], [0], [1], [0, 0, 1, 1], [], []>} : vector<512x32xbf16>, vector<32x32xbf16>, vector<512x32xf32> -> vector<512x32xf32>
    %c1_20 = arith.constant 1 : index
    %c0_21 = arith.constant 0 : index
    %37 = vector.load %arg7[%c1_20, %c0_21] : memref<3x32xf32, #tpu.memory_space<vmem>>, vector<1x32xf32>
    %38 = vector.shape_cast %37 : vector<1x32xf32> to vector<32xf32>
    %39 = vector.shape_cast %38 : vector<32xf32> to vector<1x32xf32>
    %40 = vector.broadcast %39 : vector<1x32xf32> to vector<512x32xf32>
    %41 = arith.addf %36, %40 : vector<512x32xf32>
    %cst_22 = arith.constant 0.000000e+00 : f32
    %42 = vector.broadcast %cst_22 : f32 to vector<512x32xf32>
    %43 = arith.maximumf %41, %42 : vector<512x32xf32>
    %44 = arith.truncf %43 : vector<512x32xf32> to vector<512x32xbf16>
    %c2 = arith.constant 2 : index
    %c0_23 = arith.constant 0 : index
    %c0_24 = arith.constant 0 : index
    %45 = vector.load %arg6[%c2, %c0_23, %c0_24] : memref<3x32x32xbf16, #tpu.memory_space<vmem>>, vector<1x32x32xbf16>
    %46 = vector.shape_cast %45 : vector<1x32x32xbf16> to vector<32x32xbf16>
    %cst_25 = arith.constant dense<0.000000e+00> : vector<512x32xf32>
    %47 = tpu.matmul %44, %46, %cst_25 {dimension_numbers = #tpu.dot_dimension_numbers<[1], [0], [0], [1], [0, 0, 1, 1], [], []>} : vector<512x32xbf16>, vector<32x32xbf16>, vector<512x32xf32> -> vector<512x32xf32>
    %c2_26 = arith.constant 2 : index
    %c0_27 = arith.constant 0 : index
    %48 = vector.load %arg7[%c2_26, %c0_27] : memref<3x32xf32, #tpu.memory_space<vmem>>, vector<1x32xf32>
    %49 = vector.shape_cast %48 : vector<1x32xf32> to vector<32xf32>
    %50 = vector.shape_cast %49 : vector<32xf32> to vector<1x32xf32>
    %51 = vector.broadcast %50 : vector<1x32xf32> to vector<512x32xf32>
    %52 = arith.addf %47, %51 : vector<512x32xf32>
    %cst_28 = arith.constant 0.000000e+00 : f32
    %53 = vector.broadcast %cst_28 : f32 to vector<512x32xf32>
    %54 = arith.maximumf %52, %53 : vector<512x32xf32>
    %c0_29 = arith.constant 0 : index
    %c0_30 = arith.constant 0 : index
    %55 = vector.load %arg8[%c0_29, %c0_30] : memref<3x32xbf16, #tpu.memory_space<vmem>>, vector<3x32xbf16>
    %56 = arith.truncf %54 : vector<512x32xf32> to vector<512x32xbf16>
    %cst_31 = arith.constant dense<0.000000e+00> : vector<3x512xf32>
    %57 = tpu.matmul %55, %56, %cst_31 {dimension_numbers = #tpu.dot_dimension_numbers<[1], [1], [0], [0], [0, 0, 1, 0], [], []>} : vector<3x32xbf16>, vector<512x32xbf16>, vector<3x512xf32> -> vector<3x512xf32>
    %c0_32 = arith.constant 0 : index
    %c0_33 = arith.constant 0 : index
    %58 = vector.load %arg9[%c0_32, %c0_33] : memref<3x1xf32, #tpu.memory_space<vmem>>, vector<3x1xf32>
    %59 = vector.broadcast %58 : vector<3x1xf32> to vector<3x512xf32>
    %60 = arith.addf %57, %59 : vector<3x512xf32>
    %c0_34 = arith.constant 0 : index
    %c0_35 = arith.constant 0 : index
    %c0_36 = arith.constant 0 : index
    %61 = vector.load %arg10[%c0_34, %c0_35, %c0_36] : memref<1x3x512xf32, #tpu.memory_space<vmem>>, vector<1x3x512xf32>
    %62 = vector.shape_cast %61 : vector<1x3x512xf32> to vector<3x512xf32>
    %63 = vector.shape_cast %60 : vector<3x512xf32> to vector<1x3x512xf32>
    tpu.vector_store %arg10[%c0_34, %c0_35, %c0_36], %63 {strides = array<i32>} : memref<1x3x512xf32, #tpu.memory_space<vmem>>, vector<1x3x512xf32>,
    return
  }
  func.func @transform_0(%arg0: i32, %arg1: i32) -> (i32, i32, i32) {
    %c0_i32 = arith.constant 0 : i32
    %c0_i32_0 = arith.constant 0 : i32
    return %arg0, %arg1, %c0_i32 : i32, i32, i32
  }
  func.func @transform_1(%arg0: i32, %arg1: i32) -> (i32, i32, i32) {
    %c1_i32 = arith.constant 1 : i32
    %0 = arith.addi %arg1, %c1_i32 : i32
    %c0_i32 = arith.constant 0 : i32
    %c0_i32_0 = arith.constant 0 : i32
    return %arg0, %0, %c0_i32 : i32, i32, i32
  }
  func.func @transform_2(%arg0: i32, %arg1: i32) -> (i32, i32) {
    %c0_i32 = arith.constant 0 : i32
    %c0_i32_0 = arith.constant 0 : i32
    %c0_i32_1 = arith.constant 0 : i32
    return %c0_i32, %c0_i32_0 : i32, i32
  }
  func.func @transform_3(%arg0: i32, %arg1: i32) -> (i32, i32) {
    %c0_i32 = arith.constant 0 : i32
    %c0_i32_0 = arith.constant 0 : i32
    %c0_i32_1 = arith.constant 0 : i32
    return %c0_i32, %c0_i32_0 : i32, i32
  }
  func.func @transform_4(%arg0: i32, %arg1: i32) -> (i32, i32, i32) {
    %c0_i32 = arith.constant 0 : i32
    %c0_i32_0 = arith.constant 0 : i32
    %c0_i32_1 = arith.constant 0 : i32
    %c0_i32_2 = arith.constant 0 : i32
    return %c0_i32, %c0_i32_0, %c0_i32_1 : i32, i32, i32
  }
  func.func @transform_5(%arg0: i32, %arg1: i32) -> (i32, i32) {
    %c0_i32 = arith.constant 0 : i32
    %c0_i32_0 = arith.constant 0 : i32
    %c0_i32_1 = arith.constant 0 : i32
    return %c0_i32, %c0_i32_0 : i32, i32
  }
  func.func @transform_6(%arg0: i32, %arg1: i32) -> (i32, i32) {
    %c0_i32 = arith.constant 0 : i32
    %c0_i32_0 = arith.constant 0 : i32
    %c0_i32_1 = arith.constant 0 : i32
    return %c0_i32, %c0_i32_0 : i32, i32
  }
  func.func @transform_7(%arg0: i32, %arg1: i32) -> (i32, i32) {
    %c0_i32 = arith.constant 0 : i32
    %c0_i32_0 = arith.constant 0 : i32
    %c0_i32_1 = arith.constant 0 : i32
    return %c0_i32, %c0_i32_0 : i32, i32
  }
  func.func @transform_8(%arg0: i32, %arg1: i32) -> (i32, i32, i32) {
    %c0_i32 = arith.constant 0 : i32
    %c0_i32_0 = arith.constant 0 : i32
    return %arg0, %c0_i32, %arg1 : i32, i32, i32
  }
}

</mosaic_0001>

<bundles_post_ra>
// kernel: tpu_custom_call.1
= control target key start
LH: loop header
LB: loop body
LE: loop exit
PB: predicated region body
PF: predicated region fallthrough
CT: control target
= control target key end

     0   :  { %s5254_s27 = smov 0   ;;  %s5256_s28 = smov 0   ;;  %s7301_s0 = inlined_call_operand.vmem [shape: bf16[2,1536,4], index: 0, kind: input, shape index: {}]   ;;  %s7302_s1 = inlined_call_operand.vmem [shape: bf16[2,1536,4], index: 1, kind: input, shape index: {}]   ;;  %s7303_s2 = inlined_call_operand.vmem [shape: bf16[28,32], index: 2, kind: input, shape index: {}]   ;;  %s7304_s3 = inlined_call_operand.vmem [shape: f32[1,32], index: 3, kind: input, shape index: {}]   ;;  %s7305_s4 = inlined_call_operand.vmem [shape: bf16[3,32,32], index: 4, kind: input, shape index: {}]   ;;  %s7306_s5 = inlined_call_operand.vmem [shape: f32[3,32], index: 5, kind: input, shape index: {}]   ;;  %s7307_s6 = inlined_call_operand.vmem [shape: bf16[3,32], index: 6, kind: input, shape index: {}]   ;;  %s7308_s7 = inlined_call_operand.vmem [shape: f32[3,1], index: 7, kind: input, shape index: {}]   ;;  %s7309_s8 = inlined_call_operand.vmem [shape: f32[2,3,1024], index: 8, kind: output, shape index: {}]  }
   0x1   :  { %s5258_s29 = smov 0   ;;  %s5260_s30 = smov 0  }
   0x2   :  { %s5262_s9 = smov 0  }
   0x3 LB: > { %s27_s10 = sadd.s32 1, %s5192_s29  ;;  %s30_s11 = sadd.s32 1, %s5196_s30  ;;  %s5200_s9 = sphi %s5262_s9, %s18_s9   ;;  %s5196_s30 = sphi %s5260_s30, %s7314_s30   ;;  %s5192_s29 = sphi %s5258_s29, %s7313_s29   ;;  %s5188_s28 = sphi %s5256_s28, %s7312_s28   ;;  %s5184_s27 = sphi %s5254_s27, %s7311_s27  }
   0x4   : > { %p28_p0 = scmp.ge.s32.totalorder %s27_s10, 2  ;;  %p4409_p1 = scmp.ge.s32.totalorder %s5200_s9, 1 }
   0x5   : > { %p304_p2 = scmp.lt.s32.totalorder %s5200_s9, 5 }
   0x6   : > { %s7316_s10 = smov (%p28_p0, %s27_s10), 0  ;;  %s7318_s11 = smov (!%p28_p0, %s30_s11), %s5196_s30 }
   0x7   : > { %p305_p3 = pnand %p4409_p1, %p304_p2  ;;  %p32_p4 = scmp.ge.s32.totalorder %s7318_s11, 2 }
   0x8   : > { %s5287_s12 = sshll.u32 (!%p305_p3), %s5184_s27, 6  ;;  %p357_p5 = scmp.lt.s32.totalorder (!%p305_p3), %s5188_s28, 1  ;;  %vm1268_vm0 = vcmask (!%p305_p3), 1045504   ;;  %vm614_vm1 = vsmask.f32 (!%p305_p3), 7424  ;;  %vm940_vm2 = vcmask (!%p305_p3), 1046528  }
   0x9   : > { %s7320_s11 = smov (%p32_p4, %s7318_s11), 0  ;;  %308 = sbr.rel (%p305_p3) target bundleno = 1646 (0x66e), region = 52 }
   0xa   : > { %p359_p6 = scmp.lt.s32.totalorder (!%p305_p3), %s5287_s12, 191  ;;  %vm1070_vm3 = vsmask.f32 (!%p305_p3), 6400  ;;  %s5202_s20 = smov (!%p305_p3), 16   ;;  %vm1398_vm4 = vsmask.f32 (!%p305_p3), 5376 }
   0xb   : > { %s5203_s21 = smov (!%p305_p3), 8   ;;  %s5204_s22 = smov (!%p305_p3), 4   ;;  %v5126_v51 = vld [vmem:[%s7303_s2] sm:$0xff] (!%p305_p3)   ;;  %v5366_v52 = vld [vmem:[%s7303_s2 + $0x8] sm:$0x3f] (!%p305_p3)   ;;  %vm1594_vm5 = vcmask (!%p305_p3), 1044480  }
   0xc   : > { %s5205_s23 = smov (!%p305_p3), 12   ;;  %4775 = vmatprep.subr.bf16.mxu0 (!%p305_p3), %v5126_v51  ;;  %vm1724_vm6 = vcmask (!%p305_p3), 31744   ;;  %vm1789_vm7 = vcmask (!%p305_p3), 64512   ;;  %vm1854_vm8 = vcmask (!%p305_p3), 97280   ;;  %vm1919_vm9 = vcmask (!%p305_p3), 130048   ;;  %s4602_s26 = sadd.s32 (!%p305_p3), 64, %s5287_s12 }
   0xd   : > { %4776 = vmatpush3.bf16.msra.mxu0 (!%p305_p3), %v5126_v51  ;;  %vm1984_vm10 = vcmask (!%p305_p3), 162816   ;;  %vm2049_vm11 = vcmask (!%p305_p3), 195584   ;;  %vm2136_vm12 = vcmask (!%p305_p3), 228352   ;;  %p6523_p7 = scmp.lt.s32.totalorder (!%p305_p3), %s4602_s26, 191  ;;  %vm2611_vm13 = vcmask (!%p305_p3), 261120  }
   0xe   : > { %5047 = vmatprep.subr.msk.bf16.mxu0 (!%p305_p3), %vm1268_vm0, %v5366_v52 }
  0x10   : > { %s7322_s28 = smov (!%p357_p5, %s5188_s28), 1  ;;  %s7324_s26 = smov (!%p6523_p7, %s4602_s26), 191 }
  0x11   : > { %s360_s13 = scalar_select %p359_p6, %s5287_s12, 191 }
  0x12   : > { %s5064_s14 = smul.u32 192, %s7322_s28 }
  0x14   : > { %s362_s15 = sadd.s32 %s5064_s14, %s360_s13  ;;  %s373_s13 = sadd.s32 %s5064_s14, %s7324_s26 }
  0x15   : > { %s4411_s16 = sshll.u32 %s362_s15, 2  ;;  %s5206_s15 = smov 20  }
  0x16   : > { %s5299_s19 = scalar_lea.vmem %s7301_s0, %s4411_s16  ;;  %s5207_s16 = smov 24  }
  0x17   : > { %v5302_v0 = vld [vmem:[%s5299_s19] sm:$0xff]   ;;  %v5305_v1 = vld [vmem:[%s5299_s19 + $0x8] sm:$0xff]   ;;  %v5308_v2 = vld [vmem:[%s5299_s19 + $0x10] sm:$0xff]   ;;  %s4413_s17 = sshll.u32 %s373_s13, 2 }
  0x18   : > { %v1269_v3 = vrot.slane %v5302_v0, 2  ;;  %v1270_v4 = vrot.slane %v5305_v1, 2  ;;  %v941_v5 = vrot.slane %v5302_v0, 1  ;;  %v942_v6 = vrot.slane %v5305_v1, 1  ;;  %v5334_v29 = vld [vmem:[%s5299_s19 + $0x18] sm:$0xff]   ;;  %v5353_v45 = vld [vmem:[%s5299_s19 + $0x20] sm:$0xff]   ;;  %s375_s24 = scalar_lea.vmem %s7302_s1, %s4413_s17 }
  0x19   : > { %v944_v7 = vrot.slane %v5308_v2, 1  ;;  %v616_v8 = vshrl.u32 %v5302_v0, 16  ;;  %v618_v9 = vshll.u32 %v5302_v0, 16  ;;  %v623_v10 = vshll.u32 %v5305_v1, 16 }
  0x1a   : > { %v1271_v11 = vsel %vm1268_vm0, %v1269_v3, %v1270_v4  ;;  %v943_v12 = vsel %vm940_vm2, %v941_v5, %v942_v6  ;;  %v627_v13 = vshrl.u32 %v5305_v1, 16  ;;  %v1272_v16 = vrot.slane %v5308_v2, 2 }
  0x1b   : > { %1334 = vrot.lane.b32.xlu0 %v1271_v11, %s5202_s20  ;;  %1006 = vrot.lane.b32.xlu1 %v943_v12, %s5203_s21  ;;  %v620_v14 = vrot.slane %v618_v9, 1  ;;  %v625_v15 = vrot.slane %v623_v10, 1  ;;  %v5325_v17 = vshll.u32 %v5308_v2, 16  ;;  %v945_v18 = vsel %vm940_vm2, %v942_v6, %v944_v7 }
  0x1c   : > { %v635_v19 = vshrl.u32 %v5308_v2, 16  ;;  %v1074_v20 = vrot.slane %v627_v13, 1  ;;  %v1075_v21 = vrot.slane %v623_v10, 2  ;;  %v1071_v27 = vrot.slane %v616_v8, 1 }
  0x1d   : > { %v621_v22 = vor.u32 %v620_v14, %v616_v8  ;;  %v629_v23 = vor.u32 %v627_v13, %v625_v15  ;;  %v633_v24 = vrot.slane %v5325_v17, 1  ;;  %v1079_v25 = vrot.slane %v5325_v17, 2 }
  0x1e   : > { %v1078_v26 = vrot.slane %v635_v19, 1  ;;  %v1072_v28 = vrot.slane %v618_v9, 2  ;;  %v1273_v31 = vsel %vm1268_vm0, %v1270_v4, %v1272_v16  ;;  %v1402_v32 = vrot.slane %v627_v13, 2 }
  0x1f   : > { %1008 = vrot.lane.b32.xlu1 %v945_v18, %s5203_s21  ;;  %v626_v30 = vsel %vm614_vm1, %v621_v22, %v625_v15  ;;  %v1403_v33 = vrot.slane %v623_v10, 3  ;;  %v1076_v34 = vor.u32 %v1075_v21, %v1074_v20  ;;  %v1406_v36 = vrot.slane %v635_v19, 2  ;;  %v5407_v20 = vld [vmem:[%s5299_s19 + $0x28] sm:$0xff]  }
  0x20   : > { %875 = vrot.lane.b32.xlu0 %v626_v30, %s5204_s22  ;;  %v5342_v35 = vor.u32 %v1079_v25, %v1078_v26  ;;  %v1407_v37 = vrot.slane %v5325_v17, 3  ;;  %v634_v38 = vsel %vm614_vm1, %v629_v23, %v633_v24  ;;  %v1073_v39 = vor.u32 %v1072_v28, %v1071_v27  ;;  %v5424_v30 = vld [vmem:[%s5299_s19 + $0x30] sm:$0xff]  }
  0x21   : > { %v1399_v40 = vrot.slane %v616_v8, 2  ;;  %v1400_v41 = vrot.slane %v618_v9, 3  ;;  %v1404_v43 = vor.u32 %v1403_v33, %v1402_v32  ;;  %v639_v46 = vshll.u32 %v5334_v29, 16 }
  0x22   : > { %v1081_v42 = vsel %vm1070_vm3, %v1076_v34, %v5342_v35  ;;  %v5350_v44 = vor.u32 %v1407_v37, %v1406_v36  ;;  %v1077_v47 = vsel %vm1070_vm3, %v1073_v39, %v1076_v34  ;;  %v1596_v49 = vrot.slane %v5305_v1, 3 }
  0x23   : > { %1336 = vrot.lane.b32.xlu1 %v1273_v31, %s5202_s20  ;;  %v1401_v48 = vor.u32 %v1400_v41, %v1399_v40  ;;  %v1598_v50 = vrot.slane %v5308_v2, 3  ;;  %v641_v54 = vrot.slane %v639_v46, 1  ;;  %v643_v55 = vshrl.u32 %v5334_v29, 16 }
  0x24   : > { %877 = vrot.lane.b32.xlu0 %v634_v38, %s5204_s22  ;;  %v1409_v53 = vsel %vm1398_vm4, %v1404_v43, %v5350_v44  ;;  %v5373_v56 = vshll.u32 %v5353_v45, 16  ;;  %v1595_v58 = vrot.slane %v5302_v0, 3  ;;  %v651_v62 = vshrl.u32 %v5353_v45, 16 }
  0x25   : > { %v1405_v57 = vsel %vm1398_vm4, %v1401_v48, %v1404_v43  ;;  %v1599_v59 = vsel %vm1594_vm5, %v1596_v49, %v1598_v50  ;;  %v645_v60 = vor.u32 %v643_v55, %v641_v54  ;;  %v637_v3 = vor.u32 %v635_v19, %v633_v24 }
  0x26   : > { %v649_v61 = vrot.slane %v5373_v56, 1  ;;  %v1597_v63 = vsel %vm1594_vm5, %v1595_v58, %v1596_v49  ;;  %v946_v4 = vrot.slane %v5334_v29, 1  ;;  %v948_v5 = vrot.slane %v5353_v45, 1 }
  0x27   : > { %1206 = vrot.lane.b32.xlu1 %v1081_v42, %s5205_s23  ;;  %v1082_v6 = vrot.slane %v643_v55, 1  ;;  %v1083_v8 = vrot.slane %v639_v46, 2  ;;  %v1086_v10 = vrot.slane %v651_v62, 1  ;;  %v1087_v11 = vrot.slane %v5373_v56, 2 }
  0x28   : > { %1204 = vrot.lane.b32.xlu0 %v1077_v47, %s5205_s23  ;;  %v650_v9 = vsel %vm614_vm1, %v645_v60, %v649_v61  ;;  %v642_v12 = vsel %vm614_vm1, %v637_v3, %v641_v54  ;;  %v949_v13 = vsel %vm940_vm2, %v946_v4, %v948_v5  ;;  %v947_v17 = vsel %vm940_vm2, %v944_v7, %v946_v4 }
  0x29   : > { %v1084_v14 = vor.u32 %v1083_v8, %v1082_v6  ;;  %v5399_v15 = vor.u32 %v1087_v11, %v1086_v10  ;;  %v1274_v18 = vrot.slane %v5334_v29, 2  ;;  %v1276_v19 = vrot.slane %v5353_v45, 2  ;;  %v5477_v6 = vld [vmem:[%s5299_s19 + $0x38] sm:$0xff]  }
  0x2a   : > { %v1410_v21 = vrot.slane %v643_v55, 2  ;;  %v1411_v22 = vrot.slane %v639_v46, 3  ;;  %v1414_v24 = vrot.slane %v651_v62, 2  ;;  %v1415_v25 = vrot.slane %v5373_v56, 3 }
  0x2b   : > { %1532 = vrot.lane.b32.xlu1 %v1409_v53, %s5206_s15  ;;  %v1089_v23 = vsel %vm1070_vm3, %v1084_v14, %v5399_v15  ;;  %v1085_v7 = vsel %vm1070_vm3, %v5342_v35, %v1084_v14  ;;  %v1277_v26 = vsel %vm1268_vm0, %v1274_v18, %v1276_v19  ;;  %v655_v31 = vshll.u32 %v5407_v20, 16 }
  0x2c   : > { %1530 = vrot.lane.b32.xlu0 %v1405_v57, %s5206_s15  ;;  %v1412_v27 = vor.u32 %v1411_v22, %v1410_v21  ;;  %v5421_v28 = vor.u32 %v1415_v25, %v1414_v24  ;;  %v1275_v32 = vsel %vm1268_vm0, %v1272_v16, %v1274_v18  ;;  %v1600_v33 = vrot.slane %v5334_v29, 3 }
  0x2d   : > { %v1602_v34 = vrot.slane %v5353_v45, 3  ;;  %v657_v36 = vrot.slane %v655_v31, 1  ;;  %v659_v37 = vshrl.u32 %v5407_v20, 16  ;;  %v5438_v38 = vshll.u32 %v5424_v30, 16 }
  0x2e   : > { %v1417_v35 = vsel %vm1398_vm4, %v1412_v27, %v5421_v28  ;;  %v1413_v16 = vsel %vm1398_vm4, %v5350_v44, %v1412_v27  ;;  %v667_v42 = vshrl.u32 %v5424_v30, 16  ;;  %v1601_v43 = vsel %vm1594_vm5, %v1598_v50, %v1600_v33 }
  0x2f   : > { %1662 = vrot.lane.b32.xlu1 %v1599_v59, %s5207_s16  ;;  %v1603_v39 = vsel %vm1594_vm5, %v1600_v33, %v1602_v34  ;;  %v661_v40 = vor.u32 %v659_v37, %v657_v36  ;;  %v665_v41 = vrot.slane %v5438_v38, 1  ;;  %v653_v46 = vor.u32 %v651_v62, %v649_v61 }
  0x30   : > { %1660 = vrot.lane.b32.xlu0 %v1597_v63, %s5207_s16  ;;  %v950_v44 = vrot.slane %v5407_v20, 1  ;;  %v952_v47 = vrot.slane %v5424_v30, 1  ;;  %v1090_v48 = vrot.slane %v659_v37, 1  ;;  %v1091_v51 = vrot.slane %v655_v31, 2 }
  0x31   : > { %v666_v49 = vsel %vm614_vm1, %v661_v40, %v665_v41  ;;  %v1094_v53 = vrot.slane %v667_v42, 1  ;;  %v1095_v54 = vrot.slane %v5438_v38, 2  ;;  %v658_v55 = vsel %vm614_vm1, %v653_v46, %v657_v36 }
  0x32   : > { %v953_v50 = vsel %vm940_vm2, %v950_v44, %v952_v47  ;;  %v1092_v56 = vor.u32 %v1091_v51, %v1090_v48  ;;  %v951_v58 = vsel %vm940_vm2, %v948_v5, %v950_v44  ;;  %v1278_v59 = vrot.slane %v5407_v20, 2  ;;  %v5539_v51 = vld [vmem:[%s5299_s19 + $0x48] sm:$0xff]  }
  0x33   : > { %881 = vrot.lane.b32.xlu1 %v650_v9, %s5204_s22  ;;  %v5464_v57 = vor.u32 %v1095_v54, %v1094_v53  ;;  %v1280_v60 = vrot.slane %v5424_v30, 2  ;;  %v1418_v61 = vrot.slane %v659_v37, 2  ;;  %v1419_v62 = vrot.slane %v655_v31, 3 }
  0x34   : > { %879 = vrot.lane.b32.xlu0 %v642_v12, %s5204_s22  ;;  %v1422_v3 = vrot.slane %v667_v42, 2  ;;  %v1423_v4 = vrot.slane %v5438_v38, 3  ;;  %v2203_v5 = vsel %vm1268_vm0, %v5366_v52, 0  ;;  %v1093_v8 = vsel %vm1070_vm3, %v5399_v15, %v1092_v56  ;;  %v5491_v12 = vld [vmem:[%s5299_s19 + $0x40] sm:$0xff]  }
  0x35   : > { %v1097_v63 = vsel %vm1070_vm3, %v1092_v56, %v5464_v57  ;;  %4778 = vmatpush3.bf16.msra.mxu0 %v2203_v5  ;;  %v1281_v9 = vsel %vm1268_vm0, %v1278_v59, %v1280_v60  ;;  %v1420_v10 = vor.u32 %v1419_v62, %v1418_v61  ;;  %v1279_v52 = vsel %vm1268_vm0, %v1276_v19, %v1278_v59 }
  0x36   : > { %v5488_v11 = vor.u32 %v1423_v4, %v1422_v3  ;;  %v1604_v14 = vrot.slane %v5407_v20, 3  ;;  %v1606_v15 = vrot.slane %v5424_v30, 3  ;;  %v675_v21 = vshrl.u32 %v5477_v6, 16 }
  0x37   : > { %1012 = vrot.lane.b32.xlu1 %v949_v13, %s5203_s21  ;;  %v671_v13 = vshll.u32 %v5477_v6, 16  ;;  %v679_v22 = vshll.u32 %v5491_v12, 16  ;;  %v669_v27 = vor.u32 %v667_v42, %v665_v41  ;;  %v956_v31 = vrot.slane %v5491_v12, 1 }
  0x38   : > { %1010 = vrot.lane.b32.xlu0 %v947_v17, %s5203_s21  ;;  %v1425_v17 = vsel %vm1398_vm4, %v1420_v10, %v5488_v11  ;;  %v1607_v19 = vsel %vm1594_vm5, %v1604_v14, %v1606_v15  ;;  %v1282_v41 = vrot.slane %v5477_v6, 2  ;;  %v1284_v42 = vrot.slane %v5491_v12, 2 }
  0x39   : > { %v673_v18 = vrot.slane %v671_v13, 1  ;;  %v681_v25 = vrot.slane %v679_v22, 1  ;;  %v1103_v37 = vrot.slane %v679_v22, 2  ;;  %v1427_v44 = vrot.slane %v671_v13, 3 }
  0x3a   : > { %v1285_v53 = vsel %vm1268_vm0, %v1282_v41, %v1284_v42  ;;  %v687_v56 = vshll.u32 %v5539_v51, 16  ;;  %v1610_v59 = vrot.slane %v5491_v12, 3 }
  0x3b   : > { %1210 = vrot.lane.b32.xlu1 %v1089_v23, %s5205_s23  ;;  %v1421_v23 = vsel %vm1398_vm4, %v5421_v28, %v1420_v10  ;;  %v677_v24 = vor.u32 %v675_v21, %v673_v18  ;;  %v954_v28 = vrot.slane %v5477_v6, 1  ;;  %v674_v38 = vsel %vm614_vm1, %v669_v27, %v673_v18 }
  0x3c   : > { %1208 = vrot.lane.b32.xlu0 %v1085_v7, %s5205_s23  ;;  %v683_v7 = vshrl.u32 %v5491_v12, 16  ;;  %v689_v62 = vrot.slane %v687_v56, 1  ;;  %v1107_v18 = vrot.slane %v687_v56, 2 }
  0x3d   : > { %v682_v33 = vsel %vm614_vm1, %v677_v24, %v681_v25  ;;  %v955_v40 = vsel %vm940_vm2, %v952_v47, %v954_v28 }
  0x3e   : > { %v1102_v36 = vrot.slane %v683_v7, 1  ;;  %v1430_v48 = vrot.slane %v683_v7, 2 }
  0x3f   : > { %1340 = vrot.lane.b32.xlu1 %v1277_v26, %s5202_s20  ;;  %v1605_v26 = vsel %vm1594_vm5, %v1602_v34, %v1604_v14  ;;  %v957_v34 = vsel %vm940_vm2, %v954_v28, %v956_v31 }
  0x40   : > { %1338 = vrot.lane.b32.xlu0 %v1275_v32, %s5202_s20  ;;  %v1098_v32 = vrot.slane %v675_v21, 1 }
  0x43   : > { %1536 = vrot.lane.b32.xlu1 %v1417_v35, %s5206_s15  ;;  %v1099_v35 = vrot.slane %v671_v13, 2  ;;  %v685_v13 = vor.u32 %v683_v7, %v681_v25  ;;  %v1286_v7 = vrot.slane %v5539_v51, 2 }
  0x44   : > { %1534 = vrot.lane.b32.xlu0 %v1413_v16, %s5206_s15 }
  0x45   : > { %v1100_v16 = vor.u32 %v1099_v35, %v1098_v32  ;;  %v1435_v32 = vrot.slane %v687_v56, 3 }
  0x47   : > { %1666 = vrot.lane.b32.xlu1 %v1603_v39, %s5207_s16  ;;  %v5527_v39 = vor.u32 %v1103_v37, %v1102_v36  ;;  %v1101_v47 = vsel %vm1070_vm3, %v5464_v57, %v1100_v16  ;;  %v1608_v57 = vrot.slane %v5477_v6, 3  ;;  %v5604_v36 = vld [vmem:[%s5299_s19 + $0x58] sm:$0xff]  }
  0x48   : > { %1664 = vrot.lane.b32.xlu0 %v1601_v43, %s5207_s16  ;;  %v1426_v43 = vrot.slane %v675_v21, 2 }
  0x49   : > { %v1105_v46 = vsel %vm1070_vm3, %v1100_v16, %v5527_v39  ;;  %v1611_v4 = vsel %vm1594_vm5, %v1608_v57, %v1610_v59  ;;  %v1609_v10 = vsel %vm1594_vm5, %v1606_v15, %v1608_v57  ;;  %v5616_v16 = vld [vmem:[%s5299_s19 + $0x60] sm:$0xff]  }
  0x4a   : > { %v1428_v54 = vor.u32 %v1427_v44, %v1426_v43  ;;  %v5644_v56 = vshrl.u32 %v5616_v16, 16 }
  0x4b   : > { %885 = vrot.lane.b32.xlu1 %v666_v49, %s5204_s22  ;;  %v1431_v49 = vrot.slane %v679_v22, 3 }
  0x4c   : > { %883 = vrot.lane.b32.xlu0 %v658_v55, %s5204_s22 }
  0x4d   : > { %v5548_v55 = vor.u32 %v1431_v49, %v1430_v48  ;;  %v707_v48 = vshrl.u32 %v5604_v36, 16  ;;  %v5633_v49 = vshll.u32 %v5616_v16, 16 }
  0x4f   : > { %1016 = vrot.lane.b32.xlu1 %v953_v50, %s5203_s21  ;;  %v5551_v50 = vld [vmem:[%s5299_s19 + $0x50] sm:$0xff]   ;;  %v1433_v61 = vsel %vm1398_vm4, %v1428_v54, %v5548_v55 }
  0x50   : > { %1014 = vrot.lane.b32.xlu0 %v951_v58, %s5203_s21  ;;  %v1283_v58 = vsel %vm1268_vm0, %v1280_v60, %v1282_v41  ;;  %v5565_v3 = vshll.u32 %v5551_v50, 16  ;;  %v1429_v60 = vsel %vm1398_vm4, %v5488_v11, %v1428_v54  ;;  %v958_v11 = vrot.slane %v5539_v51, 1 }
  0x51   : > { %v1612_v41 = vrot.slane %v5539_v51, 3  ;;  %v1614_v43 = vrot.slane %v5551_v50, 3  ;;  %v713_v54 = vrot.slane %v5633_v49, 1 }
  0x52   : > { %v1111_v22 = vrot.slane %v5565_v3, 2  ;;  %v959_v25 = vsel %vm940_vm2, %v956_v31, %v958_v11  ;;  %v1439_v35 = vrot.slane %v5565_v3, 3 }
  0x53   : > { %1214 = vrot.lane.b32.xlu1 %v1097_v63, %s5205_s23  ;;  %v691_v63 = vshrl.u32 %v5539_v51, 16 }
  0x54   : > { %1212 = vrot.lane.b32.xlu0 %v1093_v8, %s5205_s23  ;;  %v697_v8 = vrot.slane %v5565_v3, 1  ;;  %v1114_v3 = vrot.slane %v707_v48, 1 }
  0x55   : > { %v693_v5 = vor.u32 %v691_v63, %v689_v62  ;;  %v1106_v14 = vrot.slane %v691_v63, 1  ;;  %v1434_v27 = vrot.slane %v691_v63, 2  ;;  %v964_v63 = vrot.slane %v5616_v16, 1 }
  0x57   : > { %1344 = vrot.lane.b32.xlu1 %v1281_v9, %s5202_s20  ;;  %v699_v9 = vshrl.u32 %v5551_v50, 16 }
  0x58   : > { %1342 = vrot.lane.b32.xlu0 %v1279_v52, %s5202_s20  ;;  %v960_v52 = vrot.slane %v5551_v50, 1 }
  0x59   : > { %v1110_v21 = vrot.slane %v699_v9, 1 }
  0x5a   : > { %v961_v15 = vsel %vm940_vm2, %v958_v11, %v960_v52 }
  0x5b   : > { %1540 = vrot.lane.b32.xlu1 %v1425_v17, %s5206_s15  ;;  %v698_v17 = vsel %vm614_vm1, %v693_v5, %v697_v8  ;;  %v5591_v24 = vor.u32 %v1111_v22, %v1110_v21  ;;  %v1118_v5 = vrot.slane %v5644_v56, 1  ;;  %v1290_v22 = vrot.slane %v5604_v36, 2 }
  0x5c   : > { %1538 = vrot.lane.b32.xlu0 %v1421_v23, %s5206_s15  ;;  %v690_v23 = vsel %vm614_vm1, %v685_v13, %v689_v62  ;;  %v962_v62 = vrot.slane %v5604_v36, 1 }
  0x5e   : > { %v965_v13 = vsel %vm940_vm2, %v962_v62, %v964_v63 }
  0x5f   : > { %1670 = vrot.lane.b32.xlu1 %v1607_v19, %s5207_s16  ;;  %v1108_v19 = vor.u32 %v1107_v18, %v1106_v14  ;;  %v963_v18 = vsel %vm940_vm2, %v960_v52, %v962_v62  ;;  %v1447_v52 = vrot.slane %v5633_v49, 3 }
  0x60   : > { %1668 = vrot.lane.b32.xlu0 %v1605_v26, %s5207_s16  ;;  %v1288_v26 = vrot.slane %v5551_v50, 2 }
  0x61   : > { %v1113_v28 = vsel %vm1070_vm3, %v1108_v19, %v5591_v24  ;;  %v1109_v31 = vsel %vm1070_vm3, %v5527_v39, %v1108_v19  ;;  %v1287_v39 = vsel %vm1268_vm0, %v1284_v42, %v1286_v7 }
  0x62   : > { %v1289_v37 = vsel %vm1268_vm0, %v1286_v7, %v1288_v26  ;;  %v1446_v7 = vrot.slane %v5644_v56, 2 }
  0x63   : > { %889 = vrot.lane.b32.xlu1 %v682_v33, %s5204_s22  ;;  %v1438_v33 = vrot.slane %v699_v9, 2 }
  0x64   : > { %887 = vrot.lane.b32.xlu0 %v674_v38, %s5204_s22  ;;  %v1436_v38 = vor.u32 %v1435_v32, %v1434_v27  ;;  %v5682_v27 = vld [vmem:[%s5299_s19 + $0x68] sm:$0xff]  }
  0x66   : > { %v1437_v42 = vsel %vm1398_vm4, %v5548_v55, %v1436_v38  ;;  %v1613_v55 = vsel %vm1594_vm5, %v1610_v59, %v1612_v41  ;;  %v1119_v59 = vrot.slane %v5633_v49, 2 }
  0x67   : > { %1020 = vrot.lane.b32.xlu1 %v957_v34, %s5203_s21  ;;  %v5613_v34 = vor.u32 %v1439_v35, %v1438_v33 }
  0x68   : > { %1018 = vrot.lane.b32.xlu0 %v955_v40, %s5203_s21  ;;  %v5619_v40 = vshll.u32 %v5604_v36, 16  ;;  %v5667_v14 = vor.u32 %v1119_v59, %v1118_v5 }
  0x6a   : > { %v705_v44 = vrot.slane %v5619_v40, 1 }
  0x6b   : > { %1218 = vrot.lane.b32.xlu1 %v1105_v46, %s5205_s23  ;;  %v1441_v46 = vsel %vm1398_vm4, %v1436_v38, %v5613_v34 }
  0x6c   : > { %1216 = vrot.lane.b32.xlu0 %v1101_v47, %s5205_s23  ;;  %v1615_v47 = vsel %vm1594_vm5, %v1612_v41, %v1614_v43 }
  0x6f   : > { %1348 = vrot.lane.b32.xlu1 %v1285_v53, %s5202_s20  ;;  %v709_v53 = vor.u32 %v707_v48, %v705_v44 }
  0x70   : > { %1346 = vrot.lane.b32.xlu0 %v1283_v58, %s5202_s20 }
  0x73   : > { %1544 = vrot.lane.b32.xlu1 %v1433_v61, %s5206_s15  ;;  %v701_v61 = vor.u32 %v699_v9, %v697_v8 }
  0x74   : > { %1542 = vrot.lane.b32.xlu0 %v1429_v60, %s5206_s15  ;;  %v714_v60 = vsel %vm614_vm1, %v709_v53, %v713_v54  ;;  %v1618_v53 = vrot.slane %v5616_v16, 3 }
  0x75   : > { %v706_v9 = vsel %vm614_vm1, %v701_v61, %v705_v44  ;;  %v1291_v44 = vsel %vm1268_vm0, %v1288_v26, %v1290_v22 }
  0x77   : > { %1674 = vrot.lane.b32.xlu1 %v1611_v4, %s5207_s16  ;;  %v1115_v4 = vrot.slane %v5619_v40, 2 }
  0x78   : > { %1672 = vrot.lane.b32.xlu0 %v1609_v10, %s5207_s16 }
  0x79   : > { %v1116_v11 = vor.u32 %v1115_v4, %v1114_v3 }
  0x7b   : > { %893 = vrot.lane.b32.xlu1 %v698_v17, %s5204_s22  ;;  %v1121_v19 = vsel %vm1070_vm3, %v1116_v11, %v5667_v14  ;;  %v1117_v33 = vsel %vm1070_vm3, %v5591_v24, %v1116_v11  ;;  %v5699_v24 = vld [vmem:[%s5299_s19 + $0x70] sm:$0xff]  }
  0x7c   : > { %891 = vrot.lane.b32.xlu0 %v690_v23, %s5204_s22  ;;  %v1292_v23 = vrot.slane %v5616_v16, 2  ;;  %v5722_v62 = vshll.u32 %v5699_v24, 16  ;;  %v5741_v11 = vshrl.u32 %v5699_v24, 16 }
  0x7e   : > { %v1126_v49 = vrot.slane %v5741_v11, 1 }
  0x7f   : > { %1024 = vrot.lane.b32.xlu1 %v961_v15, %s5203_s21  ;;  %v1442_v15 = vrot.slane %v707_v48, 2 }
  0x80   : > { %1022 = vrot.lane.b32.xlu0 %v959_v25, %s5203_s21  ;;  %v1443_v25 = vrot.slane %v5619_v40, 3  ;;  %v5696_v40 = vor.u32 %v1447_v52, %v1446_v7 }
  0x83   : > { %1222 = vrot.lane.b32.xlu1 %v1113_v28, %s5205_s23 }
  0x84   : > { %1220 = vrot.lane.b32.xlu0 %v1109_v31, %s5205_s23 }
  0x87   : > { %1352 = vrot.lane.b32.xlu1 %v1289_v37, %s5202_s20  ;;  %v1293_v37 = vsel %vm1268_vm0, %v1290_v22, %v1292_v23 }
  0x88   : > { %1350 = vrot.lane.b32.xlu0 %v1287_v39, %s5202_s20 }
  0x8b   : > { %1548 = vrot.lane.b32.xlu1 %v1441_v46, %s5206_s15 }
  0x8c   : > { %1546 = vrot.lane.b32.xlu0 %v1437_v42, %s5206_s15 }
  0x8d   : > { %v5646_v58 = vpop.permute.xlu0 %1334  ;;  %v1007_v57 = vpop.permute.xlu1 %1006 }
  0x8f   : > { %1678 = vrot.lane.b32.xlu1 %v1615_v47, %s5207_s16  ;;  %v1616_v47 = vrot.slane %v5604_v36, 3 }
  0x90   : > { %1676 = vrot.lane.b32.xlu0 %v1613_v55, %s5207_s16  ;;  %v5714_v55 = vshrl.u32 %v5682_v27, 16 }
  0x91   : > { %v1009_v8 = vpop.permute.xlu1 %1008 }
  0x92   : > { %v876_v10 = vpop.permute.xlu0 %875 }
  0x93   : > { %897 = vrot.lane.b32.xlu1 %v714_v60, %s5204_s22  ;;  %v1726_v35 = vsel %vm1724_vm6, %v5302_v0, %v876_v10  ;;  %v5702_v0 = vshll.u32 %v5682_v27, 16 }
  0x94   : > { %895 = vrot.lane.b32.xlu0 %v706_v9, %s5204_s22  ;;  %v1791_v41 = vsel %vm1789_vm7, %v1726_v35, %v1007_v57 }
  0x95   : > { %v1337_v17 = vpop.permute.xlu1 %1336  ;;  %v721_v61 = vrot.slane %v5702_v0, 1 }
  0x96   : > { %v878_v21 = vpop.permute.xlu0 %877 }
  0x97   : > { %1028 = vrot.lane.b32.xlu1 %v965_v13, %s5203_s21  ;;  %v1728_v28 = vsel %vm1724_vm6, %v5305_v1, %v878_v21  ;;  %v1444_v1 = vor.u32 %v1443_v25, %v1442_v15  ;;  %v729_v13 = vrot.slane %v5722_v62, 1  ;;  %v717_v21 = vor.u32 %v5644_v56, %v713_v54 }
  0x98   : > { %1026 = vrot.lane.b32.xlu0 %v963_v18, %s5203_s21  ;;  %v1793_v38 = vsel %vm1789_vm7, %v1728_v28, %v1009_v8  ;;  %v1617_v18 = vsel %vm1594_vm5, %v1614_v43, %v1616_v47  ;;  %v966_v15 = vrot.slane %v5682_v27, 1  ;;  %v1122_v25 = vrot.slane %v5714_v55, 1 }
  0x99   : > { %v1207_v32 = vpop.permute.xlu1 %1206  ;;  %v1449_v26 = vsel %vm1398_vm4, %v1444_v1, %v5696_v40  ;;  %v1445_v5 = vsel %vm1398_vm4, %v5613_v34, %v1444_v1  ;;  %v725_v34 = vor.u32 %v5714_v55, %v721_v61  ;;  %v1123_v43 = vrot.slane %v5702_v0, 2 }
  0x9a   : > { %v1205_v31 = vpop.permute.xlu0 %1204  ;;  %v1858_v39 = vsel %vm1854_vm8, %v1793_v38, %v1207_v32  ;;  %v1127_v54 = vrot.slane %v5722_v62, 2  ;;  %v722_v7 = vsel %vm614_vm1, %v717_v21, %v721_v61  ;;  %v1294_v38 = vrot.slane %v5682_v27, 2 }
  0x9b   : > { %1226 = vrot.lane.b32.xlu1 %v1121_v19, %s5205_s23  ;;  %v1856_v48 = vsel %vm1854_vm8, %v1791_v41, %v1205_v31  ;;  %v1923_v57 = vsel %vm1919_vm9, %v1858_v39, %v1337_v17  ;;  %v968_v19 = vrot.slane %v5699_v24, 1  ;;  %v730_v50 = vsel %vm614_vm1, %v725_v34, %v729_v13 }
  0x9c   : > { %1224 = vrot.lane.b32.xlu0 %v1117_v33, %s5205_s23  ;;  %v1921_v60 = vsel %vm1919_vm9, %v1856_v48, %v5646_v58  ;;  %v1619_v58 = vsel %vm1594_vm5, %v1616_v47, %v1618_v53  ;;  %v1124_v32 = vor.u32 %v1123_v43, %v1122_v25  ;;  %v5767_v33 = vor.u32 %v1127_v54, %v1126_v49  ;;  %v5783_v48 = vld [vmem:[%s5299_s19 + $0x78] sm:$0xff]  }
  0x9d   : > { %v1533_v46 = vpop.permute.xlu1 %1532  ;;  %v969_v28 = vsel %vm940_vm2, %v966_v15, %v968_v19  ;;  %v967_v31 = vsel %vm940_vm2, %v964_v63, %v966_v15  ;;  %v1296_v1 = vrot.slane %v5699_v24, 2  ;;  %v1450_v39 = vrot.slane %v5714_v55, 2  ;;  %v5789_v55 = vld [vmem:[%s5299_s19 + $0x80] sm:$0xff]  }
  0x9e   : > { %v1531_v42 = vpop.permute.xlu0 %1530  ;;  %v1988_v3 = vsel %vm1984_vm10, %v1923_v57, %v1533_v46  ;;  %v1129_v41 = vsel %vm1070_vm3, %v1124_v32, %v5767_v33  ;;  %v1451_v46 = vrot.slane %v5702_v0, 3  ;;  %v1455_v63 = vrot.slane %v5722_v62, 3 }
  0x9f   : > { %1356 = vrot.lane.b32.xlu1 %v1293_v37, %s5202_s20  ;;  %v1986_v59 = vsel %vm1984_vm10, %v1921_v60, %v1531_v42  ;;  %v1125_v47 = vsel %vm1070_vm3, %v5667_v14, %v1124_v32  ;;  %v1297_v0 = vsel %vm1268_vm0, %v1294_v38, %v1296_v1 }
  0xa0   : > { %1354 = vrot.lane.b32.xlu0 %v1291_v44, %s5202_s20  ;;  %v1454_v44 = vrot.slane %v5741_v11, 2 }
  0xa1   : > { %v1663_v4 = vpop.permute.xlu1 %1662 }
  0xa2   : > { %v2053_v8 = vsel %vm2049_vm11, %v1988_v3, %v1663_v4  ;;  %v1661_v9 = vpop.permute.xlu0 %1660  ;;  %v5795_v61 = vor.u32 %v1455_v63, %v1454_v44  ;;  %v5798_v3 = vshll.u32 %v5783_v48, 16  ;;  %v1295_v4 = vsel %vm1268_vm0, %v1292_v23, %v1294_v38 }
  0xa3   : > { %1552 = vrot.lane.b32.xlu1 %v1449_v26, %s5206_s15  ;;  %v2051_v10 = vsel %vm2049_vm11, %v1986_v59, %v1661_v9  ;;  %v1452_v26 = vor.u32 %v1451_v46, %v1450_v39  ;;  %v1620_v9 = vrot.slane %v5682_v27, 3  ;;  %v5817_v23 = vshll.u32 %v5789_v55, 16 }
  0xa4   : > { %1550 = vrot.lane.b32.xlu0 %v1445_v5, %s5206_s15  ;;  %4779 = vmatprep.mubr.msk.bf16.mxu0 %vm2136_vm12, %v2051_v10  ;;  %v1622_v10 = vrot.slane %v5699_v24, 3  ;;  %v737_v21 = vrot.slane %v5798_v3, 1  ;;  %v970_v38 = vrot.slane %v5783_v48, 1  ;;  %v972_v39 = vrot.slane %v5789_v55, 1 }
  0xa5   : > { %4780 = vmatmul.mubr.msk.bf16.vlgmr.msra.gmra.mrb[0].mxu0 %vm2136_vm12, %v2053_v8  ;;  %v882_v17 = vpop.permute.xlu1 %881 }
  0xa6   : > { %v880_v22 = vpop.permute.xlu0 %879  ;;  %v1732_v14 = vsel %vm1724_vm6, %v5334_v29, %v882_v17  ;;  %v5814_v29 = vshrl.u32 %v5783_v48, 16  ;;  %v973_v63 = vsel %vm940_vm2, %v970_v38, %v972_v39 }
  0xa7   : > { %1682 = vrot.lane.b32.xlu1 %v1619_v58, %s5207_s16  ;;  %v1730_v5 = vsel %vm1724_vm6, %v5308_v2, %v880_v22 }
  0xa8   : > { %1680 = vrot.lane.b32.xlu0 %v1617_v18, %s5207_s16  ;;  %v1457_v18 = vsel %vm1398_vm4, %v1452_v26, %v5795_v61 }
  0xa9   : > { %v1013_v56 = vpop.permute.xlu1 %1012 }
  0xaa   : > { %v1011_v52 = vpop.permute.xlu0 %1010  ;;  %v1797_v59 = vsel %vm1789_vm7, %v1732_v14, %v1013_v56  ;;  %v1298_v14 = vrot.slane %v5783_v48, 2 }
  0xab   : > { %901 = vrot.lane.b32.xlu1 %v730_v50, %s5204_s22  ;;  %v1795_v58 = vsel %vm1789_vm7, %v1730_v5, %v1011_v52  ;;  %v1453_v50 = vsel %vm1398_vm4, %v5696_v40, %v1452_v26  ;;  %v741_v52 = vor.u32 %v5814_v29, %v737_v21  ;;  %v745_v40 = vrot.slane %v5817_v23, 1 }
  0xac   : > { %899 = vrot.lane.b32.xlu0 %v722_v7, %s5204_s22  ;;  %v1623_v7 = vsel %vm1594_vm5, %v1620_v9, %v1622_v10 }
  0xad   : > { %v1211_v35 = vpop.permute.xlu1 %1210  ;;  %v746_v16 = vsel %vm614_vm1, %v741_v52, %v745_v40 }
  0xae   : > { %v1209_v37 = vpop.permute.xlu0 %1208  ;;  %v1862_v34 = vsel %vm1854_vm8, %v1797_v59, %v1211_v35  ;;  %v1621_v35 = vsel %vm1594_vm5, %v1618_v53, %v1620_v9  ;;  %v1131_v53 = vrot.slane %v5798_v3, 2  ;;  %v1459_v59 = vrot.slane %v5798_v3, 3  ;;  %v5883_v9 = vld [vmem:[%s5299_s19 + $0x88] sm:$0xff]  }
  0xaf   : > { %1032 = vrot.lane.b32.xlu1 %v969_v28, %s5203_s21  ;;  %v1860_v2 = vsel %vm1854_vm8, %v1795_v58, %v1209_v37  ;;  %v5841_v28 = vshrl.u32 %v5789_v55, 16 }
  0xb0   : > { %1030 = vrot.lane.b32.xlu0 %v967_v31, %s5203_s21  ;;  %v733_v31 = vor.u32 %v5741_v11, %v729_v13  ;;  %v1135_v13 = vrot.slane %v5817_v23, 2 }
  0xb1   : > { %v1341_v42 = vpop.permute.xlu1 %1340  ;;  %v1134_v62 = vrot.slane %v5841_v28, 1 }
  0xb2   : > { %v1339_v57 = vpop.permute.xlu0 %1338  ;;  %v1927_v17 = vsel %vm1919_vm9, %v1862_v34, %v1341_v42  ;;  %v738_v46 = vsel %vm614_vm1, %v733_v31, %v737_v21  ;;  %v5898_v21 = vshll.u32 %v5883_v9, 16 }
  0xb3   : > { %1230 = vrot.lane.b32.xlu1 %v1129_v41, %s5205_s23  ;;  %v1925_v22 = vsel %vm1919_vm9, %v1860_v2, %v1339_v57  ;;  %v1130_v41 = vrot.slane %v5814_v29, 1 }
  0xb4   : > { %1228 = vrot.lane.b32.xlu0 %v1125_v47, %s5205_s23  ;;  %v5867_v47 = vor.u32 %v1135_v13, %v1134_v62 }
  0xb5   : > { %v1537_v60 = vpop.permute.xlu1 %1536  ;;  %v1132_v42 = vor.u32 %v1131_v53, %v1130_v41 }
  0xb6   : > { %v1535_v8 = vpop.permute.xlu0 %1534  ;;  %v1992_v15 = vsel %vm1984_vm10, %v1927_v17, %v1537_v60  ;;  %v1300_v60 = vrot.slane %v5789_v55, 2 }
  0xb7   : > { %1360 = vrot.lane.b32.xlu1 %v1297_v0, %s5202_s20  ;;  %v1990_v43 = vsel %vm1984_vm10, %v1925_v22, %v1535_v8  ;;  %v971_v0 = vsel %vm940_vm2, %v968_v19, %v970_v38  ;;  %v1137_v5 = vsel %vm1070_vm3, %v1132_v42, %v5867_v47  ;;  %v1462_v8 = vrot.slane %v5841_v28, 2 }
  0xb8   : > { %1358 = vrot.lane.b32.xlu0 %v1295_v4, %s5202_s20  ;;  %v1458_v4 = vrot.slane %v5814_v29, 2  ;;  %v1463_v19 = vrot.slane %v5817_v23, 3  ;;  %v1133_v34 = vsel %vm1070_vm3, %v5767_v33, %v1132_v42  ;;  %v5889_v29 = vld [vmem:[%s5299_s19 + $0x90] sm:$0xff]   ;;  %v1301_v3 = vsel %vm1268_vm0, %v1298_v14, %v1300_v60 }
  0xb9   : > { %v1667_v25 = vpop.permute.xlu1 %1666 }
  0xba   : > { %v2057_v49 = vsel %vm2049_vm11, %v1992_v15, %v1667_v25  ;;  %v1665_v54 = vpop.permute.xlu0 %1664  ;;  %v1460_v17 = vor.u32 %v1459_v59, %v1458_v4  ;;  %v1299_v15 = vsel %vm1268_vm0, %v1296_v1, %v1298_v14  ;;  %v5917_v1 = vshll.u32 %v5889_v29, 16 }
  0xbb   : > { %v2055_v56 = vsel %vm2049_vm11, %v1990_v43, %v1665_v54  ;;  %1556 = vrot.lane.b32.xlu1 %v1457_v18, %s5206_s15  ;;  %v5895_v18 = vor.u32 %v1463_v19, %v1462_v8  ;;  %v1626_v54 = vrot.slane %v5789_v55, 3  ;;  %v976_v14 = vrot.slane %v5889_v29, 1 }
  0xbc   : > { %1554 = vrot.lane.b32.xlu0 %v1453_v50, %s5206_s15  ;;  %4783 = vmatprep.mubr.msk.bf16.mxu0 %vm2136_vm12, %v2055_v56  ;;  %v1461_v41 = vsel %vm1398_vm4, %v5795_v61, %v1460_v17  ;;  %v761_v61 = vrot.slane %v5917_v1, 1 }
  0xbd   : > { %4784 = vmatmul.mubr.msk.bf16.gmra.mrb[4].mxu0 %vm2136_vm12, %v2057_v49  ;;  %v886_v32 = vpop.permute.xlu1 %885  ;;  %v1624_v49 = vrot.slane %v5783_v48, 3 }
  0xbe   : > { %v884_v37 = vpop.permute.xlu0 %883  ;;  %v1736_v33 = vsel %vm1724_vm6, %v5407_v20, %v886_v32  ;;  %v5914_v20 = vshrl.u32 %v5883_v9, 16  ;;  %v1465_v32 = vsel %vm1398_vm4, %v1460_v17, %v5895_v18  ;;  %v1302_v17 = vrot.slane %v5883_v9, 2 }
  0xbf   : > { %1686 = vrot.lane.b32.xlu1 %v1623_v7, %s5207_s16  ;;  %v1734_v25 = vsel %vm1724_vm6, %v5353_v45, %v884_v37  ;;  %v1625_v42 = vsel %vm1594_vm5, %v1622_v10, %v1624_v49  ;;  %v1139_v10 = vrot.slane %v5898_v21, 2 }
  0xc0   : > { %1684 = vrot.lane.b32.xlu0 %v1621_v35, %s5207_s16  ;;  %v753_v35 = vrot.slane %v5898_v21, 1  ;;  %v1138_v4 = vrot.slane %v5914_v20, 1 }
  0xc1   : > { %v1017_v11 = vpop.permute.xlu1 %1016 }
  0xc2   : > { %v1015_v44 = vpop.permute.xlu0 %1014  ;;  %v1801_v50 = vsel %vm1789_vm7, %v1736_v33, %v1017_v11  ;;  %v1627_v11 = vsel %vm1594_vm5, %v1624_v49, %v1626_v54  ;;  %v1140_v19 = vor.u32 %v1139_v10, %v1138_v4  ;;  %v1304_v33 = vrot.slane %v5889_v29, 2 }
  0xc3   : > { %905 = vrot.lane.b32.xlu1 %v746_v16, %s5204_s22  ;;  %v1799_v56 = vsel %vm1789_vm7, %v1734_v25, %v1015_v44  ;;  %v5941_v44 = vshrl.u32 %v5889_v29, 16 }
  0xc4   : > { %903 = vrot.lane.b32.xlu0 %v738_v46, %s5204_s22  ;;  %v757_v46 = vor.u32 %v5914_v20, %v753_v35 }
  0xc5   : > { %v1215_v57 = vpop.permute.xlu1 %1214  ;;  %v1142_v23 = vrot.slane %v5941_v44, 1 }
  0xc6   : > { %v1213_v26 = vpop.permute.xlu0 %1212  ;;  %v1866_v7 = vsel %vm1854_vm8, %v1801_v50, %v1215_v57  ;;  %v749_v57 = vor.u32 %v5841_v28, %v745_v40  ;;  %v762_v24 = vsel %vm614_vm1, %v757_v46, %v761_v61  ;;  %v1143_v40 = vrot.slane %v5917_v1, 2 }
  0xc7   : > { %1036 = vrot.lane.b32.xlu1 %v973_v63, %s5203_s21  ;;  %v1864_v45 = vsel %vm1854_vm8, %v1799_v56, %v1213_v26  ;;  %v974_v26 = vrot.slane %v5883_v9, 1  ;;  %v1467_v50 = vrot.slane %v5898_v21, 3  ;;  %v1141_v56 = vsel %vm1070_vm3, %v5867_v47, %v1140_v19 }
  0xc8   : > { %1034 = vrot.lane.b32.xlu0 %v971_v0, %s5203_s21  ;;  %v1305_v21 = vsel %vm1268_vm0, %v1302_v17, %v1304_v33 }
  0xc9   : > { %v1345_v58 = vpop.permute.xlu1 %1344  ;;  %v977_v8 = vsel %vm940_vm2, %v974_v26, %v976_v14 }
  0xca   : > { %v1343_v2 = vpop.permute.xlu0 %1342  ;;  %v1931_v52 = vsel %vm1919_vm9, %v1866_v7, %v1345_v58  ;;  %v5967_v58 = vor.u32 %v1143_v40, %v1142_v23 }
  0xcb   : > { %1234 = vrot.lane.b32.xlu1 %v1137_v5, %s5205_s23  ;;  %v1929_v31 = vsel %vm1919_vm9, %v1864_v45, %v1343_v2  ;;  %v754_v5 = vsel %vm614_vm1, %v749_v57, %v753_v35  ;;  %v975_v2 = vsel %vm940_vm2, %v972_v39, %v974_v26  ;;  %v1470_v39 = vrot.slane %v5941_v44, 2 }
  0xcc   : > { %1232 = vrot.lane.b32.xlu0 %v1133_v34, %s5205_s23  ;;  %v1145_v25 = vsel %vm1070_vm3, %v1140_v19, %v5967_v58  ;;  %v765_v19 = vor.u32 %v5941_v44, %v761_v61 }
  0xcd   : > { %v1541_v22 = vpop.permute.xlu1 %1540 }
  0xce   : > { %v1539_v43 = vpop.permute.xlu0 %1538  ;;  %v1996_v37 = vsel %vm1984_vm10, %v1931_v52, %v1541_v22  ;;  %v1466_v22 = vrot.slane %v5914_v20, 2  ;;  %v5989_v20 = vld [vmem:[%s5299_s19 + $0xa0] sm:$0xff]  }
  0xcf   : > { %1364 = vrot.lane.b32.xlu1 %v1301_v3, %s5202_s20  ;;  %v1994_v16 = vsel %vm1984_vm10, %v1929_v31, %v1539_v43  ;;  %v1471_v43 = vrot.slane %v5917_v1, 3  ;;  %v1303_v31 = vsel %vm1268_vm0, %v1300_v60, %v1302_v17  ;;  %v6017_v60 = vshll.u32 %v5989_v20, 16 }
  0xd0   : > { %1362 = vrot.lane.b32.xlu0 %v1299_v15, %s5202_s20  ;;  %v5977_v15 = vld [vmem:[%s5299_s19 + $0x98] sm:$0xff]   ;;  %v1468_v52 = vor.u32 %v1467_v50, %v1466_v22  ;;  %v980_v17 = vrot.slane %v5989_v20, 1 }
  0xd1   : > { %v1671_v38 = vpop.permute.xlu1 %1670  ;;  %v5992_v45 = vshll.u32 %v5977_v15, 16  ;;  %v1151_v61 = vrot.slane %v6017_v60, 2 }
  0xd2   : > { %v2061_v53 = vsel %vm2049_vm11, %v1996_v37, %v1671_v38  ;;  %v1669_v62 = vpop.permute.xlu0 %1668  ;;  %v1469_v26 = vsel %vm1398_vm4, %v5895_v18, %v1468_v52 }
  0xd3   : > { %v2059_v13 = vsel %vm2049_vm11, %v1994_v16, %v1669_v62  ;;  %1560 = vrot.lane.b32.xlu1 %v1465_v32, %s5206_s15  ;;  %v5998_v32 = vor.u32 %v1471_v43, %v1470_v39  ;;  %v1628_v16 = vrot.slane %v5883_v9, 3 }
  0xd4   : > { %1558 = vrot.lane.b32.xlu0 %v1461_v41, %s5206_s15  ;;  %4787 = vmatprep.mubr.msk.bf16.mxu0 %vm2136_vm12, %v2059_v13  ;;  %v769_v13 = vrot.slane %v5992_v45, 1 }
  0xd5   : > { %4788 = vmatmul.mubr.msk.bf16.gmra.mrb[8].mxu0 %vm2136_vm12, %v2061_v53  ;;  %v890_v63 = vpop.permute.xlu1 %889  ;;  %v6010_v53 = vshrl.u32 %v5977_v15, 16  ;;  %v1473_v46 = vsel %vm1398_vm4, %v1468_v52, %v5998_v32  ;;  %v1475_v52 = vrot.slane %v5992_v45, 3 }
  0xd6   : > { %v888_v0 = vpop.permute.xlu0 %887  ;;  %v1740_v47 = vsel %vm1724_vm6, %v5477_v6, %v890_v63  ;;  %v1630_v63 = vrot.slane %v5889_v29, 3  ;;  %v770_v22 = vsel %vm614_vm1, %v765_v19, %v769_v13 }
  0xd7   : > { %1690 = vrot.lane.b32.xlu1 %v1627_v11, %s5207_s16  ;;  %v1738_v37 = vsel %vm1724_vm6, %v5424_v30, %v888_v0  ;;  %v773_v40 = vor.u32 %v6010_v53, %v769_v13  ;;  %v1146_v55 = vrot.slane %v6010_v53, 1 }
  0xd8   : > { %1688 = vrot.lane.b32.xlu0 %v1625_v42, %s5207_s16  ;;  %v1631_v18 = vsel %vm1594_vm5, %v1628_v16, %v1630_v63 }
  0xd9   : > { %v1021_v28 = vpop.permute.xlu1 %1020 }
  0xda   : > { %v1019_v59 = vpop.permute.xlu0 %1018  ;;  %v1805_v38 = vsel %vm1789_vm7, %v1740_v47, %v1021_v28  ;;  %v777_v28 = vrot.slane %v6017_v60, 1 }
  0xdb   : > { %909 = vrot.lane.b32.xlu1 %v762_v24, %s5204_s22  ;;  %v1803_v62 = vsel %vm1789_vm7, %v1738_v37, %v1019_v59 }
  0xdc   : > { %907 = vrot.lane.b32.xlu0 %v754_v5, %s5204_s22  ;;  %v6041_v5 = vshrl.u32 %v5989_v20, 16 }
  0xdd   : > { %v1219_v34 = vpop.permute.xlu1 %1218 }
  0xde   : > { %v1217_v3 = vpop.permute.xlu0 %1216  ;;  %v1870_v6 = vsel %vm1854_vm8, %v1805_v38, %v1219_v34  ;;  %v1150_v1 = vrot.slane %v6041_v5, 1  ;;  %v1478_v47 = vrot.slane %v6041_v5, 2  ;;  %v1308_v38 = vrot.slane %v5989_v20, 2 }
  0xdf   : > { %1040 = vrot.lane.b32.xlu1 %v977_v8, %s5203_s21  ;;  %v1868_v30 = vsel %vm1854_vm8, %v1803_v62, %v1217_v3  ;;  %v1629_v8 = vsel %vm1594_vm5, %v1626_v54, %v1628_v16  ;;  %v978_v3 = vrot.slane %v5977_v15, 1  ;;  %v1147_v54 = vrot.slane %v5992_v45, 2  ;;  %v5146_v16 = vld [vmem:[%s7305_s4] sm:$0xff]  }
  0xe0   : > { %1038 = vrot.lane.b32.xlu0 %v975_v2, %s5203_s21  ;;  %v778_v2 = vsel %vm614_vm1, %v773_v40, %v777_v28  ;;  %v6067_v43 = vor.u32 %v1151_v61, %v1150_v1  ;;  %4843 = vmatprep.subr.bf16.mxu1 %v5146_v16 }
  0xe1   : > { %v1349_v49 = vpop.permute.xlu1 %1348  ;;  %v981_v50 = vsel %vm940_vm2, %v978_v3, %v980_v17  ;;  %v1148_v39 = vor.u32 %v1147_v54, %v1146_v55  ;;  %4844 = vmatpush3.bf16.msra.mxu1 %v5146_v16 }
  0xe2   : > { %v1347_v7 = vpop.permute.xlu0 %1346  ;;  %v1935_v11 = vsel %vm1919_vm9, %v1870_v6, %v1349_v49 }
  0xe3   : > { %1238 = vrot.lane.b32.xlu1 %v1145_v25, %s5205_s23  ;;  %v1933_v42 = vsel %vm1919_vm9, %v1868_v30, %v1347_v7  ;;  %v1153_v37 = vsel %vm1070_vm3, %v1148_v39, %v6067_v43  ;;  %v1149_v45 = vsel %vm1070_vm3, %v5967_v58, %v1148_v39  ;;  %v6097_v30 = vld [vmem:[%s5299_s19 + $0xb0] sm:$0xff]  }
  0xe4   : > { %1236 = vrot.lane.b32.xlu0 %v1141_v56, %s5205_s23  ;;  %v979_v56 = vsel %vm940_vm2, %v976_v14, %v978_v3  ;;  %v1306_v14 = vrot.slane %v5977_v15, 2  ;;  %v6124_v40 = vshll.u32 %v6097_v30, 16 }
  0xe5   : > { %v1545_v35 = vpop.permute.xlu1 %1544 }
  0xe6   : > { %v1543_v41 = vpop.permute.xlu0 %1542  ;;  %v2000_v57 = vsel %vm1984_vm10, %v1935_v11, %v1545_v35  ;;  %v1479_v35 = vrot.slane %v6017_v60, 3  ;;  %v1309_v58 = vsel %vm1268_vm0, %v1306_v14, %v1308_v38 }
  0xe7   : > { %1368 = vrot.lane.b32.xlu1 %v1305_v21, %s5202_s20  ;;  %v1998_v4 = vsel %vm1984_vm10, %v1933_v42, %v1543_v41  ;;  %v1474_v21 = vrot.slane %v6010_v53, 2  ;;  %v1307_v42 = vsel %vm1268_vm0, %v1304_v33, %v1306_v14 }
  0xe8   : > { %1366 = vrot.lane.b32.xlu0 %v1303_v31, %s5202_s20  ;;  %v6077_v31 = vld [vmem:[%s5299_s19 + $0xa8] sm:$0xff]   ;;  %v6090_v6 = vor.u32 %v1479_v35, %v1478_v47 }
  0xe9   : > { %v1675_v0 = vpop.permute.xlu1 %1674  ;;  %v1476_v62 = vor.u32 %v1475_v52, %v1474_v21  ;;  %v6093_v13 = vshll.u32 %v6077_v31, 16  ;;  %v6121_v33 = vshrl.u32 %v6077_v31, 16  ;;  %v982_v21 = vrot.slane %v6077_v31, 1 }
  0xea   : > { %v2065_v24 = vsel %vm2049_vm11, %v2000_v57, %v1675_v0  ;;  %v1673_v10 = vpop.permute.xlu0 %1672  ;;  %v5147_v57 = vld [vmem:[%s7305_s4 + $0x8] sm:$0xff]   ;;  %v984_v52 = vrot.slane %v6097_v30, 1 }
  0xeb   : > { %v2063_v23 = vsel %vm2049_vm11, %v1998_v4, %v1673_v10  ;;  %1564 = vrot.lane.b32.xlu1 %v1473_v46, %s5206_s15  ;;  %4845 = vmatprep.subr.bf16.mxu1 %v5147_v57  ;;  %v1477_v3 = vsel %vm1398_vm4, %v5998_v32, %v1476_v62  ;;  %v1154_v29 = vrot.slane %v6121_v33, 1  ;;  %v983_v16 = vsel %vm940_vm2, %v980_v17, %v982_v21 }
  0xec   : > { %1562 = vrot.lane.b32.xlu0 %v1469_v26, %s5206_s15  ;;  %4791 = vmatprep.mubr.msk.bf16.mxu0 %vm2136_vm12, %v2063_v23  ;;  %v1310_v17 = vrot.slane %v6077_v31, 2 }
  0xed   : > { %4792 = vmatmul.mubr.msk.bf16.gmra.mrb[12].mxu0 %vm2136_vm12, %v2065_v24  ;;  %v894_v59 = vpop.permute.xlu1 %893  ;;  %v1481_v24 = vsel %vm1398_vm4, %v1476_v62, %v6090_v6  ;;  %4846 = vmatpush3.bf16.msra.mxu1 %v5147_v57  ;;  %v1482_v62 = vrot.slane %v6121_v33, 2 }
  0xee   : > { %v892_v34 = vpop.permute.xlu0 %891  ;;  %v1744_v11 = vsel %vm1724_vm6, %v5539_v51, %v894_v59  ;;  %v785_v51 = vrot.slane %v6093_v13, 1  ;;  %v1632_v59 = vrot.slane %v5977_v15, 3 }
  0xef   : > { %1694 = vrot.lane.b32.xlu1 %v1631_v18, %s5207_s16  ;;  %v1742_v0 = vsel %vm1724_vm6, %v5491_v12, %v892_v34 }
  0xf0   : > { %1692 = vrot.lane.b32.xlu0 %v1629_v8, %s5207_s16  ;;  %v1634_v8 = vrot.slane %v5989_v20, 3  ;;  %v1633_v39 = vsel %vm1594_vm5, %v1630_v63, %v1632_v59  ;;  %v1155_v63 = vrot.slane %v6093_v13, 2 }
  0xf1   : > { %v1025_v44 = vpop.permute.xlu1 %1024 }
  0xf2   : > { %v1023_v25 = vpop.permute.xlu0 %1022  ;;  %v1809_v26 = vsel %vm1789_vm7, %v1744_v11, %v1025_v44  ;;  %v789_v44 = vor.u32 %v6121_v33, %v785_v51  ;;  %v1635_v32 = vsel %vm1594_vm5, %v1632_v59, %v1634_v8  ;;  %v1156_v14 = vor.u32 %v1155_v63, %v1154_v29  ;;  %v5153_v59 = vld [vmem:[%s5299_s19 + $0x50] sm:$0xff]  }
  0xf3   : > { %913 = vrot.lane.b32.xlu1 %v778_v2, %s5204_s22  ;;  %v1807_v10 = vsel %vm1789_vm7, %v1742_v0, %v1023_v25  ;;  %v6147_v25 = vshrl.u32 %v6097_v30, 16  ;;  %v1312_v0 = vrot.slane %v6097_v30, 2 }
  0xf4   : > { %911 = vrot.lane.b32.xlu0 %v770_v22, %s5204_s22  ;;  %v793_v22 = vrot.slane %v6124_v40, 1 }
  0xf5   : > { %v1223_v49 = vpop.permute.xlu1 %1222  ;;  %v1158_v60 = vrot.slane %v6147_v25, 1  ;;  %v1486_v11 = vrot.slane %v6147_v25, 2  ;;  %v1313_v33 = vsel %vm1268_vm0, %v1310_v17, %v1312_v0 }
  0xf6   : > { %v1221_v7 = vpop.permute.xlu0 %1220  ;;  %v1874_v23 = vsel %vm1854_vm8, %v1809_v26, %v1223_v49  ;;  %v781_v49 = vor.u32 %v6041_v5, %v777_v28  ;;  %v1159_v28 = vrot.slane %v6124_v40, 2  ;;  %v1157_v26 = vsel %vm1070_vm3, %v6067_v43, %v1156_v14 }
  0xf7   : > { %1044 = vrot.lane.b32.xlu1 %v981_v50, %s5203_s21  ;;  %v1872_v12 = vsel %vm1854_vm8, %v1807_v10, %v1221_v7  ;;  %v794_v7 = vsel %vm614_vm1, %v789_v44, %v793_v22 }
  0xf8   : > { %1042 = vrot.lane.b32.xlu0 %v979_v56, %s5203_s21  ;;  %v786_v47 = vsel %vm614_vm1, %v781_v49, %v785_v51 }
  0xf9   : > { %v1353_v41 = vpop.permute.xlu1 %1352 }
  0xfa   : > { %v1351_v53 = vpop.permute.xlu0 %1350  ;;  %v1939_v18 = vsel %vm1919_vm9, %v1874_v23, %v1353_v41  ;;  %v6173_v41 = vor.u32 %v1159_v28, %v1158_v60  ;;  %v6200_v23 = vld [vmem:[%s5299_s19 + $0xc0] sm:$0xff]  }
  0xfb   : > { %1242 = vrot.lane.b32.xlu1 %v1153_v37, %s5205_s23  ;;  %v1937_v19 = vsel %vm1919_vm9, %v1872_v12, %v1351_v53  ;;  %v985_v37 = vsel %vm940_vm2, %v982_v21, %v984_v52 }
  0xfc   : > { %1240 = vrot.lane.b32.xlu0 %v1149_v45, %s5205_s23  ;;  %v1161_v57 = vsel %vm1070_vm3, %v1156_v14, %v6173_v41  ;;  %v797_v14 = vor.u32 %v6147_v25, %v793_v22 }
  0xfd   : > { %v1549_v46 = vpop.permute.xlu1 %1548 }
  0xfe   : > { %v1547_v4 = vpop.permute.xlu0 %1546  ;;  %v2004_v34 = vsel %vm1984_vm10, %v1939_v18, %v1549_v46  ;;  %v1487_v46 = vrot.slane %v6124_v40, 3  ;;  %v1311_v18 = vsel %vm1268_vm0, %v1308_v38, %v1310_v17  ;;  %v6222_v38 = vshll.u32 %v6200_v23, 16 }
  0xff   : > { %1372 = vrot.lane.b32.xlu1 %v1309_v58, %s5202_s20  ;;  %v2002_v55 = vsel %vm1984_vm10, %v1937_v19, %v1547_v4  ;;  %v1483_v58 = vrot.slane %v6093_v13, 3 }
 0x100   : > { %1370 = vrot.lane.b32.xlu0 %v1307_v42, %s5202_s20  ;;  %v6183_v42 = vld [vmem:[%s5299_s19 + $0xb8] sm:$0xff]   ;;  %v6193_v51 = vor.u32 %v1487_v46, %v1486_v11  ;;  %v1167_v22 = vrot.slane %v6222_v38, 2 }
 0x101   : > { %v1679_v2 = vpop.permute.xlu1 %1678  ;;  %v6196_v10 = vshll.u32 %v6183_v42, 16 }
 0x102   : > { %v2069_v54 = vsel %vm2049_vm11, %v2004_v34, %v1679_v2  ;;  %v1677_v1 = vpop.permute.xlu0 %1676 }
 0x103   : > { %v2067_v61 = vsel %vm2049_vm11, %v2002_v55, %v1677_v1  ;;  %1568 = vrot.lane.b32.xlu1 %v1481_v24, %s5206_s15  ;;  %v1484_v24 = vor.u32 %v1483_v58, %v1482_v62  ;;  %v801_v55 = vrot.slane %v6196_v10, 1  ;;  %v803_v1 = vshrl.u32 %v6183_v42, 16 }
 0x104   : > { %1566 = vrot.lane.b32.xlu0 %v1477_v3, %s5206_s15  ;;  %4795 = vmatprep.mubr.msk.bf16.mxu0 %vm2136_vm12, %v2067_v61  ;;  %v988_v62 = vrot.slane %v6200_v23, 1 }
 0x105   : > { %4796 = vmatmul.mubr.msk.bf16.gmra.mrb[16].mxu0 %vm2136_vm12, %v2069_v54  ;;  %v898_v50 = vpop.permute.xlu1 %897  ;;  %v1489_v3 = vsel %vm1398_vm4, %v1484_v24, %v6193_v51  ;;  %v805_v28 = vor.u32 %v803_v1, %v801_v55  ;;  %v1162_v20 = vrot.slane %v803_v1, 1  ;;  %v802_v58 = vsel %vm614_vm1, %v797_v14, %v801_v55 }
 0x106   : > { %v896_v56 = vpop.permute.xlu0 %895  ;;  %v1748_v43 = vsel %vm1724_vm6, %v5604_v36, %v898_v50  ;;  %v1638_v50 = vrot.slane %v6097_v30, 3 }
 0x107   : > { %1698 = vrot.lane.b32.xlu1 %v1635_v32, %s5207_s16  ;;  %v1746_v19 = vsel %vm1724_vm6, %v5153_v59, %v896_v56  ;;  %v1636_v32 = vrot.slane %v6077_v31, 3 }
 0x108   : > { %1696 = vrot.lane.b32.xlu0 %v1633_v39, %s5207_s16 }
 0x109   : > { %v1029_v5 = vpop.permute.xlu1 %1028 }
 0x10a   : > { %v1027_v35 = vpop.permute.xlu0 %1026  ;;  %v1813_v34 = vsel %vm1789_vm7, %v1748_v43, %v1029_v5  ;;  %v809_v5 = vrot.slane %v6222_v38, 1 }
 0x10b   : > { %917 = vrot.lane.b32.xlu1 %v794_v7, %s5204_s22  ;;  %v1811_v54 = vsel %vm1789_vm7, %v1746_v19, %v1027_v35  ;;  %v1485_v7 = vsel %vm1398_vm4, %v6090_v6, %v1484_v24  ;;  %v1639_v6 = vsel %vm1594_vm5, %v1636_v32, %v1638_v50  ;;  %v1490_v24 = vrot.slane %v803_v1, 2 }
 0x10c   : > { %915 = vrot.lane.b32.xlu0 %v786_v47, %s5204_s22  ;;  %v6244_v47 = vshrl.u32 %v6200_v23, 16  ;;  %v1316_v19 = vrot.slane %v6200_v23, 2 }
 0x10d   : > { %v1227_v45 = vpop.permute.xlu1 %1226 }
 0x10e   : > { %v1225_v53 = vpop.permute.xlu0 %1224  ;;  %v1878_v36 = vsel %vm1854_vm8, %v1813_v34, %v1227_v45  ;;  %v1166_v40 = vrot.slane %v6244_v47, 1  ;;  %v1494_v43 = vrot.slane %v6244_v47, 2 }
 0x10f   : > { %1048 = vrot.lane.b32.xlu1 %v985_v37, %s5203_s21  ;;  %v1876_v61 = vsel %vm1854_vm8, %v1811_v54, %v1225_v53  ;;  %v1637_v37 = vsel %vm1594_vm5, %v1634_v8, %v1636_v32  ;;  %v986_v53 = vrot.slane %v6183_v42, 1  ;;  %v1163_v8 = vrot.slane %v6196_v10, 2  ;;  %v5154_v32 = vld [vmem:[%s5299_s19 + $0x60] sm:$0xff]  }
 0x110   : > { %1046 = vrot.lane.b32.xlu0 %v983_v16, %s5203_s21  ;;  %v810_v16 = vsel %vm614_vm1, %v805_v28, %v809_v5  ;;  %v6269_v17 = vor.u32 %v1167_v22, %v1166_v40 }
 0x111   : > { %v1357_v13 = vpop.permute.xlu1 %1356  ;;  %v989_v46 = vsel %vm940_vm2, %v986_v53, %v988_v62 }
 0x112   : > { %v1355_v4 = vpop.permute.xlu0 %1354  ;;  %v1943_v44 = vsel %vm1919_vm9, %v1878_v36, %v1357_v13  ;;  %v6295_v36 = vld [vmem:[%s5299_s19 + $0xd0] sm:$0xff]  }
 0x113   : > { %1246 = vrot.lane.b32.xlu1 %v1161_v57, %s5205_s23  ;;  %v1941_v39 = vsel %vm1919_vm9, %v1876_v61, %v1355_v4  ;;  %v1164_v57 = vor.u32 %v1163_v8, %v1162_v20 }
 0x114   : > { %1244 = vrot.lane.b32.xlu0 %v1157_v26, %s5205_s23  ;;  %v987_v26 = vsel %vm940_vm2, %v984_v52, %v986_v53  ;;  %v1314_v52 = vrot.slane %v6183_v42, 2 }
 0x115   : > { %v1553_v12 = vpop.permute.xlu1 %1552  ;;  %v1169_v59 = vsel %vm1070_vm3, %v1164_v57, %v6269_v17  ;;  %v1165_v34 = vsel %vm1070_vm3, %v6173_v41, %v1164_v57  ;;  %v813_v57 = vor.u32 %v6244_v47, %v809_v5 }
 0x116   : > { %v1551_v2 = vpop.permute.xlu0 %1550  ;;  %v2008_v49 = vsel %vm1984_vm10, %v1943_v44, %v1553_v12  ;;  %v1495_v12 = vrot.slane %v6222_v38, 3  ;;  %v1317_v1 = vsel %vm1268_vm0, %v1314_v52, %v1316_v19  ;;  %v1315_v44 = vsel %vm1268_vm0, %v1312_v0, %v1314_v52 }
 0x117   : > { %1376 = vrot.lane.b32.xlu1 %v1313_v33, %s5202_s20  ;;  %v2006_v21 = vsel %vm1984_vm10, %v1941_v39, %v1551_v2  ;;  %v1491_v33 = vrot.slane %v6196_v10, 3  ;;  %v6317_v0 = vshll.u32 %v6295_v36, 16 }
 0x118   : > { %1374 = vrot.lane.b32.xlu0 %v1311_v18, %s5202_s20  ;;  %v6278_v18 = vld [vmem:[%s5299_s19 + $0xc8] sm:$0xff]   ;;  %v6288_v55 = vor.u32 %v1495_v12, %v1494_v43 }
 0x119   : > { %v1683_v56 = vpop.permute.xlu1 %1682  ;;  %v6291_v54 = vshll.u32 %v6278_v18, 16  ;;  %v1175_v5 = vrot.slane %v6317_v0, 2 }
 0x11a   : > { %v2073_v29 = vsel %vm2049_vm11, %v2008_v49, %v1683_v56  ;;  %v1681_v63 = vpop.permute.xlu0 %1680 }
 0x11b   : > { %v2071_v60 = vsel %vm2049_vm11, %v2006_v21, %v1681_v63  ;;  %1572 = vrot.lane.b32.xlu1 %v1489_v3, %s5206_s15  ;;  %v1492_v3 = vor.u32 %v1491_v33, %v1490_v24  ;;  %v817_v21 = vrot.slane %v6291_v54, 1  ;;  %v819_v63 = vshrl.u32 %v6278_v18, 16 }
 0x11c   : > { %1570 = vrot.lane.b32.xlu0 %v1485_v7, %s5206_s15  ;;  %4799 = vmatprep.mubr.msk.bf16.mxu0 %vm2136_vm12, %v2071_v60  ;;  %v992_v24 = vrot.slane %v6295_v36, 1 }
 0x11d   : > { %4800 = vmatmul.mubr.msk.bf16.gmra.mrb[20].mxu0 %vm2136_vm12, %v2073_v29  ;;  %v902_v35 = vpop.permute.xlu1 %901  ;;  %v1497_v7 = vsel %vm1398_vm4, %v1492_v3, %v6288_v55  ;;  %v821_v22 = vor.u32 %v819_v63, %v817_v21  ;;  %v1170_v30 = vrot.slane %v819_v63, 1  ;;  %v818_v33 = vsel %vm614_vm1, %v813_v57, %v817_v21 }
 0x11e   : > { %v900_v45 = vpop.permute.xlu0 %899  ;;  %v1752_v41 = vsel %vm1724_vm6, %v5682_v27, %v902_v35  ;;  %v1642_v35 = vrot.slane %v6200_v23, 3 }
 0x11f   : > { %1702 = vrot.lane.b32.xlu1 %v1639_v6, %s5207_s16  ;;  %v1750_v39 = vsel %vm1724_vm6, %v5154_v32, %v900_v45  ;;  %v1640_v6 = vrot.slane %v6183_v42, 3 }
 0x120   : > { %1700 = vrot.lane.b32.xlu0 %v1637_v37, %s5207_s16 }
 0x121   : > { %v1033_v25 = vpop.permute.xlu1 %1032 }
 0x122   : > { %v1031_v11 = vpop.permute.xlu0 %1030  ;;  %v1817_v49 = vsel %vm1789_vm7, %v1752_v41, %v1033_v25  ;;  %v825_v25 = vrot.slane %v6317_v0, 1 }
 0x123   : > { %921 = vrot.lane.b32.xlu1 %v810_v16, %s5204_s22  ;;  %v1815_v29 = vsel %vm1789_vm7, %v1750_v39, %v1031_v11  ;;  %v1493_v16 = vsel %vm1398_vm4, %v6193_v51, %v1492_v3  ;;  %v1643_v51 = vsel %vm1594_vm5, %v1640_v6, %v1642_v35  ;;  %v1498_v3 = vrot.slane %v819_v63, 2 }
 0x124   : > { %919 = vrot.lane.b32.xlu0 %v802_v58, %s5204_s22  ;;  %v6339_v58 = vshrl.u32 %v6295_v36, 16  ;;  %v1320_v39 = vrot.slane %v6295_v36, 2 }
 0x125   : > { %v1231_v13 = vpop.permute.xlu1 %1230 }
 0x126   : > { %v1229_v4 = vpop.permute.xlu0 %1228  ;;  %v1882_v27 = vsel %vm1854_vm8, %v1817_v49, %v1231_v13  ;;  %v1174_v38 = vrot.slane %v6339_v58, 1  ;;  %v1502_v41 = vrot.slane %v6339_v58, 2 }
 0x127   : > { %1052 = vrot.lane.b32.xlu1 %v989_v46, %s5203_s21  ;;  %v1880_v60 = vsel %vm1854_vm8, %v1815_v29, %v1229_v4  ;;  %v1641_v46 = vsel %vm1594_vm5, %v1638_v50, %v1640_v6  ;;  %v990_v4 = vrot.slane %v6278_v18, 1  ;;  %v1171_v50 = vrot.slane %v6291_v54, 2  ;;  %v5155_v6 = vld [vmem:[%s5299_s19 + $0x70] sm:$0xff]  }
 0x128   : > { %1050 = vrot.lane.b32.xlu0 %v987_v26, %s5203_s21  ;;  %v826_v26 = vsel %vm614_vm1, %v821_v22, %v825_v25  ;;  %v6364_v52 = vor.u32 %v1175_v5, %v1174_v38 }
 0x129   : > { %v1361_v10 = vpop.permute.xlu1 %1360  ;;  %v993_v12 = vsel %vm940_vm2, %v990_v4, %v992_v24 }
 0x12a   : > { %v1359_v2 = vpop.permute.xlu0 %1358  ;;  %v1947_v28 = vsel %vm1919_vm9, %v1882_v27, %v1361_v10  ;;  %v6390_v27 = vld [vmem:[%s5299_s19 + $0xe0] sm:$0xff]  }
 0x12b   : > { %1250 = vrot.lane.b32.xlu1 %v1169_v59, %s5205_s23  ;;  %v1945_v37 = vsel %vm1919_vm9, %v1880_v60, %v1359_v2  ;;  %v1172_v59 = vor.u32 %v1171_v50, %v1170_v30 }
 0x12c   : > { %1248 = vrot.lane.b32.xlu0 %v1165_v34, %s5205_s23  ;;  %v991_v34 = vsel %vm940_vm2, %v988_v62, %v990_v4  ;;  %v1318_v62 = vrot.slane %v6278_v18, 2 }
 0x12d   : > { %v1557_v61 = vpop.permute.xlu1 %1556  ;;  %v1177_v32 = vsel %vm1070_vm3, %v1172_v59, %v6364_v52  ;;  %v1173_v49 = vsel %vm1070_vm3, %v6269_v17, %v1172_v59  ;;  %v829_v59 = vor.u32 %v6339_v58, %v825_v25 }
 0x12e   : > { %v1555_v56 = vpop.permute.xlu0 %1554  ;;  %v2012_v14 = vsel %vm1984_vm10, %v1947_v28, %v1557_v61  ;;  %v1503_v61 = vrot.slane %v6317_v0, 3  ;;  %v1321_v63 = vsel %vm1268_vm0, %v1318_v62, %v1320_v39  ;;  %v1319_v28 = vsel %vm1268_vm0, %v1316_v19, %v1318_v62 }
 0x12f   : > { %1380 = vrot.lane.b32.xlu1 %v1317_v1, %s5202_s20  ;;  %v2010_v53 = vsel %vm1984_vm10, %v1945_v37, %v1555_v56  ;;  %v1499_v1 = vrot.slane %v6291_v54, 3  ;;  %v6412_v19 = vshll.u32 %v6390_v27, 16 }
 0x130   : > { %1378 = vrot.lane.b32.xlu0 %v1315_v44, %s5202_s20  ;;  %v6373_v44 = vld [vmem:[%s5299_s19 + $0xd8] sm:$0xff]   ;;  %v6383_v21 = vor.u32 %v1503_v61, %v1502_v41 }
 0x131   : > { %v1687_v45 = vpop.permute.xlu1 %1686  ;;  %v6386_v29 = vshll.u32 %v6373_v44, 16  ;;  %v1183_v25 = vrot.slane %v6412_v19, 2 }
 0x132   : > { %v2077_v20 = vsel %vm2049_vm11, %v2012_v14, %v1687_v45  ;;  %v1685_v8 = vpop.permute.xlu0 %1684 }
 0x133   : > { %v2075_v40 = vsel %vm2049_vm11, %v2010_v53, %v1685_v8  ;;  %1576 = vrot.lane.b32.xlu1 %v1497_v7, %s5206_s15  ;;  %v1500_v7 = vor.u32 %v1499_v1, %v1498_v3  ;;  %v833_v53 = vrot.slane %v6386_v29, 1  ;;  %v835_v8 = vshrl.u32 %v6373_v44, 16 }
 0x134   : > { %1574 = vrot.lane.b32.xlu0 %v1493_v16, %s5206_s15  ;;  %4803 = vmatprep.mubr.msk.bf16.mxu0 %vm2136_vm12, %v2075_v40  ;;  %v996_v3 = vrot.slane %v6390_v27, 1 }
 0x135   : > { %4804 = vmatmul.mubr.msk.bf16.gmra.mrb[24].mxu0 %vm2136_vm12, %v2077_v20  ;;  %v906_v11 = vpop.permute.xlu1 %905  ;;  %v1505_v16 = vsel %vm1398_vm4, %v1500_v7, %v6383_v21  ;;  %v837_v5 = vor.u32 %v835_v8, %v833_v53  ;;  %v1178_v23 = vrot.slane %v835_v8, 1  ;;  %v834_v1 = vsel %vm614_vm1, %v829_v59, %v833_v53 }
 0x136   : > { %v904_v13 = vpop.permute.xlu0 %903  ;;  %v1756_v17 = vsel %vm1724_vm6, %v5783_v48, %v906_v11  ;;  %v1646_v11 = vrot.slane %v6295_v36, 3 }
 0x137   : > { %1706 = vrot.lane.b32.xlu1 %v1643_v51, %s5207_s16  ;;  %v1754_v37 = vsel %vm1724_vm6, %v5155_v6, %v904_v13  ;;  %v1644_v51 = vrot.slane %v6278_v18, 3 }
 0x138   : > { %1704 = vrot.lane.b32.xlu0 %v1641_v46, %s5207_s16 }
 0x139   : > { %v1037_v47 = vpop.permute.xlu1 %1036 }
 0x13a   : > { %v1035_v43 = vpop.permute.xlu0 %1034  ;;  %v1821_v14 = vsel %vm1789_vm7, %v1756_v17, %v1037_v47  ;;  %v841_v47 = vrot.slane %v6412_v19, 1 }
 0x13b   : > { %925 = vrot.lane.b32.xlu1 %v826_v26, %s5204_s22  ;;  %v1819_v20 = vsel %vm1789_vm7, %v1754_v37, %v1035_v43  ;;  %v1501_v26 = vsel %vm1398_vm4, %v6288_v55, %v1500_v7  ;;  %v1647_v55 = vsel %vm1594_vm5, %v1644_v51, %v1646_v11  ;;  %v1506_v7 = vrot.slane %v835_v8, 2 }
 0x13c   : > { %923 = vrot.lane.b32.xlu0 %v818_v33, %s5204_s22  ;;  %v6434_v33 = vshrl.u32 %v6390_v27, 16  ;;  %v1324_v37 = vrot.slane %v6390_v27, 2 }
 0x13d   : > { %v1235_v10 = vpop.permute.xlu1 %1234 }
 0x13e   : > { %v1233_v2 = vpop.permute.xlu0 %1232  ;;  %v1886_v48 = vsel %vm1854_vm8, %v1821_v14, %v1235_v10  ;;  %v1182_v0 = vrot.slane %v6434_v33, 1  ;;  %v1510_v17 = vrot.slane %v6434_v33, 2 }
 0x13f   : > { %1056 = vrot.lane.b32.xlu1 %v993_v12, %s5203_s21  ;;  %v1884_v40 = vsel %vm1854_vm8, %v1819_v20, %v1233_v2  ;;  %v1645_v12 = vsel %vm1594_vm5, %v1642_v35, %v1644_v51  ;;  %v994_v2 = vrot.slane %v6373_v44, 1  ;;  %v1179_v35 = vrot.slane %v6386_v29, 2  ;;  %v5156_v51 = vld [vmem:[%s5299_s19 + $0x80] sm:$0xff]  }
 0x140   : > { %1054 = vrot.lane.b32.xlu0 %v991_v34, %s5203_s21  ;;  %v842_v34 = vsel %vm614_vm1, %v837_v5, %v841_v47  ;;  %v6459_v62 = vor.u32 %v1183_v25, %v1182_v0 }
 0x141   : > { %v1365_v54 = vpop.permute.xlu1 %1364  ;;  %v997_v61 = vsel %vm940_vm2, %v994_v2, %v996_v3 }
 0x142   : > { %v1363_v56 = vpop.permute.xlu0 %1362  ;;  %v1951_v22 = vsel %vm1919_vm9, %v1886_v48, %v1365_v54  ;;  %v6485_v48 = vld [vmem:[%s5299_s19 + $0xf0] sm:$0xff]  }
 0x143   : > { %1254 = vrot.lane.b32.xlu1 %v1177_v32, %s5205_s23  ;;  %v1949_v46 = vsel %vm1919_vm9, %v1884_v40, %v1363_v56  ;;  %v1180_v32 = vor.u32 %v1179_v35, %v1178_v23 }
 0x144   : > { %1252 = vrot.lane.b32.xlu0 %v1173_v49, %s5205_s23  ;;  %v995_v49 = vsel %vm940_vm2, %v992_v24, %v994_v2  ;;  %v1322_v24 = vrot.slane %v6373_v44, 2 }
 0x145   : > { %v1561_v60 = vpop.permute.xlu1 %1560  ;;  %v1185_v6 = vsel %vm1070_vm3, %v1180_v32, %v6459_v62  ;;  %v1181_v14 = vsel %vm1070_vm3, %v6364_v52, %v1180_v32  ;;  %v845_v32 = vor.u32 %v6434_v33, %v841_v47 }
 0x146   : > { %v1559_v45 = vpop.permute.xlu0 %1558  ;;  %v2016_v57 = vsel %vm1984_vm10, %v1951_v22, %v1561_v60  ;;  %v1511_v60 = vrot.slane %v6412_v19, 3  ;;  %v1325_v8 = vsel %vm1268_vm0, %v1322_v24, %v1324_v37  ;;  %v1323_v22 = vsel %vm1268_vm0, %v1320_v39, %v1322_v24 }
 0x147   : > { %1384 = vrot.lane.b32.xlu1 %v1321_v63, %s5202_s20  ;;  %v2014_v4 = vsel %vm1984_vm10, %v1949_v46, %v1559_v45  ;;  %v1507_v63 = vrot.slane %v6386_v29, 3  ;;  %v6509_v39 = vshll.u32 %v6485_v48, 16 }
 0x148   : > { %1382 = vrot.lane.b32.xlu0 %v1319_v28, %s5202_s20  ;;  %v6468_v28 = vld [vmem:[%s5299_s19 + $0xe8] sm:$0xff]   ;;  %v6478_v53 = vor.u32 %v1511_v60, %v1510_v17 }
 0x149   : > { %v1691_v13 = vpop.permute.xlu1 %1690  ;;  %v6481_v20 = vshll.u32 %v6468_v28, 16  ;;  %v1191_v33 = vrot.slane %v6509_v39, 2 }
 0x14a   : > { %v2081_v30 = vsel %vm2049_vm11, %v2016_v57, %v1691_v13  ;;  %v1689_v50 = vpop.permute.xlu0 %1688 }
 0x14b   : > { %v2079_v38 = vsel %vm2049_vm11, %v2014_v4, %v1689_v50  ;;  %1580 = vrot.lane.b32.xlu1 %v1505_v16, %s5206_s15  ;;  %v1508_v16 = vor.u32 %v1507_v63, %v1506_v7  ;;  %v849_v4 = vrot.slane %v6481_v20, 1  ;;  %v6506_v50 = vshrl.u32 %v6468_v28, 16 }
 0x14c   : > { %1578 = vrot.lane.b32.xlu0 %v1501_v26, %s5206_s15  ;;  %4807 = vmatprep.mubr.msk.bf16.mxu0 %vm2136_vm12, %v2079_v38  ;;  %v1000_v7 = vrot.slane %v6485_v48, 1 }
 0x14d   : > { %4808 = vmatmul.mubr.msk.bf16.gmra.mrb[28].mxu0 %vm2136_vm12, %v2081_v30  ;;  %v910_v43 = vpop.permute.xlu1 %909  ;;  %v1513_v26 = vsel %vm1398_vm4, %v1508_v16, %v6478_v53  ;;  %v853_v25 = vor.u32 %v6506_v50, %v849_v4  ;;  %v1186_v19 = vrot.slane %v6506_v50, 1  ;;  %v850_v17 = vsel %vm614_vm1, %v845_v32, %v849_v4 }
 0x14e   : > { %v908_v10 = vpop.permute.xlu0 %907  ;;  %v1760_v52 = vsel %vm1724_vm6, %v5883_v9, %v910_v43  ;;  %v1650_v43 = vrot.slane %v6390_v27, 3 }
 0x14f   : > { %1710 = vrot.lane.b32.xlu1 %v1647_v55, %s5207_s16  ;;  %v1758_v46 = vsel %vm1724_vm6, %v5156_v51, %v908_v10  ;;  %v1648_v55 = vrot.slane %v6373_v44, 3  ;;  %v1519_v51 = vrot.slane %v6509_v39, 3 }
 0x150   : > { %1708 = vrot.lane.b32.xlu0 %v1645_v12, %s5207_s16 }
 0x151   : > { %v1041_v58 = vpop.permute.xlu1 %1040 }
 0x152   : > { %v1039_v41 = vpop.permute.xlu0 %1038  ;;  %v1825_v57 = vsel %vm1789_vm7, %v1760_v52, %v1041_v58  ;;  %v857_v58 = vrot.slane %v6509_v39, 1  ;;  %v1514_v52 = vrot.slane %v6506_v50, 2  ;;  %v6596_v50 = vld [vmem:[%s375_s24] sm:$0x7] }
 0x153   : > { %929 = vrot.lane.b32.xlu1 %v842_v34, %s5204_s22  ;;  %v1823_v30 = vsel %vm1789_vm7, %v1758_v46, %v1039_v41  ;;  %v1509_v34 = vsel %vm1398_vm4, %v6383_v21, %v1508_v16  ;;  %v1651_v21 = vsel %vm1594_vm5, %v1648_v55, %v1650_v43  ;;  %v6573_v16 = vld [vmem:[%s5299_s19 + $0xf8] sm:$0xff]  }
 0x154   : > { %927 = vrot.lane.b32.xlu0 %v834_v1, %s5204_s22  ;;  %v6537_v1 = vshrl.u32 %v6485_v48, 16 }
 0x155   : > { %v1239_v54 = vpop.permute.xlu1 %1238 }
 0x156   : > { %v1237_v56 = vpop.permute.xlu0 %1236  ;;  %v1890_v9 = vsel %vm1854_vm8, %v1825_v57, %v1239_v54  ;;  %v1190_v47 = vrot.slane %v6537_v1, 1  ;;  %v1328_v57 = vrot.slane %v6485_v48, 2 }
 0x157   : > { %1060 = vrot.lane.b32.xlu1 %v997_v61, %s5203_s21  ;;  %v1888_v38 = vsel %vm1854_vm8, %v1823_v30, %v1237_v56  ;;  %v1649_v61 = vsel %vm1594_vm5, %v1646_v11, %v1648_v55  ;;  %v998_v56 = vrot.slane %v6468_v28, 1  ;;  %v1187_v11 = vrot.slane %v6481_v20, 2 }
 0x158   : > { %1058 = vrot.lane.b32.xlu0 %v995_v49, %s5203_s21  ;;  %v858_v49 = vsel %vm614_vm1, %v853_v25, %v857_v58 }
 0x159   : > { %v1369_v29 = vpop.permute.xlu1 %1368  ;;  %v1188_v24 = vor.u32 %v1187_v11, %v1186_v19 }
 0x15a   : > { %v1367_v45 = vpop.permute.xlu0 %1366  ;;  %v1955_v5 = vsel %vm1919_vm9, %v1890_v9, %v1369_v29  ;;  %v6567_v29 = vor.u32 %v1191_v33, %v1190_v47 }
 0x15b   : > { %1258 = vrot.lane.b32.xlu1 %v1185_v6, %s5205_s23  ;;  %v1953_v12 = vsel %vm1919_vm9, %v1888_v38, %v1367_v45  ;;  %v1001_v6 = vsel %vm940_vm2, %v998_v56, %v1000_v7  ;;  %v999_v45 = vsel %vm940_vm2, %v996_v3, %v998_v56  ;;  %v1326_v3 = vrot.slane %v6468_v28, 2 }
 0x15c   : > { %1256 = vrot.lane.b32.xlu0 %v1181_v14, %s5205_s23  ;;  %v1193_v46 = vsel %vm1070_vm3, %v1188_v24, %v6567_v29 }
 0x15d   : > { %v1565_v40 = vpop.permute.xlu1 %1564  ;;  %v1329_v38 = vsel %vm1268_vm0, %v1326_v3, %v1328_v57  ;;  %v1327_v55 = vsel %vm1268_vm0, %v1324_v37, %v1326_v3 }
 0x15e   : > { %v1563_v13 = vpop.permute.xlu0 %1562  ;;  %v2020_v59 = vsel %vm1984_vm10, %v1955_v5, %v1565_v40  ;;  %v1515_v40 = vrot.slane %v6481_v20, 3  ;;  %v1189_v20 = vsel %vm1070_vm3, %v6459_v62, %v1188_v24 }
 0x15f   : > { %1388 = vrot.lane.b32.xlu1 %v1325_v8, %s5202_s20  ;;  %v2018_v2 = vsel %vm1984_vm10, %v1953_v12, %v1563_v13 }
 0x160   : > { %1386 = vrot.lane.b32.xlu0 %v1323_v22, %s5202_s20  ;;  %v1518_v22 = vrot.slane %v6537_v1, 2  ;;  %v1516_v30 = vor.u32 %v1515_v40, %v1514_v52 }
 0x161   : > { %v1695_v10 = vpop.permute.xlu1 %1694 }
 0x162   : > { %v2085_v23 = vsel %vm2049_vm11, %v2020_v59, %v1695_v10  ;;  %v1693_v35 = vpop.permute.xlu0 %1692  ;;  %v6594_v9 = vor.u32 %v1519_v51, %v1518_v22  ;;  %v6609_v59 = vshrl.u32 %v6573_v16, 16  ;;  %v5157_v10 = vld [vmem:[%s5299_s19 + $0x90] sm:$0xff]   ;;  %v1517_v25 = vsel %vm1398_vm4, %v6478_v53, %v1516_v30 }
 0x163   : > { %v2083_v0 = vsel %vm2049_vm11, %v2018_v2, %v1693_v35  ;;  %1584 = vrot.lane.b32.xlu1 %v1513_v26, %s5206_s15  ;;  %v6591_v26 = vshll.u32 %v6573_v16, 16  ;;  %v6620_v35 = vshll.u32 %v6596_v50, 16  ;;  %v1198_v51 = vshrl.u32 %v6596_v50, 16 }
 0x164   : > { %1582 = vrot.lane.b32.xlu0 %v1509_v34, %s5206_s15  ;;  %4811 = vmatprep.mubr.msk.bf16.mxu0 %vm2136_vm12, %v2083_v0 }
 0x165   : > { %4812 = vmatmul.mubr.msk.bf16.gmra.mrb[32].mxu0 %vm2136_vm12, %v2085_v23  ;;  %v914_v41 = vpop.permute.xlu1 %913  ;;  %v865_v12 = vrot.slane %v6591_v26, 1 }
 0x166   : > { %v912_v54 = vpop.permute.xlu0 %911  ;;  %v1764_v62 = vsel %vm1724_vm6, %v5977_v15, %v914_v41  ;;  %v6617_v15 = vld [vmem:[%s7304_s3] ss:$0 sm:$0xff] }
 0x167   : > { %1714 = vrot.lane.b32.xlu1 %v1651_v21, %s5207_s16  ;;  %v1762_v34 = vsel %vm1724_vm6, %v5157_v10, %v912_v54  ;;  %v1521_v21 = vsel %vm1398_vm4, %v1516_v30, %v6594_v9  ;;  %v1652_v54 = vrot.slane %v6468_v28, 3  ;;  %v869_v33 = vor.u32 %v6609_v59, %v865_v12 }
 0x168   : > { %1712 = vrot.lane.b32.xlu0 %v1649_v61, %s5207_s16  ;;  %v1002_v10 = vrot.slane %v6573_v16, 1 }
 0x169   : > { %v1045_v63 = vpop.permute.xlu1 %1044 }
 0x16a   : > { %v1043_v60 = vpop.permute.xlu0 %1042  ;;  %v1829_v2 = vsel %vm1789_vm7, %v1764_v62, %v1045_v63 }
 0x16b   : > { %933 = vrot.lane.b32.xlu1 %v858_v49, %s5204_s22  ;;  %v1827_v37 = vsel %vm1789_vm7, %v1762_v34, %v1043_v60  ;;  %v1654_v49 = vrot.slane %v6485_v48, 3  ;;  %v1004_v34 = vrot.slane %v6596_v50, 1 }
 0x16c   : > { %931 = vrot.lane.b32.xlu0 %v850_v17, %s5204_s22 }
 0x16d   : > { %v1243_v14 = vpop.permute.xlu1 %1242  ;;  %v1655_v22 = vsel %vm1594_vm5, %v1652_v54, %v1654_v49 }
 0x16e   : > { %v1241_v8 = vpop.permute.xlu0 %1240  ;;  %v1894_v0 = vsel %vm1854_vm8, %v1829_v2, %v1243_v14  ;;  %v873_v14 = vrot.slane %v6620_v35, 1  ;;  %v1194_v2 = vrot.slane %v6609_v59, 1 }
 0x16f   : > { %1064 = vrot.lane.b32.xlu1 %v1001_v6, %s5203_s21  ;;  %v1892_v41 = vsel %vm1854_vm8, %v1827_v37, %v1241_v8 }
 0x170   : > { %1062 = vrot.lane.b32.xlu0 %v999_v45, %s5203_s21 }
 0x171   : > { %v1373_v13 = vpop.permute.xlu1 %1372 }
 0x172   : > { %v1371_v4 = vpop.permute.xlu0 %1370  ;;  %v1959_v61 = vsel %vm1919_vm9, %v1894_v0, %v1373_v13 }
 0x173   : > { %1262 = vrot.lane.b32.xlu1 %v1193_v46, %s5205_s23  ;;  %v1957_v56 = vsel %vm1919_vm9, %v1892_v41, %v1371_v4  ;;  %v861_v4 = vor.u32 %v6537_v1, %v857_v58  ;;  %v1200_v58 = vrot.slane %v1198_v51, 1  ;;  %v1201_v1 = vrot.slane %v6620_v35, 2 }
 0x174   : > { %1260 = vrot.lane.b32.xlu0 %v1189_v20, %s5205_s23  ;;  %v1653_v20 = vsel %vm1594_vm5, %v1650_v43, %v1652_v54  ;;  %v1195_v43 = vrot.slane %v6591_v26, 2 }
 0x175   : > { %v1569_v5 = vpop.permute.xlu1 %1568  ;;  %v866_v37 = vsel %vm614_vm1, %v861_v4, %v865_v12  ;;  %v1202_v41 = vor.u32 %v1201_v1, %v1200_v58  ;;  %v1522_v12 = vrot.slane %v6609_v59, 2 }
 0x176   : > { %v1567_v23 = vpop.permute.xlu0 %1566  ;;  %v2024_v19 = vsel %vm1984_vm10, %v1959_v61, %v1569_v5  ;;  %v874_v5 = vsel %vm614_vm1, %v869_v33, %v873_v14  ;;  %v1332_v33 = vrot.slane %v6596_v50, 2  ;;  %v5158_v14 = vld [vmem:[%s5299_s19 + $0xa0] sm:$0xff]  }
 0x177   : > { %1392 = vrot.lane.b32.xlu1 %v1329_v38, %s5202_s20  ;;  %v2022_v63 = vsel %vm1984_vm10, %v1957_v56, %v1567_v23  ;;  %v1523_v56 = vrot.slane %v6591_v26, 3 }
 0x178   : > { %v4781_v32 = vpop.f32.mrb[0].mxu0  ;;  %1390 = vrot.lane.b32.xlu0 %v1327_v55, %s5202_s20 }
 0x179   : > { %v2248_v53 = vadd.f32 %v4781_v32, %v6617_v15  ;;  %v2239_v11 = vpop.f32.mrb[1].mxu0  ;;  %v1699_v47 = vpop.permute.xlu1 %1698  ;;  %v1003_v32 = vsel %vm940_vm2, %v1000_v7, %v1002_v10  ;;  %v1524_v26 = vor.u32 %v1523_v56, %v1522_v12 }
 0x17a   : > { %v2240_v17 = vadd.f32 %v6617_v15, %v2239_v11  ;;  %v2089_v60 = vsel %vm2049_vm11, %v2024_v19, %v1699_v47  ;;  %v4782_v6 = vpop.f32.mrb[2].mxu0  ;;  %v1697_v24 = vpop.permute.xlu0 %1696  ;;  %v1526_v19 = vrot.slane %v1198_v51, 2  ;;  %v1330_v47 = vrot.slane %v6573_v16, 2 }
 0x17b   : > { %v2251_v45 = vadd.f32 %v4782_v6, %v6617_v15  ;;  %v2087_v8 = vsel %vm2049_vm11, %v2022_v63, %v1697_v24  ;;  %v2242_v52 = vpop.f32.mrb[3].mxu0  ;;  %1588 = vrot.lane.b32.xlu1 %v1521_v21, %s5206_s15  ;;  %v2496_v46 = vmax.f32 %v2248_v53, 0.0  ;;  %v1196_v21 = vor.u32 %v1195_v43, %v1194_v2 }
 0x17c   : > { %v2243_v40 = vadd.f32 %v6617_v15, %v2242_v52  ;;  %1586 = vrot.lane.b32.xlu0 %v1517_v25, %s5206_s15  ;;  %4815 = vmatprep.mubr.msk.bf16.mxu0 %vm2136_vm12, %v2087_v8  ;;  %v2494_v30 = vmax.f32 %v2240_v17, 0.0  ;;  %v1005_v25 = vsel %vm940_vm2, %v1002_v10, %v1004_v34  ;;  %v1527_v53 = vrot.slane %v6620_v35, 3 }
 0x17d   : > { %v2497_v3 = vmax.f32 %v2251_v45, 0.0  ;;  %4816 = vmatmul.mubr.msk.bf16.gmra.mrb[36].mxu0 %vm2136_vm12, %v2089_v60  ;;  %v918_v13 = vpop.permute.xlu1 %917  ;;  %v1203_v11 = vsel %vm1070_vm3, %v1196_v21, %v1202_v41  ;;  %v1197_v63 = vsel %vm1070_vm3, %v6567_v29, %v1196_v21  ;;  %v1333_v35 = vsel %vm1268_vm0, %v1330_v47, %v1332_v33  ;;  %v5159_v33 = vld [vmem:[%s5299_s19 + $0xb0] sm:$0xff]  }
 0x17e   : > { %v2495_v38 = vmax.f32 %v2243_v40, 0.0  ;;  %v916_v62 = vpop.permute.xlu0 %915  ;;  %v1528_v59 = vor.u32 %v1527_v53, %v1526_v19  ;;  %v1768_v60 = vsel %vm1724_vm6, %v6077_v31, %v918_v13  ;;  %v1331_v24 = vsel %vm1268_vm0, %v1328_v57, %v1330_v47 }
 0x17f   : > { %v2559_v55 = vpack.c.bf16 %v2497_v3, %v2496_v46  ;;  %1718 = vrot.lane.b32.xlu1 %v1655_v22, %s5207_s16  ;;  %v1766_v29 = vsel %vm1724_vm6, %v5158_v14, %v916_v62  ;;  %v1656_v57 = vrot.slane %v6573_v16, 3  ;;  %v1658_v3 = vrot.slane %v6596_v50, 3 }
 0x180   : > { %1716 = vrot.lane.b32.xlu0 %v1653_v20, %s5207_s16  ;;  %v2558_v39 = vpack.c.bf16 %v2495_v38, %v2494_v30  ;;  %v1529_v22 = vsel %vm1398_vm4, %v1524_v26, %v1528_v59  ;;  %v1525_v62 = vsel %vm1398_vm4, %v6594_v9, %v1524_v26 }
 0x181   : > { %v1049_v23 = vpop.permute.xlu1 %1048  ;;  %v1659_v9 = vsel %vm1594_vm5, %v1656_v57, %v1658_v3 }
 0x182   : > { %4847 = vmatprep.mubr.msk.bf16.mxu1 %vm2611_vm13, %v2558_v39  ;;  %v1047_v0 = vpop.permute.xlu0 %1046  ;;  %v1833_v45 = vsel %vm1789_vm7, %v1768_v60, %v1049_v23 }
 0x183   : > { %4848 = vmatmul.mubr.msk.bf16.vlgmr.msra.gmra.mrb[0].mxu1 %vm2611_vm13, %v2559_v55  ;;  %937 = vrot.lane.b32.xlu1 %v874_v5, %s5204_s22  ;;  %v1831_v52 = vsel %vm1789_vm7, %v1766_v29, %v1047_v0  ;;  %v1657_v0 = vsel %vm1594_vm5, %v1654_v49, %v1656_v57 }
 0x184   : > { %935 = vrot.lane.b32.xlu0 %v866_v37, %s5204_s22 }
 0x185   : > { %v1247_v61 = vpop.permute.xlu1 %1246 }
 0x186   : > { %v1245_v54 = vpop.permute.xlu0 %1244  ;;  %v1898_v40 = vsel %vm1854_vm8, %v1833_v45, %v1247_v61 }
 0x187   : > { %1068 = vrot.lane.b32.xlu1 %v1005_v25, %s5203_s21  ;;  %v1896_v31 = vsel %vm1854_vm8, %v1831_v52, %v1245_v54 }
 0x188   : > { %1066 = vrot.lane.b32.xlu0 %v1003_v32, %s5203_s21 }
 0x189   : > { %v1377_v7 = vpop.permute.xlu1 %1376 }
 0x18a   : > { %v1375_v17 = vpop.permute.xlu0 %1374  ;;  %v1963_v51 = vsel %vm1919_vm9, %v1898_v40, %v1377_v7 }
 0x18b   : > { %1266 = vrot.lane.b32.xlu1 %v1203_v11, %s5205_s23  ;;  %v1961_v13 = vsel %vm1919_vm9, %v1896_v31, %v1375_v17 }
 0x18c   : > { %1264 = vrot.lane.b32.xlu0 %v1197_v63, %s5205_s23 }
 0x18d   : > { %v1573_v6 = vpop.permute.xlu1 %1572 }
 0x18e   : > { %v1571_v8 = vpop.permute.xlu0 %1570  ;;  %v2028_v20 = vsel %vm1984_vm10, %v1963_v51, %v1573_v6 }
 0x18f   : > { %1396 = vrot.lane.b32.xlu1 %v1333_v35, %s5202_s20  ;;  %v2026_v5 = vsel %vm1984_vm10, %v1961_v13, %v1571_v8 }
 0x190   : > { %v4785_v46 = vpop.f32.mrb[4].mxu0  ;;  %1394 = vrot.lane.b32.xlu0 %v1331_v24, %s5202_s20 }
 0x191   : > { %v2264_v4 = vadd.f32 %v4785_v46, %v6617_v15  ;;  %v2255_v30 = vpop.f32.mrb[5].mxu0  ;;  %v1703_v38 = vpop.permute.xlu1 %1702 }
 0x192   : > { %v2256_v55 = vadd.f32 %v6617_v15, %v2255_v30  ;;  %v2093_v10 = vsel %vm2049_vm11, %v2028_v20, %v1703_v38  ;;  %v4786_v34 = vpop.f32.mrb[6].mxu0  ;;  %v1701_v2 = vpop.permute.xlu0 %1700 }
 0x193   : > { %v2267_v50 = vadd.f32 %v4786_v34, %v6617_v15  ;;  %v2091_v39 = vsel %vm2049_vm11, %v2026_v5, %v1701_v2  ;;  %v2258_v43 = vpop.f32.mrb[7].mxu0  ;;  %1592 = vrot.lane.b32.xlu1 %v1529_v22, %s5206_s15  ;;  %v2500_v1 = vmax.f32 %v2264_v4, 0.0 }
 0x194   : > { %v2259_v58 = vadd.f32 %v6617_v15, %v2258_v43  ;;  %1590 = vrot.lane.b32.xlu0 %v1525_v62, %s5206_s15  ;;  %4819 = vmatprep.mubr.msk.bf16.mxu0 %vm2136_vm12, %v2091_v39  ;;  %v2498_v25 = vmax.f32 %v2256_v55, 0.0  ;;  %s4414_s15 = sshll.u32 %s5184_s27, 2 }
 0x195   : > { %v2501_v23 = vmax.f32 %v2267_v50, 0.0  ;;  %4820 = vmatmul.mubr.msk.bf16.gmra.mrb[40].mxu0 %vm2136_vm12, %v2093_v10  ;;  %v922_v37 = vpop.permute.xlu1 %921  ;;  %p381_p8 = scmp.lt.s32.totalorder %s4414_s15, 7 }
 0x196   : > { %v2499_v21 = vmax.f32 %v2259_v58, 0.0  ;;  %v920_v41 = vpop.permute.xlu0 %919  ;;  %v1772_v11 = vsel %vm1724_vm6, %v6183_v42, %v922_v37 }
 0x197   : > { %v2561_v61 = vpack.c.bf16 %v2501_v23, %v2500_v1  ;;  %1722 = vrot.lane.b32.xlu1 %v1659_v9, %s5207_s16  ;;  %v1770_v7 = vsel %vm1724_vm6, %v5159_v33, %v920_v41  ;;  %v5160_v1 = vld [vmem:[%s5299_s19 + $0xc0] sm:$0xff]   ;;  %s7326_s15 = smov (!%p381_p8, %s4414_s15), 7 }
 0x198   : > { %v2560_v32 = vpack.c.bf16 %v2499_v21, %v2498_v25  ;;  %1720 = vrot.lane.b32.xlu0 %v1657_v0, %s5207_s16  ;;  %s4415_s16 = sshll.u32 %s7322_s28, 3 }
 0x199   : > { %v1053_v54 = vpop.permute.xlu1 %1052  ;;  %s384_s12 = sadd.s32 %s4415_s16, %s7326_s15 }
 0x19a   : > { %4851 = vmatprep.mubr.msk.bf16.mxu1 %vm2611_vm13, %v2560_v32  ;;  %v1051_v12 = vpop.permute.xlu0 %1050  ;;  %v1837_v63 = vsel %vm1789_vm7, %v1772_v11, %v1053_v54  ;;  %s4416_s13 = sshll.u32 %s384_s12, 2 }
 0x19b   : > { %4852 = vmatmul.mubr.msk.bf16.gmra.mrb[4].mxu1 %vm2611_vm13, %v2561_v61  ;;  %v1835_v26 = vsel %vm1789_vm7, %v1770_v7, %v1051_v12  ;;  %s386_s18 = scalar_lea.vmem %s7309_s8, %s4416_s13 }
 0x19d   : > { %v1251_v56 = vpop.permute.xlu1 %1250 }
 0x19e   : > { %v1249_v19 = vpop.permute.xlu0 %1248  ;;  %v1902_v59 = vsel %vm1854_vm8, %v1837_v63, %v1251_v56 }
 0x19f   : > { %v1900_v35 = vsel %vm1854_vm8, %v1835_v26, %v1249_v19 }
 0x1a1   : > { %v1381_v53 = vpop.permute.xlu1 %1380 }
 0x1a2   : > { %v1379_v49 = vpop.permute.xlu0 %1378  ;;  %v1967_v60 = vsel %vm1919_vm9, %v1902_v59, %v1381_v53 }
 0x1a3   : > { %v1965_v24 = vsel %vm1919_vm9, %v1900_v35, %v1379_v49 }
 0x1a5   : > { %v1577_v47 = vpop.permute.xlu1 %1576 }
 0x1a6   : > { %v1575_v17 = vpop.permute.xlu0 %1574  ;;  %v2032_v42 = vsel %vm1984_vm10, %v1967_v60, %v1577_v47 }
 0x1a7   : > { %v2030_v8 = vsel %vm1984_vm10, %v1965_v24, %v1575_v17 }
 0x1a8   : > { %v4789_v6 = vpop.f32.mrb[8].mxu0 }
 0x1a9   : > { %v2280_v14 = vadd.f32 %v4789_v6, %v6617_v15  ;;  %v2271_v29 = vpop.f32.mrb[9].mxu0  ;;  %v1707_v45 = vpop.permute.xlu1 %1706 }
 0x1aa   : > { %v2272_v52 = vadd.f32 %v6617_v15, %v2271_v29  ;;  %v2097_v40 = vsel %vm2049_vm11, %v2032_v42, %v1707_v45  ;;  %v4790_v22 = vpop.f32.mrb[10].mxu0  ;;  %v1705_v31 = vpop.permute.xlu0 %1704 }
 0x1ab   : > { %v2283_v51 = vadd.f32 %v4790_v22, %v6617_v15  ;;  %v2095_v46 = vsel %vm2049_vm11, %v2030_v8, %v1705_v31  ;;  %v2274_v57 = vpop.f32.mrb[11].mxu0  ;;  %v2504_v13 = vmax.f32 %v2280_v14, 0.0 }
 0x1ac   : > { %v2275_v3 = vadd.f32 %v6617_v15, %v2274_v57  ;;  %4823 = vmatprep.mubr.msk.bf16.mxu0 %vm2136_vm12, %v2095_v46  ;;  %v2502_v30 = vmax.f32 %v2272_v52, 0.0 }
 0x1ad   : > { %v2505_v20 = vmax.f32 %v2283_v51, 0.0  ;;  %4824 = vmatmul.mubr.msk.bf16.gmra.mrb[44].mxu0 %vm2136_vm12, %v2097_v40  ;;  %v926_v4 = vpop.permute.xlu1 %925 }
 0x1ae   : > { %v2503_v38 = vmax.f32 %v2275_v3, 0.0  ;;  %v924_v62 = vpop.permute.xlu0 %923  ;;  %v1776_v58 = vsel %vm1724_vm6, %v6278_v18, %v926_v4 }
 0x1af   : > { %v2563_v5 = vpack.c.bf16 %v2505_v20, %v2504_v13  ;;  %v1774_v23 = vsel %vm1724_vm6, %v5160_v1, %v924_v62 }
 0x1b0   : > { %v2562_v55 = vpack.c.bf16 %v2503_v38, %v2502_v30  ;;  %v5149_v30 = vld [vmem:[%s7305_s4 + $0x10] sm:$0xff]  }
 0x1b1   : > { %v1057_v10 = vpop.permute.xlu1 %1056  ;;  %4911 = vmatprep.subr.bf16.mxu0 %v5149_v30 }
 0x1b2   : > { %4855 = vmatprep.mubr.msk.bf16.mxu1 %vm2611_vm13, %v2562_v55  ;;  %v1055_v34 = vpop.permute.xlu0 %1054  ;;  %v1841_v37 = vsel %vm1789_vm7, %v1776_v58, %v1057_v10  ;;  %4912 = vmatpush3.bf16.msra.mxu0 %v5149_v30 }
 0x1b3   : > { %4856 = vmatmul.mubr.msk.bf16.gmra.mrb[8].mxu1 %vm2611_vm13, %v2563_v5  ;;  %v1839_v25 = vsel %vm1789_vm7, %v1774_v23, %v1055_v34 }
 0x1b5   : > { %v1255_v2 = vpop.permute.xlu1 %1254 }
 0x1b6   : > { %v1253_v50 = vpop.permute.xlu0 %1252  ;;  %v1906_v21 = vsel %vm1854_vm8, %v1841_v37, %v1255_v2  ;;  %v5150_v37 = vld [vmem:[%s7305_s4 + $0x18] sm:$0xff]  }
 0x1b7   : > { %v1904_v41 = vsel %vm1854_vm8, %v1839_v25, %v1253_v50  ;;  %4913 = vmatprep.subr.bf16.mxu0 %v5150_v37 }
 0x1b8   : > { %4914 = vmatpush3.bf16.msra.mxu0 %v5150_v37 }
 0x1b9   : > { %v1385_v39 = vpop.permute.xlu1 %1384 }
 0x1ba   : > { %v1383_v43 = vpop.permute.xlu0 %1382  ;;  %v1971_v61 = vsel %vm1919_vm9, %v1906_v21, %v1385_v39 }
 0x1bb   : > { %v1969_v54 = vsel %vm1919_vm9, %v1904_v41, %v1383_v43 }
 0x1bd   : > { %v1581_v9 = vpop.permute.xlu1 %1580 }
 0x1be   : > { %v1579_v0 = vpop.permute.xlu0 %1578  ;;  %v2036_v18 = vsel %vm1984_vm10, %v1971_v61, %v1581_v9 }
 0x1bf   : > { %v2034_v53 = vsel %vm1984_vm10, %v1969_v54, %v1579_v0 }
 0x1c0   : > { %v4793_v32 = vpop.f32.mrb[12].mxu0 }
 0x1c1   : > { %v2296_v12 = vadd.f32 %v4793_v32, %v6617_v15  ;;  %v2287_v56 = vpop.f32.mrb[13].mxu0  ;;  %v1711_v19 = vpop.permute.xlu1 %1710 }
 0x1c2   : > { %v2288_v49 = vadd.f32 %v6617_v15, %v2287_v56  ;;  %v2101_v11 = vsel %vm2049_vm11, %v2036_v18, %v1711_v19  ;;  %v4794_v47 = vpop.f32.mrb[14].mxu0  ;;  %v1709_v33 = vpop.permute.xlu0 %1708 }
 0x1c3   : > { %v2299_v7 = vadd.f32 %v4794_v47, %v6617_v15  ;;  %v2099_v63 = vsel %vm2049_vm11, %v2034_v53, %v1709_v33  ;;  %v2290_v17 = vpop.f32.mrb[15].mxu0  ;;  %v2508_v59 = vmax.f32 %v2296_v12, 0.0 }
 0x1c4   : > { %v2291_v26 = vadd.f32 %v6617_v15, %v2290_v17  ;;  %4827 = vmatprep.mubr.msk.bf16.mxu0 %vm2136_vm12, %v2099_v63  ;;  %v2506_v6 = vmax.f32 %v2288_v49, 0.0 }
 0x1c5   : > { %v2509_v35 = vmax.f32 %v2299_v7, 0.0  ;;  %4828 = vmatmul.mubr.msk.bf16.gmra.mrb[48].mxu0 %vm2136_vm12, %v2101_v11  ;;  %v930_v60 = vpop.permute.xlu1 %929 }
 0x1c6   : > { %v2507_v24 = vmax.f32 %v2291_v26, 0.0  ;;  %v928_v42 = vpop.permute.xlu0 %927  ;;  %v1780_v51 = vsel %vm1724_vm6, %v6373_v44, %v930_v60 }
 0x1c7   : > { %v2565_v14 = vpack.c.bf16 %v2509_v35, %v2508_v59  ;;  %v1778_v57 = vsel %vm1724_vm6, %v6295_v36, %v928_v42 }
 0x1c8   : > { %v2564_v29 = vpack.c.bf16 %v2507_v24, %v2506_v6 }
 0x1c9   : > { %v1061_v45 = vpop.permute.xlu1 %1060 }
 0x1ca   : > { %4859 = vmatprep.mubr.msk.bf16.mxu1 %vm2611_vm13, %v2564_v29  ;;  %v1059_v8 = vpop.permute.xlu0 %1058  ;;  %v1845_v3 = vsel %vm1789_vm7, %v1780_v51, %v1061_v45 }
 0x1cb   : > { %4860 = vmatmul.mubr.msk.bf16.gmra.mrb[12].mxu1 %vm2611_vm13, %v2565_v14  ;;  %v1843_v20 = vsel %vm1789_vm7, %v1778_v57, %v1059_v8 }
 0x1cd   : > { %v1259_v52 = vpop.permute.xlu1 %1258 }
 0x1ce   : > { %v1257_v40 = vpop.permute.xlu0 %1256  ;;  %v1910_v4 = vsel %vm1854_vm8, %v1845_v3, %v1259_v52 }
 0x1cf   : > { %v1908_v38 = vsel %vm1854_vm8, %v1843_v20, %v1257_v40 }
 0x1d1   : > { %v1389_v22 = vpop.permute.xlu1 %1388 }
 0x1d2   : > { %v1387_v31 = vpop.permute.xlu0 %1386  ;;  %v1975_v62 = vsel %vm1919_vm9, %v1910_v4, %v1389_v22 }
 0x1d3   : > { %v1973_v5 = vsel %vm1919_vm9, %v1908_v38, %v1387_v31 }
 0x1d5   : > { %v1585_v46 = vpop.permute.xlu1 %1584 }
 0x1d6   : > { %v1583_v13 = vpop.permute.xlu0 %1582  ;;  %v2040_v36 = vsel %vm1984_vm10, %v1975_v62, %v1585_v46 }
 0x1d7   : > { %v2038_v2 = vsel %vm1984_vm10, %v1973_v5, %v1583_v13 }
 0x1d8   : > { %v4797_v44 = vpop.f32.mrb[16].mxu0 }
 0x1d9   : > { %v2312_v55 = vadd.f32 %v4797_v44, %v6617_v15  ;;  %v2303_v10 = vpop.f32.mrb[17].mxu0  ;;  %v1715_v34 = vpop.permute.xlu1 %1714 }
 0x1da   : > { %v2304_v50 = vadd.f32 %v6617_v15, %v2303_v10  ;;  %v2105_v39 = vsel %vm2049_vm11, %v2040_v36, %v1715_v34  ;;  %v4798_v43 = vpop.f32.mrb[18].mxu0  ;;  %v1713_v58 = vpop.permute.xlu0 %1712 }
 0x1db   : > { %v2315_v9 = vadd.f32 %v4798_v43, %v6617_v15  ;;  %v2103_v1 = vsel %vm2049_vm11, %v2038_v2, %v1713_v58  ;;  %v2306_v23 = vpop.f32.mrb[19].mxu0  ;;  %v2512_v25 = vmax.f32 %v2312_v55, 0.0 }
 0x1dc   : > { %v2307_v0 = vadd.f32 %v6617_v15, %v2306_v23  ;;  %4831 = vmatprep.mubr.msk.bf16.mxu0 %vm2136_vm12, %v2103_v1  ;;  %v2510_v61 = vmax.f32 %v2304_v50, 0.0 }
 0x1dd   : > { %v2513_v21 = vmax.f32 %v2315_v9, 0.0  ;;  %4832 = vmatmul.mubr.msk.bf16.gmra.mrb[52].mxu0 %vm2136_vm12, %v2105_v39  ;;  %v934_v41 = vpop.permute.xlu1 %933 }
 0x1de   : > { %v2511_v32 = vmax.f32 %v2307_v0, 0.0  ;;  %v932_v54 = vpop.permute.xlu0 %931  ;;  %v1784_v33 = vsel %vm1724_vm6, %v6468_v28, %v934_v41 }
 0x1df   : > { %v2567_v18 = vpack.c.bf16 %v2513_v21, %v2512_v25  ;;  %v1782_v63 = vsel %vm1724_vm6, %v6390_v27, %v932_v54 }
 0x1e0   : > { %v2566_v12 = vpack.c.bf16 %v2511_v32, %v2510_v61 }
 0x1e1   : > { %v1065_v56 = vpop.permute.xlu1 %1064 }
 0x1e2   : > { %4863 = vmatprep.mubr.msk.bf16.mxu1 %vm2611_vm13, %v2566_v12  ;;  %v1063_v19 = vpop.permute.xlu0 %1062  ;;  %v1849_v17 = vsel %vm1789_vm7, %v1784_v33, %v1065_v56 }
 0x1e3   : > { %4864 = vmatmul.mubr.msk.bf16.gmra.mrb[16].mxu1 %vm2611_vm13, %v2567_v18  ;;  %v1847_v59 = vsel %vm1789_vm7, %v1782_v63, %v1063_v19 }
 0x1e5   : > { %v1263_v53 = vpop.permute.xlu1 %1262 }
 0x1e6   : > { %v1261_v49 = vpop.permute.xlu0 %1260  ;;  %v1914_v35 = vsel %vm1854_vm8, %v1849_v17, %v1263_v53 }
 0x1e7   : > { %v1912_v60 = vsel %vm1854_vm8, %v1847_v59, %v1261_v49 }
 0x1e9   : > { %v1393_v11 = vpop.permute.xlu1 %1392 }
 0x1ea   : > { %v1391_v47 = vpop.permute.xlu0 %1390  ;;  %v1979_v6 = vsel %vm1919_vm9, %v1914_v35, %v1393_v11 }
 0x1eb   : > { %v1977_v42 = vsel %vm1919_vm9, %v1912_v60, %v1391_v47 }
 0x1ed   : > { %v1589_v7 = vpop.permute.xlu1 %1588 }
 0x1ee   : > { %v1587_v26 = vpop.permute.xlu0 %1586  ;;  %v2044_v28 = vsel %vm1984_vm10, %v1979_v6, %v1589_v7 }
 0x1ef   : > { %v2042_v45 = vsel %vm1984_vm10, %v1977_v42, %v1587_v26 }
 0x1f0   : > { %v4801_v24 = vpop.f32.mrb[20].mxu0 }
 0x1f1   : > { %v2328_v14 = vadd.f32 %v4801_v24, %v6617_v15  ;;  %v2319_v29 = vpop.f32.mrb[21].mxu0  ;;  %v1719_v27 = vpop.permute.xlu1 %1718 }
 0x1f2   : > { %v2320_v8 = vadd.f32 %v6617_v15, %v2319_v29  ;;  %v4802_v52 = vpop.f32.mrb[22].mxu0  ;;  %v1717_v40 = vpop.permute.xlu0 %1716  ;;  %v2109_v22 = vsel %vm2049_vm11, %v2044_v28, %v1719_v27 }
 0x1f3   : > { %v2331_v31 = vadd.f32 %v4802_v52, %v6617_v15  ;;  %v2107_v51 = vsel %vm2049_vm11, %v2042_v45, %v1717_v40  ;;  %v2322_v46 = vpop.f32.mrb[23].mxu0  ;;  %v2516_v3 = vmax.f32 %v2328_v14, 0.0 }
 0x1f4   : > { %v2323_v57 = vadd.f32 %v6617_v15, %v2322_v46  ;;  %4835 = vmatprep.mubr.msk.bf16.mxu0 %vm2136_vm12, %v2107_v51  ;;  %v2514_v4 = vmax.f32 %v2320_v8, 0.0 }
 0x1f5   : > { %v2517_v13 = vmax.f32 %v2331_v31, 0.0  ;;  %4836 = vmatmul.mubr.msk.bf16.gmra.mrb[56].mxu0 %vm2136_vm12, %v2109_v22  ;;  %v938_v20 = vpop.permute.xlu1 %937 }
 0x1f6   : > { %v2515_v30 = vmax.f32 %v2323_v57, 0.0  ;;  %v936_v38 = vpop.permute.xlu0 %935  ;;  %v1788_v50 = vsel %vm1724_vm6, %v6573_v16, %v938_v20 }
 0x1f7   : > { %v2569_v62 = vpack.c.bf16 %v2517_v13, %v2516_v3  ;;  %v1786_v43 = vsel %vm1724_vm6, %v6485_v48, %v936_v38 }
 0x1f8   : > { %v2568_v44 = vpack.c.bf16 %v2515_v30, %v2514_v4 }
 0x1f9   : > { %v1069_v5 = vpop.permute.xlu1 %1068 }
 0x1fa   : > { %4867 = vmatprep.mubr.msk.bf16.mxu1 %vm2611_vm13, %v2568_v44  ;;  %v1067_v36 = vpop.permute.xlu0 %1066  ;;  %v1853_v58 = vsel %vm1789_vm7, %v1788_v50, %v1069_v5 }
 0x1fb   : > { %4868 = vmatmul.mubr.msk.bf16.gmra.mrb[20].mxu1 %vm2611_vm13, %v2569_v62  ;;  %v1851_v1 = vsel %vm1789_vm7, %v1786_v43, %v1067_v36 }
 0x1fd   : > { %v1267_v55 = vpop.permute.xlu1 %1266 }
 0x1fe   : > { %v1265_v10 = vpop.permute.xlu0 %1264  ;;  %v1918_v23 = vsel %vm1854_vm8, %v1853_v58, %v1267_v55  ;;  %v6868_v58 = vld [vmem:[%s7306_s5] ss:$0 sm:$0xff] }
 0x1ff   : > { %v1916_v37 = vsel %vm1854_vm8, %v1851_v1, %v1265_v10 }
 0x201   : > { %v1397_v34 = vpop.permute.xlu1 %1396 }
 0x202   : > { %v1395_v2 = vpop.permute.xlu0 %1394  ;;  %v1983_v0 = vsel %vm1919_vm9, %v1918_v23, %v1397_v34 }
 0x203   : > { %v1981_v21 = vsel %vm1919_vm9, %v1916_v37, %v1395_v2 }
 0x205   : > { %v1593_v39 = vpop.permute.xlu1 %1592 }
 0x206   : > { %v1591_v9 = vpop.permute.xlu0 %1590  ;;  %v2048_v16 = vsel %vm1984_vm10, %v1983_v0, %v1593_v39 }
 0x207   : > { %v2046_v32 = vsel %vm1984_vm10, %v1981_v21, %v1591_v9 }
 0x208   : > { %v4805_v25 = vpop.f32.mrb[24].mxu0 }
 0x209   : > { %v2344_v41 = vadd.f32 %v4805_v25, %v6617_v15  ;;  %v2335_v61 = vpop.f32.mrb[25].mxu0  ;;  %v1723_v48 = vpop.permute.xlu1 %1722 }
 0x20a   : > { %v2336_v54 = vadd.f32 %v6617_v15, %v2335_v61  ;;  %v4806_v18 = vpop.f32.mrb[26].mxu0  ;;  %v1721_v12 = vpop.permute.xlu0 %1720  ;;  %v2113_v56 = vsel %vm2049_vm11, %v2048_v16, %v1723_v48 }
 0x20b   : > { %v2347_v19 = vadd.f32 %v4806_v18, %v6617_v15  ;;  %v2111_v53 = vsel %vm2049_vm11, %v2046_v32, %v1721_v12  ;;  %v2338_v49 = vpop.f32.mrb[27].mxu0  ;;  %v2520_v47 = vmax.f32 %v2344_v41, 0.0 }
 0x20c   : > { %v2339_v11 = vadd.f32 %v6617_v15, %v2338_v49  ;;  %4839 = vmatprep.mubr.msk.bf16.mxu0 %vm2136_vm12, %v2111_v53  ;;  %v2518_v7 = vmax.f32 %v2336_v54, 0.0 }
 0x20d   : > { %v2521_v33 = vmax.f32 %v2347_v19, 0.0  ;;  %4840 = vmatmul.mubr.msk.bf16.gmra.mrb[60].mxu0 %vm2136_vm12, %v2113_v56 }
 0x20e   : > { %v2519_v63 = vmax.f32 %v2339_v11, 0.0 }
 0x20f   : > { %v2571_v17 = vpack.c.bf16 %v2521_v33, %v2520_v47 }
 0x210   : > { %v2570_v26 = vpack.c.bf16 %v2519_v63, %v2518_v7 }
 0x212   : > { %4871 = vmatprep.mubr.msk.bf16.mxu1 %vm2611_vm13, %v2570_v26 }
 0x213   : > { %4872 = vmatmul.mubr.msk.bf16.gmra.mrb[24].mxu1 %vm2611_vm13, %v2571_v17 }
 0x220   : > { %v4809_v59 = vpop.f32.mrb[28].mxu0 }
 0x221   : > { %v2360_v35 = vadd.f32 %v4809_v59, %v6617_v15  ;;  %v2351_v60 = vpop.f32.mrb[29].mxu0 }
 0x222   : > { %v2352_v6 = vadd.f32 %v6617_v15, %v2351_v60  ;;  %v4810_v24 = vpop.f32.mrb[30].mxu0 }
 0x223   : > { %v2363_v42 = vadd.f32 %v4810_v24, %v6617_v15  ;;  %v2354_v28 = vpop.f32.mrb[31].mxu0  ;;  %v2524_v29 = vmax.f32 %v2360_v35, 0.0 }
 0x224   : > { %v2355_v14 = vadd.f32 %v6617_v15, %v2354_v28  ;;  %v2522_v45 = vmax.f32 %v2352_v6, 0.0 }
 0x225   : > { %v2525_v27 = vmax.f32 %v2363_v42, 0.0 }
 0x226   : > { %v2523_v8 = vmax.f32 %v2355_v14, 0.0 }
 0x227   : > { %v2573_v52 = vpack.c.bf16 %v2525_v27, %v2524_v29 }
 0x228   : > { %v2572_v40 = vpack.c.bf16 %v2523_v8, %v2522_v45 }
 0x22a   : > { %4875 = vmatprep.mubr.msk.bf16.mxu1 %vm2611_vm13, %v2572_v40 }
 0x22b   : > { %4876 = vmatmul.mubr.msk.bf16.gmra.mrb[28].mxu1 %vm2611_vm13, %v2573_v52 }
 0x238   : > { %v4813_v22 = vpop.f32.mrb[32].mxu0 }
 0x239   : > { %v2376_v31 = vadd.f32 %v4813_v22, %v6617_v15  ;;  %v2367_v51 = vpop.f32.mrb[33].mxu0 }
 0x23a   : > { %v2368_v46 = vadd.f32 %v6617_v15, %v2367_v51  ;;  %v4814_v57 = vpop.f32.mrb[34].mxu0 }
 0x23b   : > { %v2379_v3 = vadd.f32 %v4814_v57, %v6617_v15  ;;  %v2370_v13 = vpop.f32.mrb[35].mxu0  ;;  %v2528_v4 = vmax.f32 %v2376_v31, 0.0 }
 0x23c   : > { %v2371_v20 = vadd.f32 %v6617_v15, %v2370_v13  ;;  %v2526_v38 = vmax.f32 %v2368_v46, 0.0 }
 0x23d   : > { %v2529_v30 = vmax.f32 %v2379_v3, 0.0 }
 0x23e   : > { %v2527_v62 = vmax.f32 %v2371_v20, 0.0 }
 0x23f   : > { %v2575_v44 = vpack.c.bf16 %v2529_v30, %v2528_v4 }
 0x240   : > { %v2574_v5 = vpack.c.bf16 %v2527_v62, %v2526_v38 }
 0x242   : > { %4879 = vmatprep.mubr.msk.bf16.mxu1 %vm2611_vm13, %v2574_v5 }
 0x243   : > { %4880 = vmatmul.mubr.msk.bf16.gmra.mrb[32].mxu1 %vm2611_vm13, %v2575_v44 }
 0x250   : > { %v4817_v36 = vpop.f32.mrb[36].mxu0 }
 0x251   : > { %v2392_v55 = vadd.f32 %v4817_v36, %v6617_v15  ;;  %v2383_v10 = vpop.f32.mrb[37].mxu0 }
 0x252   : > { %v2384_v34 = vadd.f32 %v6617_v15, %v2383_v10  ;;  %v4818_v2 = vpop.f32.mrb[38].mxu0 }
 0x253   : > { %v2395_v50 = vadd.f32 %v4818_v2, %v6617_v15  ;;  %v2386_v39 = vpop.f32.mrb[39].mxu0  ;;  %v2532_v9 = vmax.f32 %v2392_v55, 0.0 }
 0x254   : > { %v2387_v43 = vadd.f32 %v6617_v15, %v2386_v39  ;;  %v2530_v23 = vmax.f32 %v2384_v34, 0.0 }
 0x255   : > { %v2533_v1 = vmax.f32 %v2395_v50, 0.0 }
 0x256   : > { %v2531_v37 = vmax.f32 %v2387_v43, 0.0  ;;  %v4849_v0 = vpop.f32.mrb[0].mxu1 }
 0x257   : > { %v2577_v25 = vpack.c.bf16 %v2533_v1, %v2532_v9  ;;  %v2751_v21 = vadd.f32 %v4849_v0, %v6868_v58  ;;  %v2742_v16 = vpop.f32.mrb[1].mxu1 }
 0x258   : > { %v2576_v41 = vpack.c.bf16 %v2531_v37, %v2530_v23  ;;  %v2743_v61 = vadd.f32 %v6868_v58, %v2742_v16  ;;  %v4850_v48 = vpop.f32.mrb[2].mxu1 }
 0x259   : > { %v2754_v32 = vadd.f32 %v4850_v48, %v6868_v58  ;;  %v2745_v54 = vpop.f32.mrb[3].mxu1  ;;  %v2999_v12 = vmax.f32 %v2751_v21, 0.0 }
 0x25a   : > { %v2746_v18 = vadd.f32 %v6868_v58, %v2745_v54  ;;  %4883 = vmatprep.mubr.msk.bf16.mxu1 %vm2611_vm13, %v2576_v41  ;;  %v2997_v19 = vmax.f32 %v2743_v61, 0.0 }
 0x25b   : > { %v3000_v56 = vmax.f32 %v2754_v32, 0.0  ;;  %4884 = vmatmul.mubr.msk.bf16.gmra.mrb[36].mxu1 %vm2611_vm13, %v2577_v25 }
 0x25c   : > { %v2998_v53 = vmax.f32 %v2746_v18, 0.0 }
 0x25d   : > { %v3062_v49 = vpack.c.bf16 %v3000_v56, %v2999_v12 }
 0x25e   : > { %v3061_v11 = vpack.c.bf16 %v2998_v53, %v2997_v19 }
 0x260   : > { %4915 = vmatprep.mubr.msk.bf16.mxu0 %vm2611_vm13, %v3061_v11 }
 0x261   : > { %4916 = vmatmul.mubr.msk.bf16.vlgmr.msra.gmra.mrb[64].mxu0 %vm2611_vm13, %v3062_v49 }
 0x268   : > { %v4821_v47 = vpop.f32.mrb[40].mxu0 }
 0x269   : > { %v2408_v33 = vadd.f32 %v4821_v47, %v6617_v15  ;;  %v2399_v7 = vpop.f32.mrb[41].mxu0 }
 0x26a   : > { %v2400_v63 = vadd.f32 %v6617_v15, %v2399_v7  ;;  %v4822_v17 = vpop.f32.mrb[42].mxu0 }
 0x26b   : > { %v2411_v26 = vadd.f32 %v4822_v17, %v6617_v15  ;;  %v2402_v59 = vpop.f32.mrb[43].mxu0  ;;  %v2536_v60 = vmax.f32 %v2408_v33, 0.0 }
 0x26c   : > { %v2403_v35 = vadd.f32 %v6617_v15, %v2402_v59  ;;  %v2534_v24 = vmax.f32 %v2400_v63, 0.0 }
 0x26d   : > { %v2537_v6 = vmax.f32 %v2411_v26, 0.0 }
 0x26e   : > { %v2535_v42 = vmax.f32 %v2403_v35, 0.0  ;;  %v4853_v28 = vpop.f32.mrb[4].mxu1 }
 0x26f   : > { %v2579_v14 = vpack.c.bf16 %v2537_v6, %v2536_v60  ;;  %v2767_v29 = vadd.f32 %v4853_v28, %v6868_v58  ;;  %v2758_v27 = vpop.f32.mrb[5].mxu1 }
 0x270   : > { %v2578_v45 = vpack.c.bf16 %v2535_v42, %v2534_v24  ;;  %v2759_v8 = vadd.f32 %v6868_v58, %v2758_v27  ;;  %v4854_v52 = vpop.f32.mrb[6].mxu1 }
 0x271   : > { %v2770_v40 = vadd.f32 %v4854_v52, %v6868_v58  ;;  %v2761_v22 = vpop.f32.mrb[7].mxu1  ;;  %v3003_v51 = vmax.f32 %v2767_v29, 0.0 }
 0x272   : > { %v2762_v31 = vadd.f32 %v6868_v58, %v2761_v22  ;;  %4887 = vmatprep.mubr.msk.bf16.mxu1 %vm2611_vm13, %v2578_v45  ;;  %v3001_v57 = vmax.f32 %v2759_v8, 0.0 }
 0x273   : > { %v3004_v46 = vmax.f32 %v2770_v40, 0.0  ;;  %4888 = vmatmul.mubr.msk.bf16.gmra.mrb[40].mxu1 %vm2611_vm13, %v2579_v14 }
 0x274   : > { %v3002_v3 = vmax.f32 %v2762_v31, 0.0 }
 0x275   : > { %v3064_v13 = vpack.c.bf16 %v3004_v46, %v3003_v51 }
 0x276   : > { %v3063_v20 = vpack.c.bf16 %v3002_v3, %v3001_v57  ;;  %v6918_v3 = vld [vmem:[%s7304_s3] ss:$0 sm:$0xff] }
 0x278   : > { %4919 = vmatprep.mubr.msk.bf16.mxu0 %vm2611_vm13, %v3063_v20 }
 0x279   : > { %4920 = vmatmul.mubr.msk.bf16.gmra.mrb[68].mxu0 %vm2611_vm13, %v3064_v13 }
 0x280   : > { %v4825_v4 = vpop.f32.mrb[44].mxu0 }
 0x281   : > { %v2424_v30 = vadd.f32 %v4825_v4, %v6617_v15  ;;  %v2415_v38 = vpop.f32.mrb[45].mxu0 }
 0x282   : > { %v2416_v62 = vadd.f32 %v6617_v15, %v2415_v38  ;;  %v4826_v44 = vpop.f32.mrb[46].mxu0 }
 0x283   : > { %v2427_v5 = vadd.f32 %v4826_v44, %v6617_v15  ;;  %v2418_v36 = vpop.f32.mrb[47].mxu0  ;;  %v2540_v10 = vmax.f32 %v2424_v30, 0.0 }
 0x284   : > { %v2419_v55 = vadd.f32 %v6617_v15, %v2418_v36  ;;  %v2538_v2 = vmax.f32 %v2416_v62, 0.0 }
 0x285   : > { %v2541_v34 = vmax.f32 %v2427_v5, 0.0 }
 0x286   : > { %v2539_v50 = vmax.f32 %v2419_v55, 0.0  ;;  %v4857_v39 = vpop.f32.mrb[8].mxu1 }
 0x287   : > { %v2581_v43 = vpack.c.bf16 %v2541_v34, %v2540_v10  ;;  %v2783_v9 = vadd.f32 %v4857_v39, %v6868_v58  ;;  %v2774_v1 = vpop.f32.mrb[9].mxu1 }
 0x288   : > { %v2580_v23 = vpack.c.bf16 %v2539_v50, %v2538_v2  ;;  %v2775_v37 = vadd.f32 %v6868_v58, %v2774_v1  ;;  %v4858_v0 = vpop.f32.mrb[10].mxu1 }
 0x289   : > { %v2786_v25 = vadd.f32 %v4858_v0, %v6868_v58  ;;  %v2777_v21 = vpop.f32.mrb[11].mxu1  ;;  %v3007_v41 = vmax.f32 %v2783_v9, 0.0 }
 0x28a   : > { %v2778_v16 = vadd.f32 %v6868_v58, %v2777_v21  ;;  %4891 = vmatprep.mubr.msk.bf16.mxu1 %vm2611_vm13, %v2580_v23  ;;  %v3005_v48 = vmax.f32 %v2775_v37, 0.0  ;;  %v5152_v23 = vld [vmem:[%s7305_s4 + $0x28] sm:$0xff]  }
 0x28b   : > { %v3008_v61 = vmax.f32 %v2786_v25, 0.0  ;;  %4892 = vmatmul.mubr.msk.bf16.gmra.mrb[44].mxu1 %vm2611_vm13, %v2581_v43 }
 0x28c   : > { %v3006_v32 = vmax.f32 %v2778_v16, 0.0 }
 0x28d   : > { %v3066_v54 = vpack.c.bf16 %v3008_v61, %v3007_v41 }
 0x28e   : > { %v3065_v18 = vpack.c.bf16 %v3006_v32, %v3005_v48 }
 0x290   : > { %4923 = vmatprep.mubr.msk.bf16.mxu0 %vm2611_vm13, %v3065_v18 }
 0x291   : > { %4924 = vmatmul.mubr.msk.bf16.gmra.mrb[72].mxu0 %vm2611_vm13, %v3066_v54 }
 0x298   : > { %v4829_v12 = vpop.f32.mrb[48].mxu0 }
 0x299   : > { %v2440_v56 = vadd.f32 %v4829_v12, %v6617_v15  ;;  %v2431_v19 = vpop.f32.mrb[49].mxu0 }
 0x29a   : > { %v2432_v53 = vadd.f32 %v6617_v15, %v2431_v19  ;;  %v4830_v49 = vpop.f32.mrb[50].mxu0 }
 0x29b   : > { %v2443_v11 = vadd.f32 %v4830_v49, %v6617_v15  ;;  %v2434_v47 = vpop.f32.mrb[51].mxu0  ;;  %v2544_v7 = vmax.f32 %v2440_v56, 0.0 }
 0x29c   : > { %v2435_v33 = vadd.f32 %v6617_v15, %v2434_v47  ;;  %v2542_v17 = vmax.f32 %v2432_v53, 0.0 }
 0x29d   : > { %v2545_v63 = vmax.f32 %v2443_v11, 0.0 }
 0x29e   : > { %v2543_v26 = vmax.f32 %v2435_v33, 0.0  ;;  %v4861_v59 = vpop.f32.mrb[12].mxu1 }
 0x29f   : > { %v2583_v35 = vpack.c.bf16 %v2545_v63, %v2544_v7  ;;  %v2799_v60 = vadd.f32 %v4861_v59, %v6868_v58  ;;  %v2790_v6 = vpop.f32.mrb[13].mxu1 }
 0x2a0   : > { %v2582_v24 = vpack.c.bf16 %v2543_v26, %v2542_v17  ;;  %v2791_v42 = vadd.f32 %v6868_v58, %v2790_v6  ;;  %v4862_v28 = vpop.f32.mrb[14].mxu1 }
 0x2a1   : > { %v2802_v14 = vadd.f32 %v4862_v28, %v6868_v58  ;;  %v2793_v29 = vpop.f32.mrb[15].mxu1  ;;  %v3011_v45 = vmax.f32 %v2799_v60, 0.0 }
 0x2a2   : > { %v2794_v27 = vadd.f32 %v6868_v58, %v2793_v29  ;;  %4895 = vmatprep.mubr.msk.bf16.mxu1 %vm2611_vm13, %v2582_v24  ;;  %v3009_v52 = vmax.f32 %v2791_v42, 0.0 }
 0x2a3   : > { %v3012_v8 = vmax.f32 %v2802_v14, 0.0  ;;  %4896 = vmatmul.mubr.msk.bf16.gmra.mrb[48].mxu1 %vm2611_vm13, %v2583_v35 }
 0x2a4   : > { %v3010_v40 = vmax.f32 %v2794_v27, 0.0 }
 0x2a5   : > { %v3068_v22 = vpack.c.bf16 %v3012_v8, %v3011_v45 }
 0x2a6   : > { %v3067_v31 = vpack.c.bf16 %v3010_v40, %v3009_v52 }
 0x2a8   : > { %4927 = vmatprep.mubr.msk.bf16.mxu0 %vm2611_vm13, %v3067_v31 }
 0x2a9   : > { %4928 = vmatmul.mubr.msk.bf16.gmra.mrb[76].mxu0 %vm2611_vm13, %v3068_v22 }
 0x2b0   : > { %v4833_v51 = vpop.f32.mrb[52].mxu0 }
 0x2b1   : > { %v2456_v46 = vadd.f32 %v4833_v51, %v6617_v15  ;;  %v2447_v57 = vpop.f32.mrb[53].mxu0  ;;  %v5151_v15 = vld [vmem:[%s7305_s4 + $0x20] sm:$0xff]  }
 0x2b2   : > { %v2448_v13 = vadd.f32 %v6918_v3, %v2447_v57  ;;  %v4834_v20 = vpop.f32.mrb[54].mxu0  ;;  %4979 = vmatprep.subr.bf16.mxu1 %v5151_v15 }
 0x2b3   : > { %v2459_v4 = vadd.f32 %v6918_v3, %v4834_v20  ;;  %v2450_v30 = vpop.f32.mrb[55].mxu0  ;;  %v2548_v62 = vmax.f32 %v2456_v46, 0.0  ;;  %4980 = vmatpush3.bf16.msra.mxu1 %v5151_v15 }
 0x2b4   : > { %v2451_v38 = vadd.f32 %v6918_v3, %v2450_v30  ;;  %v2546_v5 = vmax.f32 %v2448_v13, 0.0  ;;  %4981 = vmatprep.subr.bf16.mxu1 %v5152_v23 }
 0x2b5   : > { %v2549_v44 = vmax.f32 %v2459_v4, 0.0 }
 0x2b6   : > { %v2547_v36 = vmax.f32 %v2451_v38, 0.0  ;;  %v4865_v55 = vpop.f32.mrb[16].mxu1 }
 0x2b7   : > { %v2585_v10 = vpack.c.bf16 %v2549_v44, %v2548_v62  ;;  %v2815_v34 = vadd.f32 %v4865_v55, %v6868_v58  ;;  %v2806_v2 = vpop.f32.mrb[17].mxu1  ;;  %4982 = vmatpush3.bf16.msra.mxu1 %v5152_v23 }
 0x2b8   : > { %v2584_v50 = vpack.c.bf16 %v2547_v36, %v2546_v5  ;;  %v2807_v39 = vadd.f32 %v6868_v58, %v2806_v2  ;;  %v4866_v43 = vpop.f32.mrb[18].mxu1 }
 0x2b9   : > { %v2818_v9 = vadd.f32 %v4866_v43, %v6868_v58  ;;  %v2809_v1 = vpop.f32.mrb[19].mxu1  ;;  %v3015_v0 = vmax.f32 %v2815_v34, 0.0 }
 0x2ba   : > { %v2810_v37 = vadd.f32 %v6868_v58, %v2809_v1  ;;  %4899 = vmatprep.mubr.msk.bf16.mxu1 %vm2611_vm13, %v2584_v50  ;;  %v3013_v21 = vmax.f32 %v2807_v39, 0.0 }
 0x2bb   : > { %v3016_v25 = vmax.f32 %v2818_v9, 0.0  ;;  %4900 = vmatmul.mubr.msk.bf16.gmra.mrb[52].mxu1 %vm2611_vm13, %v2585_v10 }
 0x2bc   : > { %v3014_v16 = vmax.f32 %v2810_v37, 0.0 }
 0x2bd   : > { %v3070_v41 = vpack.c.bf16 %v3016_v25, %v3015_v0 }
 0x2be   : > { %v3069_v61 = vpack.c.bf16 %v3014_v16, %v3013_v21 }
 0x2c0   : > { %4931 = vmatprep.mubr.msk.bf16.mxu0 %vm2611_vm13, %v3069_v61 }
 0x2c1   : > { %4932 = vmatmul.mubr.msk.bf16.gmra.mrb[80].mxu0 %vm2611_vm13, %v3070_v41 }
 0x2c8   : > { %v4837_v48 = vpop.f32.mrb[56].mxu0 }
 0x2c9   : > { %v2472_v32 = vadd.f32 %v6918_v3, %v4837_v48  ;;  %v2463_v54 = vpop.f32.mrb[57].mxu0 }
 0x2ca   : > { %v2464_v18 = vadd.f32 %v6918_v3, %v2463_v54  ;;  %v4838_v12 = vpop.f32.mrb[58].mxu0 }
 0x2cb   : > { %v2475_v56 = vadd.f32 %v6918_v3, %v4838_v12  ;;  %v2466_v19 = vpop.f32.mrb[59].mxu0  ;;  %v2552_v49 = vmax.f32 %v2472_v32, 0.0 }
 0x2cc   : > { %v2467_v53 = vadd.f32 %v6918_v3, %v2466_v19  ;;  %v2550_v47 = vmax.f32 %v2464_v18, 0.0 }
 0x2cd   : > { %v2553_v11 = vmax.f32 %v2475_v56, 0.0 }
 0x2ce   : > { %v2551_v33 = vmax.f32 %v2467_v53, 0.0  ;;  %v4869_v7 = vpop.f32.mrb[20].mxu1 }
 0x2cf   : > { %v2587_v63 = vpack.c.bf16 %v2553_v11, %v2552_v49  ;;  %v2831_v17 = vadd.f32 %v4869_v7, %v6868_v58  ;;  %v2822_v26 = vpop.f32.mrb[21].mxu1 }
 0x2d0   : > { %v2586_v59 = vpack.c.bf16 %v2551_v33, %v2550_v47  ;;  %v2823_v35 = vadd.f32 %v6868_v58, %v2822_v26  ;;  %v4870_v60 = vpop.f32.mrb[22].mxu1 }
 0x2d1   : > { %v2834_v6 = vadd.f32 %v4870_v60, %v6868_v58  ;;  %v2825_v24 = vpop.f32.mrb[23].mxu1  ;;  %v3019_v28 = vmax.f32 %v2831_v17, 0.0 }
 0x2d2   : > { %v2826_v42 = vadd.f32 %v6868_v58, %v2825_v24  ;;  %4903 = vmatprep.mubr.msk.bf16.mxu1 %vm2611_vm13, %v2586_v59  ;;  %v3017_v29 = vmax.f32 %v2823_v35, 0.0 }
 0x2d3   : > { %v3020_v14 = vmax.f32 %v2834_v6, 0.0  ;;  %4904 = vmatmul.mubr.msk.bf16.gmra.mrb[56].mxu1 %vm2611_vm13, %v2587_v63 }
 0x2d4   : > { %v3018_v27 = vmax.f32 %v2826_v42, 0.0 }
 0x2d5   : > { %v3072_v45 = vpack.c.bf16 %v3020_v14, %v3019_v28 }
 0x2d6   : > { %v3071_v8 = vpack.c.bf16 %v3018_v27, %v3017_v29 }
 0x2d8   : > { %4935 = vmatprep.mubr.msk.bf16.mxu0 %vm2611_vm13, %v3071_v8 }
 0x2d9   : > { %4936 = vmatmul.mubr.msk.bf16.gmra.mrb[84].mxu0 %vm2611_vm13, %v3072_v45 }
 0x2e0   : > { %v4841_v52 = vpop.f32.mrb[60].mxu0 }
 0x2e1   : > { %v2488_v40 = vadd.f32 %v6918_v3, %v4841_v52  ;;  %v2479_v22 = vpop.f32.mrb[61].mxu0 }
 0x2e2   : > { %v2480_v31 = vadd.f32 %v6918_v3, %v2479_v22  ;;  %v4842_v51 = vpop.f32.mrb[62].mxu0 }
 0x2e3   : > { %v2491_v46 = vadd.f32 %v6918_v3, %v4842_v51  ;;  %v2482_v57 = vpop.f32.mrb[63].mxu0  ;;  %v2556_v20 = vmax.f32 %v2488_v40, 0.0  ;;  %v6980_v40 = vld [vmem:[%s7306_s5 + $0x1] ss:$0 sm:$0xff] }
 0x2e4   : > { %v2483_v13 = vadd.f32 %v6918_v3, %v2482_v57  ;;  %v2554_v30 = vmax.f32 %v2480_v31, 0.0 }
 0x2e5   : > { %v2557_v4 = vmax.f32 %v2491_v46, 0.0 }
 0x2e6   : > { %v2555_v38 = vmax.f32 %v2483_v13, 0.0  ;;  %v4873_v62 = vpop.f32.mrb[24].mxu1 }
 0x2e7   : > { %v2589_v44 = vpack.c.bf16 %v2557_v4, %v2556_v20  ;;  %v2847_v15 = vadd.f32 %v4873_v62, %v6868_v58  ;;  %v2838_v5 = vpop.f32.mrb[25].mxu1 }
 0x2e8   : > { %v2588_v36 = vpack.c.bf16 %v2555_v38, %v2554_v30  ;;  %v2839_v55 = vadd.f32 %v6868_v58, %v2838_v5  ;;  %v4874_v10 = vpop.f32.mrb[26].mxu1 }
 0x2e9   : > { %v2850_v34 = vadd.f32 %v4874_v10, %v6868_v58  ;;  %v2841_v2 = vpop.f32.mrb[27].mxu1  ;;  %v3023_v3 = vmax.f32 %v2847_v15, 0.0 }
 0x2ea   : > { %v2842_v50 = vadd.f32 %v6868_v58, %v2841_v2  ;;  %4907 = vmatprep.mubr.msk.bf16.mxu1 %vm2611_vm13, %v2588_v36  ;;  %v3021_v43 = vmax.f32 %v2839_v55, 0.0 }
 0x2eb   : > { %v3024_v39 = vmax.f32 %v2850_v34, 0.0  ;;  %4908 = vmatmul.mubr.msk.bf16.gmra.mrb[60].mxu1 %vm2611_vm13, %v2589_v44 }
 0x2ec   : > { %v3022_v9 = vmax.f32 %v2842_v50, 0.0 }
 0x2ed   : > { %v3074_v1 = vpack.c.bf16 %v3024_v39, %v3023_v3 }
 0x2ee   : > { %v3073_v23 = vpack.c.bf16 %v3022_v9, %v3021_v43 }
 0x2f0   : > { %4939 = vmatprep.mubr.msk.bf16.mxu0 %vm2611_vm13, %v3073_v23 }
 0x2f1   : > { %4940 = vmatmul.mubr.msk.bf16.gmra.mrb[88].mxu0 %vm2611_vm13, %v3074_v1 }
 0x2fe   : > { %v4877_v37 = vpop.f32.mrb[28].mxu1 }
 0x2ff   : > { %v2863_v0 = vadd.f32 %v4877_v37, %v6868_v58  ;;  %v2854_v25 = vpop.f32.mrb[29].mxu1 }
 0x300   : > { %v2855_v21 = vadd.f32 %v6868_v58, %v2854_v25  ;;  %v4878_v16 = vpop.f32.mrb[30].mxu1 }
 0x301   : > { %v2866_v41 = vadd.f32 %v4878_v16, %v6868_v58  ;;  %v2857_v61 = vpop.f32.mrb[31].mxu1  ;;  %v3027_v32 = vmax.f32 %v2863_v0, 0.0 }
 0x302   : > { %v2858_v48 = vadd.f32 %v6868_v58, %v2857_v61  ;;  %v3025_v18 = vmax.f32 %v2855_v21, 0.0 }
 0x303   : > { %v3028_v54 = vmax.f32 %v2866_v41, 0.0 }
 0x304   : > { %v3026_v12 = vmax.f32 %v2858_v48, 0.0 }
 0x305   : > { %v3076_v56 = vpack.c.bf16 %v3028_v54, %v3027_v32 }
 0x306   : > { %v3075_v19 = vpack.c.bf16 %v3026_v12, %v3025_v18 }
 0x308   : > { %4943 = vmatprep.mubr.msk.bf16.mxu0 %vm2611_vm13, %v3075_v19 }
 0x309   : > { %4944 = vmatmul.mubr.msk.bf16.gmra.mrb[92].mxu0 %vm2611_vm13, %v3076_v56 }
 0x316   : > { %v4881_v53 = vpop.f32.mrb[32].mxu1 }
 0x317   : > { %v2879_v49 = vadd.f32 %v4881_v53, %v6868_v58  ;;  %v2870_v11 = vpop.f32.mrb[33].mxu1 }
 0x318   : > { %v2871_v47 = vadd.f32 %v6868_v58, %v2870_v11  ;;  %v4882_v33 = vpop.f32.mrb[34].mxu1 }
 0x319   : > { %v2882_v7 = vadd.f32 %v4882_v33, %v6868_v58  ;;  %v2873_v63 = vpop.f32.mrb[35].mxu1  ;;  %v3031_v26 = vmax.f32 %v2879_v49, 0.0 }
 0x31a   : > { %v2874_v17 = vadd.f32 %v6868_v58, %v2873_v63  ;;  %v3029_v35 = vmax.f32 %v2871_v47, 0.0 }
 0x31b   : > { %v3032_v59 = vmax.f32 %v2882_v7, 0.0 }
 0x31c   : > { %v3030_v60 = vmax.f32 %v2874_v17, 0.0 }
 0x31d   : > { %v3078_v6 = vpack.c.bf16 %v3032_v59, %v3031_v26 }
 0x31e   : > { %v3077_v24 = vpack.c.bf16 %v3030_v60, %v3029_v35 }
 0x320   : > { %4947 = vmatprep.mubr.msk.bf16.mxu0 %vm2611_vm13, %v3077_v24 }
 0x321   : > { %4948 = vmatmul.mubr.msk.bf16.gmra.mrb[96].mxu0 %vm2611_vm13, %v3078_v6 }
 0x32e   : > { %v4885_v42 = vpop.f32.mrb[36].mxu1 }
 0x32f   : > { %v2895_v28 = vadd.f32 %v4885_v42, %v6868_v58  ;;  %v2886_v14 = vpop.f32.mrb[37].mxu1 }
 0x330   : > { %v2887_v29 = vadd.f32 %v6868_v58, %v2886_v14  ;;  %v4886_v27 = vpop.f32.mrb[38].mxu1 }
 0x331   : > { %v2898_v45 = vadd.f32 %v4886_v27, %v6868_v58  ;;  %v2889_v8 = vpop.f32.mrb[39].mxu1  ;;  %v3035_v22 = vmax.f32 %v2895_v28, 0.0 }
 0x332   : > { %v2890_v52 = vadd.f32 %v6868_v58, %v2889_v8  ;;  %v3033_v51 = vmax.f32 %v2887_v29, 0.0 }
 0x333   : > { %v3036_v31 = vmax.f32 %v2898_v45, 0.0 }
 0x334   : > { %v3034_v46 = vmax.f32 %v2890_v52, 0.0  ;;  %v4917_v57 = vpop.f32.mrb[64].mxu0 }
 0x335   : > { %v3080_v13 = vpack.c.bf16 %v3036_v31, %v3035_v22  ;;  %v3254_v20 = vadd.f32 %v4917_v57, %v6980_v40  ;;  %v3245_v4 = vpop.f32.mrb[65].mxu0 }
 0x336   : > { %v3079_v30 = vpack.c.bf16 %v3034_v46, %v3033_v51  ;;  %v3246_v38 = vadd.f32 %v6980_v40, %v3245_v4  ;;  %v4918_v62 = vpop.f32.mrb[66].mxu0 }
 0x337   : > { %v3257_v44 = vadd.f32 %v4918_v62, %v6980_v40  ;;  %v3248_v15 = vpop.f32.mrb[67].mxu0  ;;  %v3502_v36 = vmax.f32 %v3254_v20, 0.0 }
 0x338   : > { %v3249_v5 = vadd.f32 %v6980_v40, %v3248_v15  ;;  %4951 = vmatprep.mubr.msk.bf16.mxu0 %vm2611_vm13, %v3079_v30  ;;  %v3500_v10 = vmax.f32 %v3246_v38, 0.0 }
 0x339   : > { %v3503_v55 = vmax.f32 %v3257_v44, 0.0  ;;  %4952 = vmatmul.mubr.msk.bf16.gmra.mrb[100].mxu0 %vm2611_vm13, %v3080_v13 }
 0x33a   : > { %v3501_v34 = vmax.f32 %v3249_v5, 0.0 }
 0x33b   : > { %v3565_v2 = vpack.c.bf16 %v3503_v55, %v3502_v36 }
 0x33c   : > { %v3564_v50 = vpack.c.bf16 %v3501_v34, %v3500_v10 }
 0x33e   : > { %4983 = vmatprep.mubr.msk.bf16.mxu1 %vm2611_vm13, %v3564_v50 }
 0x33f   : > { %4984 = vmatmul.mubr.msk.bf16.vlgmr.msra.gmra.mrb[64].mxu1 %vm2611_vm13, %v3565_v2 }
 0x346   : > { %v4889_v3 = vpop.f32.mrb[40].mxu1 }
 0x347   : > { %v2911_v39 = vadd.f32 %v4889_v3, %v6868_v58  ;;  %v2902_v43 = vpop.f32.mrb[41].mxu1 }
 0x348   : > { %v2903_v9 = vadd.f32 %v6868_v58, %v2902_v43  ;;  %v4890_v1 = vpop.f32.mrb[42].mxu1 }
 0x349   : > { %v2914_v23 = vadd.f32 %v4890_v1, %v6868_v58  ;;  %v2905_v37 = vpop.f32.mrb[43].mxu1  ;;  %v3039_v25 = vmax.f32 %v2911_v39, 0.0 }
 0x34a   : > { %v2906_v0 = vadd.f32 %v6868_v58, %v2905_v37  ;;  %v3037_v16 = vmax.f32 %v2903_v9, 0.0 }
 0x34b   : > { %v3040_v21 = vmax.f32 %v2914_v23, 0.0 }
 0x34c   : > { %v3038_v41 = vmax.f32 %v2906_v0, 0.0  ;;  %v4921_v61 = vpop.f32.mrb[68].mxu0 }
 0x34d   : > { %v3082_v48 = vpack.c.bf16 %v3040_v21, %v3039_v25  ;;  %v3270_v32 = vadd.f32 %v4921_v61, %v6980_v40  ;;  %v3261_v54 = vpop.f32.mrb[69].mxu0 }
 0x34e   : > { %v3081_v18 = vpack.c.bf16 %v3038_v41, %v3037_v16  ;;  %v3262_v12 = vadd.f32 %v6980_v40, %v3261_v54  ;;  %v4922_v56 = vpop.f32.mrb[70].mxu0 }
 0x34f   : > { %v3273_v19 = vadd.f32 %v4922_v56, %v6980_v40  ;;  %v3264_v53 = vpop.f32.mrb[71].mxu0  ;;  %v3506_v11 = vmax.f32 %v3270_v32, 0.0 }
 0x350   : > { %v3265_v49 = vadd.f32 %v6980_v40, %v3264_v53  ;;  %4955 = vmatprep.mubr.msk.bf16.mxu0 %vm2611_vm13, %v3081_v18  ;;  %v3504_v33 = vmax.f32 %v3262_v12, 0.0 }
 0x351   : > { %v3507_v47 = vmax.f32 %v3273_v19, 0.0  ;;  %4956 = vmatmul.mubr.msk.bf16.gmra.mrb[104].mxu0 %vm2611_vm13, %v3082_v48 }
 0x352   : > { %v3505_v7 = vmax.f32 %v3265_v49, 0.0 }
 0x353   : > { %v3567_v63 = vpack.c.bf16 %v3507_v47, %v3506_v11 }
 0x354   : > { %v3566_v17 = vpack.c.bf16 %v3505_v7, %v3504_v33 }
 0x356   : > { %4987 = vmatprep.mubr.msk.bf16.mxu1 %vm2611_vm13, %v3566_v17 }
 0x357   : > { %4988 = vmatmul.mubr.msk.bf16.gmra.mrb[68].mxu1 %vm2611_vm13, %v3567_v63 }
 0x35e   : > { %v4893_v26 = vpop.f32.mrb[44].mxu1 }
 0x35f   : > { %v2927_v59 = vadd.f32 %v4893_v26, %v6868_v58  ;;  %v2918_v35 = vpop.f32.mrb[45].mxu1 }
 0x360   : > { %v2919_v60 = vadd.f32 %v6868_v58, %v2918_v35  ;;  %v4894_v6 = vpop.f32.mrb[46].mxu1 }
 0x361   : > { %v2930_v24 = vadd.f32 %v4894_v6, %v6868_v58  ;;  %v2921_v42 = vpop.f32.mrb[47].mxu1  ;;  %v3043_v14 = vmax.f32 %v2927_v59, 0.0 }
 0x362   : > { %v2922_v28 = vadd.f32 %v6868_v58, %v2921_v42  ;;  %v3041_v27 = vmax.f32 %v2919_v60, 0.0 }
 0x363   : > { %v3044_v29 = vmax.f32 %v2930_v24, 0.0 }
 0x364   : > { %v3042_v45 = vmax.f32 %v2922_v28, 0.0  ;;  %v4925_v8 = vpop.f32.mrb[72].mxu0 }
 0x365   : > { %v3084_v52 = vpack.c.bf16 %v3044_v29, %v3043_v14  ;;  %v3286_v22 = vadd.f32 %v4925_v8, %v6980_v40  ;;  %v3277_v31 = vpop.f32.mrb[73].mxu0 }
 0x366   : > { %v3083_v51 = vpack.c.bf16 %v3042_v45, %v3041_v27  ;;  %v3278_v46 = vadd.f32 %v6980_v40, %v3277_v31  ;;  %v4926_v57 = vpop.f32.mrb[74].mxu0 }
 0x367   : > { %v3289_v13 = vadd.f32 %v4926_v57, %v6980_v40  ;;  %v3280_v20 = vpop.f32.mrb[75].mxu0  ;;  %v3510_v30 = vmax.f32 %v3286_v22, 0.0 }
 0x368   : > { %v3281_v4 = vadd.f32 %v6980_v40, %v3280_v20  ;;  %4959 = vmatprep.mubr.msk.bf16.mxu0 %vm2611_vm13, %v3083_v51  ;;  %v3508_v62 = vmax.f32 %v3278_v46, 0.0 }
 0x369   : > { %v3511_v38 = vmax.f32 %v3289_v13, 0.0  ;;  %4960 = vmatmul.mubr.msk.bf16.gmra.mrb[108].mxu0 %vm2611_vm13, %v3084_v52 }
 0x36a   : > { %v3509_v44 = vmax.f32 %v3281_v4, 0.0 }
 0x36b   : > { %v3569_v15 = vpack.c.bf16 %v3511_v38, %v3510_v30 }
 0x36c   : > { %v3568_v5 = vpack.c.bf16 %v3509_v44, %v3508_v62 }
 0x36e   : > { %4991 = vmatprep.mubr.msk.bf16.mxu1 %vm2611_vm13, %v3568_v5 }
 0x36f   : > { %4992 = vmatmul.mubr.msk.bf16.gmra.mrb[72].mxu1 %vm2611_vm13, %v3569_v15 }
 0x376   : > { %v4897_v36 = vpop.f32.mrb[48].mxu1 }
 0x377   : > { %v2943_v55 = vadd.f32 %v4897_v36, %v6868_v58  ;;  %v2934_v10 = vpop.f32.mrb[49].mxu1 }
 0x378   : > { %v2935_v34 = vadd.f32 %v6868_v58, %v2934_v10  ;;  %v4898_v2 = vpop.f32.mrb[50].mxu1 }
 0x379   : > { %v2946_v50 = vadd.f32 %v4898_v2, %v6868_v58  ;;  %v2937_v3 = vpop.f32.mrb[51].mxu1  ;;  %v3047_v43 = vmax.f32 %v2943_v55, 0.0 }
 0x37a   : > { %v2938_v39 = vadd.f32 %v6868_v58, %v2937_v3  ;;  %v3045_v1 = vmax.f32 %v2935_v34, 0.0 }
 0x37b   : > { %v3048_v9 = vmax.f32 %v2946_v50, 0.0 }
 0x37c   : > { %v3046_v23 = vmax.f32 %v2938_v39, 0.0  ;;  %v4929_v37 = vpop.f32.mrb[76].mxu0 }
 0x37d   : > { %v3086_v0 = vpack.c.bf16 %v3048_v9, %v3047_v43  ;;  %v3302_v25 = vadd.f32 %v4929_v37, %v6980_v40  ;;  %v3293_v21 = vpop.f32.mrb[77].mxu0 }
 0x37e   : > { %v3085_v16 = vpack.c.bf16 %v3046_v23, %v3045_v1  ;;  %v3294_v41 = vadd.f32 %v6980_v40, %v3293_v21  ;;  %v4930_v61 = vpop.f32.mrb[78].mxu0 }
 0x37f   : > { %v3305_v48 = vadd.f32 %v4930_v61, %v6980_v40  ;;  %v3296_v32 = vpop.f32.mrb[79].mxu0  ;;  %v3514_v18 = vmax.f32 %v3302_v25, 0.0 }
 0x380   : > { %v3297_v54 = vadd.f32 %v6980_v40, %v3296_v32  ;;  %4963 = vmatprep.mubr.msk.bf16.mxu0 %vm2611_vm13, %v3085_v16  ;;  %v3512_v56 = vmax.f32 %v3294_v41, 0.0 }
 0x381   : > { %v3515_v12 = vmax.f32 %v3305_v48, 0.0  ;;  %4964 = vmatmul.mubr.msk.bf16.gmra.mrb[112].mxu0 %vm2611_vm13, %v3086_v0 }
 0x382   : > { %v3513_v19 = vmax.f32 %v3297_v54, 0.0 }
 0x383   : > { %v3571_v53 = vpack.c.bf16 %v3515_v12, %v3514_v18 }
 0x384   : > { %v3570_v49 = vpack.c.bf16 %v3513_v19, %v3512_v56 }
 0x386   : > { %4995 = vmatprep.mubr.msk.bf16.mxu1 %vm2611_vm13, %v3570_v49 }
 0x387   : > { %4996 = vmatmul.mubr.msk.bf16.gmra.mrb[76].mxu1 %vm2611_vm13, %v3571_v53 }
 0x38e   : > { %v4901_v11 = vpop.f32.mrb[52].mxu1 }
 0x38f   : > { %v2959_v47 = vadd.f32 %v4901_v11, %v6868_v58  ;;  %v2950_v33 = vpop.f32.mrb[53].mxu1 }
 0x390   : > { %v2951_v7 = vadd.f32 %v6868_v58, %v2950_v33  ;;  %v4902_v63 = vpop.f32.mrb[54].mxu1 }
 0x391   : > { %v2962_v17 = vadd.f32 %v4902_v63, %v6868_v58  ;;  %v2953_v26 = vpop.f32.mrb[55].mxu1  ;;  %v3051_v35 = vmax.f32 %v2959_v47, 0.0 }
 0x392   : > { %v2954_v59 = vadd.f32 %v6868_v58, %v2953_v26  ;;  %v3049_v6 = vmax.f32 %v2951_v7, 0.0 }
 0x393   : > { %v3052_v60 = vmax.f32 %v2962_v17, 0.0 }
 0x394   : > { %v3050_v24 = vmax.f32 %v2954_v59, 0.0  ;;  %v4933_v42 = vpop.f32.mrb[80].mxu0 }
 0x395   : > { %v3088_v28 = vpack.c.bf16 %v3052_v60, %v3051_v35  ;;  %v3318_v14 = vadd.f32 %v4933_v42, %v6980_v40  ;;  %v3309_v29 = vpop.f32.mrb[81].mxu0 }
 0x396   : > { %v3087_v27 = vpack.c.bf16 %v3050_v24, %v3049_v6  ;;  %v3310_v45 = vadd.f32 %v6980_v40, %v3309_v29  ;;  %v4934_v8 = vpop.f32.mrb[82].mxu0 }
 0x397   : > { %v3321_v52 = vadd.f32 %v4934_v8, %v6980_v40  ;;  %v3312_v22 = vpop.f32.mrb[83].mxu0  ;;  %v3518_v51 = vmax.f32 %v3318_v14, 0.0 }
 0x398   : > { %v3313_v31 = vadd.f32 %v6980_v40, %v3312_v22  ;;  %4967 = vmatprep.mubr.msk.bf16.mxu0 %vm2611_vm13, %v3087_v27  ;;  %v3516_v57 = vmax.f32 %v3310_v45, 0.0 }
 0x399   : > { %v3519_v46 = vmax.f32 %v3321_v52, 0.0  ;;  %4968 = vmatmul.mubr.msk.bf16.gmra.mrb[116].mxu0 %vm2611_vm13, %v3088_v28 }
 0x39a   : > { %v3517_v13 = vmax.f32 %v3313_v31, 0.0 }
 0x39b   : > { %v3573_v20 = vpack.c.bf16 %v3519_v46, %v3518_v51 }
 0x39c   : > { %v3572_v4 = vpack.c.bf16 %v3517_v13, %v3516_v57 }
 0x39e   : > { %4999 = vmatprep.mubr.msk.bf16.mxu1 %vm2611_vm13, %v3572_v4 }
 0x39f   : > { %5000 = vmatmul.mubr.msk.bf16.gmra.mrb[80].mxu1 %vm2611_vm13, %v3573_v20 }
 0x3a6   : > { %v4905_v30 = vpop.f32.mrb[56].mxu1 }
 0x3a7   : > { %v2975_v38 = vadd.f32 %v4905_v30, %v6868_v58  ;;  %v2966_v62 = vpop.f32.mrb[57].mxu1 }
 0x3a8   : > { %v2967_v44 = vadd.f32 %v6868_v58, %v2966_v62  ;;  %v4906_v15 = vpop.f32.mrb[58].mxu1 }
 0x3a9   : > { %v2978_v5 = vadd.f32 %v4906_v15, %v6868_v58  ;;  %v2969_v36 = vpop.f32.mrb[59].mxu1  ;;  %v3055_v10 = vmax.f32 %v2975_v38, 0.0 }
 0x3aa   : > { %v2970_v55 = vadd.f32 %v6868_v58, %v2969_v36  ;;  %v3053_v2 = vmax.f32 %v2967_v44, 0.0 }
 0x3ab   : > { %v3056_v34 = vmax.f32 %v2978_v5, 0.0 }
 0x3ac   : > { %v3054_v50 = vmax.f32 %v2970_v55, 0.0  ;;  %v4937_v3 = vpop.f32.mrb[84].mxu0 }
 0x3ad   : > { %v3090_v39 = vpack.c.bf16 %v3056_v34, %v3055_v10  ;;  %v3334_v43 = vadd.f32 %v4937_v3, %v6980_v40  ;;  %v3325_v9 = vpop.f32.mrb[85].mxu0 }
 0x3ae   : > { %v3089_v1 = vpack.c.bf16 %v3054_v50, %v3053_v2  ;;  %v3326_v23 = vadd.f32 %v6980_v40, %v3325_v9  ;;  %v4938_v37 = vpop.f32.mrb[86].mxu0 }
 0x3af   : > { %v3337_v0 = vadd.f32 %v4938_v37, %v6980_v40  ;;  %v3328_v25 = vpop.f32.mrb[87].mxu0  ;;  %v3522_v16 = vmax.f32 %v3334_v43, 0.0 }
 0x3b0   : > { %v3329_v21 = vadd.f32 %v6980_v40, %v3328_v25  ;;  %4971 = vmatprep.mubr.msk.bf16.mxu0 %vm2611_vm13, %v3089_v1  ;;  %v3520_v61 = vmax.f32 %v3326_v23, 0.0 }
 0x3b1   : > { %v3523_v41 = vmax.f32 %v3337_v0, 0.0  ;;  %4972 = vmatmul.mubr.msk.bf16.gmra.mrb[120].mxu0 %vm2611_vm13, %v3090_v39 }
 0x3b2   : > { %v3521_v48 = vmax.f32 %v3329_v21, 0.0 }
 0x3b3   : > { %v3575_v32 = vpack.c.bf16 %v3523_v41, %v3522_v16 }
 0x3b4   : > { %v3574_v54 = vpack.c.bf16 %v3521_v48, %v3520_v61 }
 0x3b6   : > { %5003 = vmatprep.mubr.msk.bf16.mxu1 %vm2611_vm13, %v3574_v54 }
 0x3b7   : > { %5004 = vmatmul.mubr.msk.bf16.gmra.mrb[84].mxu1 %vm2611_vm13, %v3575_v32 }
 0x3be   : > { %v4909_v18 = vpop.f32.mrb[60].mxu1 }
 0x3bf   : > { %v2991_v12 = vadd.f32 %v4909_v18, %v6868_v58  ;;  %v2982_v56 = vpop.f32.mrb[61].mxu1 }
 0x3c0   : > { %v2983_v19 = vadd.f32 %v6868_v58, %v2982_v56  ;;  %v4910_v53 = vpop.f32.mrb[62].mxu1 }
 0x3c1   : > { %v2994_v49 = vadd.f32 %v4910_v53, %v6868_v58  ;;  %v2985_v11 = vpop.f32.mrb[63].mxu1  ;;  %v3059_v33 = vmax.f32 %v2991_v12, 0.0  ;;  %v7081_v12 = vld [vmem:[%s7306_s5 + $0x2] ss:$0 sm:$0xff] }
 0x3c2   : > { %v2986_v47 = vadd.f32 %v6868_v58, %v2985_v11  ;;  %v3057_v63 = vmax.f32 %v2983_v19, 0.0 }
 0x3c3   : > { %v3060_v7 = vmax.f32 %v2994_v49, 0.0 }
 0x3c4   : > { %v3058_v17 = vmax.f32 %v2986_v47, 0.0  ;;  %v4941_v26 = vpop.f32.mrb[88].mxu0 }
 0x3c5   : > { %v3092_v59 = vpack.c.bf16 %v3060_v7, %v3059_v33  ;;  %v3350_v35 = vadd.f32 %v4941_v26, %v6980_v40  ;;  %v3341_v60 = vpop.f32.mrb[89].mxu0 }
 0x3c6   : > { %v3091_v6 = vpack.c.bf16 %v3058_v17, %v3057_v63  ;;  %v3342_v24 = vadd.f32 %v6980_v40, %v3341_v60  ;;  %v4942_v42 = vpop.f32.mrb[90].mxu0 }
 0x3c7   : > { %v3353_v28 = vadd.f32 %v4942_v42, %v6980_v40  ;;  %v3344_v14 = vpop.f32.mrb[91].mxu0  ;;  %v3526_v58 = vmax.f32 %v3350_v35, 0.0 }
 0x3c8   : > { %v3345_v29 = vadd.f32 %v6980_v40, %v3344_v14  ;;  %4975 = vmatprep.mubr.msk.bf16.mxu0 %vm2611_vm13, %v3091_v6  ;;  %v3524_v45 = vmax.f32 %v3342_v24, 0.0 }
 0x3c9   : > { %v3527_v27 = vmax.f32 %v3353_v28, 0.0  ;;  %4976 = vmatmul.mubr.msk.bf16.gmra.mrb[124].mxu0 %vm2611_vm13, %v3092_v59 }
 0x3ca   : > { %v3525_v8 = vmax.f32 %v3345_v29, 0.0 }
 0x3cb   : > { %v3577_v52 = vpack.c.bf16 %v3527_v27, %v3526_v58 }
 0x3cc   : > { %v3576_v22 = vpack.c.bf16 %v3525_v8, %v3524_v45 }
 0x3ce   : > { %5007 = vmatprep.mubr.msk.bf16.mxu1 %vm2611_vm13, %v3576_v22 }
 0x3cf   : > { %5008 = vmatmul.mubr.msk.bf16.gmra.mrb[88].mxu1 %vm2611_vm13, %v3577_v52 }
 0x3dc   : > { %v4945_v31 = vpop.f32.mrb[92].mxu0 }
 0x3dd   : > { %v3366_v51 = vadd.f32 %v4945_v31, %v6980_v40  ;;  %v3357_v46 = vpop.f32.mrb[93].mxu0 }
 0x3de   : > { %v3358_v57 = vadd.f32 %v6980_v40, %v3357_v46  ;;  %v4946_v13 = vpop.f32.mrb[94].mxu0 }
 0x3df   : > { %v3369_v20 = vadd.f32 %v4946_v13, %v6980_v40  ;;  %v3360_v4 = vpop.f32.mrb[95].mxu0  ;;  %v3530_v38 = vmax.f32 %v3366_v51, 0.0 }
 0x3e0   : > { %v3361_v30 = vadd.f32 %v6980_v40, %v3360_v4  ;;  %v3528_v44 = vmax.f32 %v3358_v57, 0.0 }
 0x3e1   : > { %v3531_v62 = vmax.f32 %v3369_v20, 0.0 }
 0x3e2   : > { %v3529_v15 = vmax.f32 %v3361_v30, 0.0 }
 0x3e3   : > { %v3579_v5 = vpack.c.bf16 %v3531_v62, %v3530_v38 }
 0x3e4   : > { %v3578_v36 = vpack.c.bf16 %v3529_v15, %v3528_v44 }
 0x3e6   : > { %5011 = vmatprep.mubr.msk.bf16.mxu1 %vm2611_vm13, %v3578_v36 }
 0x3e7   : > { %5012 = vmatmul.mubr.msk.bf16.gmra.mrb[92].mxu1 %vm2611_vm13, %v3579_v5 }
 0x3f4   : > { %v4949_v55 = vpop.f32.mrb[96].mxu0 }
 0x3f5   : > { %v3382_v10 = vadd.f32 %v4949_v55, %v6980_v40  ;;  %v3373_v34 = vpop.f32.mrb[97].mxu0 }
 0x3f6   : > { %v3374_v2 = vadd.f32 %v6980_v40, %v3373_v34  ;;  %v4950_v50 = vpop.f32.mrb[98].mxu0 }
 0x3f7   : > { %v3385_v3 = vadd.f32 %v4950_v50, %v6980_v40  ;;  %v3376_v39 = vpop.f32.mrb[99].mxu0  ;;  %v3534_v9 = vmax.f32 %v3382_v10, 0.0 }
 0x3f8   : > { %v3377_v43 = vadd.f32 %v6980_v40, %v3376_v39  ;;  %v3532_v23 = vmax.f32 %v3374_v2, 0.0 }
 0x3f9   : > { %v3535_v1 = vmax.f32 %v3385_v3, 0.0 }
 0x3fa   : > { %v3533_v37 = vmax.f32 %v3377_v43, 0.0 }
 0x3fb   : > { %v3581_v0 = vpack.c.bf16 %v3535_v1, %v3534_v9 }
 0x3fc   : > { %v3580_v25 = vpack.c.bf16 %v3533_v37, %v3532_v23 }
 0x3fe   : > { %5015 = vmatprep.mubr.msk.bf16.mxu1 %vm2611_vm13, %v3580_v25 }
 0x3ff   : > { %5016 = vmatmul.mubr.msk.bf16.gmra.mrb[96].mxu1 %vm2611_vm13, %v3581_v0 }
 0x40c   : > { %v4953_v21 = vpop.f32.mrb[100].mxu0 }
 0x40d   : > { %v3398_v16 = vadd.f32 %v4953_v21, %v6980_v40  ;;  %v3389_v41 = vpop.f32.mrb[101].mxu0 }
 0x40e   : > { %v3390_v61 = vadd.f32 %v6980_v40, %v3389_v41  ;;  %v4954_v48 = vpop.f32.mrb[102].mxu0 }
 0x40f   : > { %v3401_v32 = vadd.f32 %v4954_v48, %v6980_v40  ;;  %v3392_v54 = vpop.f32.mrb[103].mxu0  ;;  %v3538_v56 = vmax.f32 %v3398_v16, 0.0 }
 0x410   : > { %v3393_v18 = vadd.f32 %v6980_v40, %v3392_v54  ;;  %v3536_v53 = vmax.f32 %v3390_v61, 0.0 }
 0x411   : > { %v3539_v19 = vmax.f32 %v3401_v32, 0.0 }
 0x412   : > { %v3537_v49 = vmax.f32 %v3393_v18, 0.0  ;;  %v4985_v11 = vpop.f32.mrb[64].mxu1 }
 0x413   : > { %v3583_v47 = vpack.c.bf16 %v3539_v19, %v3538_v56  ;;  %v3757_v33 = vadd.f32 %v4985_v11, %v7081_v12  ;;  %v3748_v7 = vpop.f32.mrb[65].mxu1 }
 0x414   : > { %v3582_v63 = vpack.c.bf16 %v3537_v49, %v3536_v53  ;;  %v3749_v17 = vadd.f32 %v7081_v12, %v3748_v7  ;;  %v4986_v26 = vpop.f32.mrb[66].mxu1 }
 0x415   : > { %v3760_v59 = vadd.f32 %v4986_v26, %v7081_v12  ;;  %v3751_v35 = vpop.f32.mrb[67].mxu1  ;;  %v4005_v6 = vmax.f32 %v3757_v33, 0.0 }
 0x416   : > { %v3752_v60 = vadd.f32 %v7081_v12, %v3751_v35  ;;  %5019 = vmatprep.mubr.msk.bf16.mxu1 %vm2611_vm13, %v3582_v63  ;;  %v4003_v42 = vmax.f32 %v3749_v17, 0.0 }
 0x417   : > { %v4006_v24 = vmax.f32 %v3760_v59, 0.0  ;;  %5020 = vmatmul.mubr.msk.bf16.gmra.mrb[100].mxu1 %vm2611_vm13, %v3583_v47 }
 0x418   : > { %v4004_v28 = vmax.f32 %v3752_v60, 0.0 }
 0x419   : > { %v7089_v14 = vpack.c.bf16 %v4006_v24, %v4005_v6 }
 0x41a   : > { %v7091_v29 = vpack.c.bf16 %v4004_v28, %v4003_v42 }
 0x424   : > { %v4957_v58 = vpop.f32.mrb[104].mxu0 }
 0x425   : > { %v3414_v27 = vadd.f32 %v4957_v58, %v6980_v40  ;;  %v3405_v45 = vpop.f32.mrb[105].mxu0 }
 0x426   : > { %v3406_v8 = vadd.f32 %v6980_v40, %v3405_v45  ;;  %v4958_v52 = vpop.f32.mrb[106].mxu0 }
 0x427   : > { %v3417_v22 = vadd.f32 %v4958_v52, %v6980_v40  ;;  %v3408_v31 = vpop.f32.mrb[107].mxu0  ;;  %v3542_v46 = vmax.f32 %v3414_v27, 0.0 }
 0x428   : > { %v3409_v51 = vadd.f32 %v6980_v40, %v3408_v31  ;;  %v3540_v13 = vmax.f32 %v3406_v8, 0.0 }
 0x429   : > { %v3543_v57 = vmax.f32 %v3417_v22, 0.0 }
 0x42a   : > { %v3541_v20 = vmax.f32 %v3409_v51, 0.0  ;;  %v4989_v4 = vpop.f32.mrb[68].mxu1 }
 0x42b   : > { %v3585_v30 = vpack.c.bf16 %v3543_v57, %v3542_v46  ;;  %v3773_v38 = vadd.f32 %v4989_v4, %v7081_v12  ;;  %v3764_v62 = vpop.f32.mrb[69].mxu1 }
 0x42c   : > { %v3584_v44 = vpack.c.bf16 %v3541_v20, %v3540_v13  ;;  %v3765_v15 = vadd.f32 %v7081_v12, %v3764_v62  ;;  %v4990_v5 = vpop.f32.mrb[70].mxu1 }
 0x42d   : > { %v3776_v36 = vadd.f32 %v4990_v5, %v7081_v12  ;;  %v3767_v55 = vpop.f32.mrb[71].mxu1  ;;  %v4009_v34 = vmax.f32 %v3773_v38, 0.0 }
 0x42e   : > { %v3768_v10 = vadd.f32 %v7081_v12, %v3767_v55  ;;  %5023 = vmatprep.mubr.msk.bf16.mxu1 %vm2611_vm13, %v3584_v44  ;;  %v4007_v50 = vmax.f32 %v3765_v15, 0.0 }
 0x42f   : > { %v4010_v2 = vmax.f32 %v3776_v36, 0.0  ;;  %5024 = vmatmul.mubr.msk.bf16.gmra.mrb[104].mxu1 %vm2611_vm13, %v3585_v30 }
 0x430   : > { %v4008_v3 = vmax.f32 %v3768_v10, 0.0 }
 0x431   : > { %v7103_v39 = vpack.c.bf16 %v4010_v2, %v4009_v34 }
 0x432   : > { %v7105_v43 = vpack.c.bf16 %v4008_v3, %v4007_v50 }
 0x43c   : > { %v4961_v9 = vpop.f32.mrb[108].mxu0 }
 0x43d   : > { %v3430_v1 = vadd.f32 %v4961_v9, %v6980_v40  ;;  %v3421_v23 = vpop.f32.mrb[109].mxu0 }
 0x43e   : > { %v3422_v37 = vadd.f32 %v6980_v40, %v3421_v23  ;;  %v4962_v0 = vpop.f32.mrb[110].mxu0 }
 0x43f   : > { %v3433_v25 = vadd.f32 %v4962_v0, %v6980_v40  ;;  %v3424_v21 = vpop.f32.mrb[111].mxu0  ;;  %v3546_v41 = vmax.f32 %v3430_v1, 0.0 }
 0x440   : > { %v3425_v16 = vadd.f32 %v6980_v40, %v3424_v21  ;;  %v3544_v48 = vmax.f32 %v3422_v37, 0.0 }
 0x441   : > { %v3547_v61 = vmax.f32 %v3433_v25, 0.0 }
 0x442   : > { %v3545_v32 = vmax.f32 %v3425_v16, 0.0  ;;  %v4993_v54 = vpop.f32.mrb[72].mxu1 }
 0x443   : > { %v3587_v18 = vpack.c.bf16 %v3547_v61, %v3546_v41  ;;  %v3789_v56 = vadd.f32 %v4993_v54, %v7081_v12  ;;  %v3780_v19 = vpop.f32.mrb[73].mxu1 }
 0x444   : > { %v3586_v53 = vpack.c.bf16 %v3545_v32, %v3544_v48  ;;  %v3781_v49 = vadd.f32 %v7081_v12, %v3780_v19  ;;  %v4994_v11 = vpop.f32.mrb[74].mxu1 }
 0x445   : > { %v3792_v47 = vadd.f32 %v4994_v11, %v7081_v12  ;;  %v3783_v33 = vpop.f32.mrb[75].mxu1  ;;  %v4013_v63 = vmax.f32 %v3789_v56, 0.0 }
 0x446   : > { %v3784_v7 = vadd.f32 %v7081_v12, %v3783_v33  ;;  %5027 = vmatprep.mubr.msk.bf16.mxu1 %vm2611_vm13, %v3586_v53  ;;  %v4011_v26 = vmax.f32 %v3781_v49, 0.0 }
 0x447   : > { %v4014_v17 = vmax.f32 %v3792_v47, 0.0  ;;  %5028 = vmatmul.mubr.msk.bf16.gmra.mrb[108].mxu1 %vm2611_vm13, %v3587_v18 }
 0x448   : > { %v4012_v59 = vmax.f32 %v3784_v7, 0.0 }
 0x449   : > { %v7117_v35 = vpack.c.bf16 %v4014_v17, %v4013_v63 }
 0x44a   : > { %v7119_v60 = vpack.c.bf16 %v4012_v59, %v4011_v26 }
 0x454   : > { %v4965_v6 = vpop.f32.mrb[112].mxu0 }
 0x455   : > { %v3446_v24 = vadd.f32 %v4965_v6, %v6980_v40  ;;  %v3437_v42 = vpop.f32.mrb[113].mxu0  ;;  %v4110_v6 = vsel %vm2611_vm13, %v7091_v29, 0 }
 0x456   : > { %v3438_v28 = vadd.f32 %v6980_v40, %v3437_v42  ;;  %v4966_v58 = vpop.f32.mrb[114].mxu0  ;;  %v4113_v42 = vsel %vm2611_vm13, %v7089_v14, 0 }
 0x457   : > { %v3449_v27 = vadd.f32 %v4966_v58, %v6980_v40  ;;  %v3440_v45 = vpop.f32.mrb[115].mxu0  ;;  %v3550_v52 = vmax.f32 %v3446_v24, 0.0 }
 0x458   : > { %v3441_v8 = vadd.f32 %v6980_v40, %v3440_v45  ;;  %v3548_v31 = vmax.f32 %v3438_v28, 0.0 }
 0x459   : > { %v3551_v22 = vmax.f32 %v3449_v27, 0.0 }
 0x45a   : > { %v3549_v51 = vmax.f32 %v3441_v8, 0.0  ;;  %v4997_v46 = vpop.f32.mrb[76].mxu1 }
 0x45b   : > { %v3589_v57 = vpack.c.bf16 %v3551_v22, %v3550_v52  ;;  %v3805_v13 = vadd.f32 %v4997_v46, %v7081_v12  ;;  %v3796_v20 = vpop.f32.mrb[77].mxu1 }
 0x45c   : > { %v3588_v4 = vpack.c.bf16 %v3549_v51, %v3548_v31  ;;  %v3797_v30 = vadd.f32 %v7081_v12, %v3796_v20  ;;  %v4998_v38 = vpop.f32.mrb[78].mxu1 }
 0x45d   : > { %v3808_v62 = vadd.f32 %v4998_v38, %v7081_v12  ;;  %v3799_v44 = vpop.f32.mrb[79].mxu1  ;;  %v4017_v5 = vmax.f32 %v3805_v13, 0.0 }
 0x45e   : > { %v3800_v15 = vadd.f32 %v7081_v12, %v3799_v44  ;;  %5031 = vmatprep.mubr.msk.bf16.mxu1 %vm2611_vm13, %v3588_v4  ;;  %v4015_v55 = vmax.f32 %v3797_v30, 0.0 }
 0x45f   : > { %v4018_v36 = vmax.f32 %v3808_v62, 0.0  ;;  %5032 = vmatmul.mubr.msk.bf16.gmra.mrb[112].mxu1 %vm2611_vm13, %v3589_v57 }
 0x460   : > { %v4016_v10 = vmax.f32 %v3800_v15, 0.0 }
 0x461   : > { %v7131_v34 = vpack.c.bf16 %v4018_v36, %v4017_v5 }
 0x462   : > { %v7133_v2 = vpack.c.bf16 %v4016_v10, %v4015_v55 }
 0x46c   : > { %v4969_v50 = vpop.f32.mrb[116].mxu0 }
 0x46d   : > { %v3462_v3 = vadd.f32 %v4969_v50, %v6980_v40  ;;  %v3453_v9 = vpop.f32.mrb[117].mxu0 }
 0x46e   : > { %v3454_v1 = vadd.f32 %v6980_v40, %v3453_v9  ;;  %v4970_v23 = vpop.f32.mrb[118].mxu0  ;;  %v4116_v9 = vsel %vm2611_vm13, %v7105_v43, 0 }
 0x46f   : > { %v3465_v37 = vadd.f32 %v4970_v23, %v6980_v40  ;;  %v3456_v0 = vpop.f32.mrb[119].mxu0  ;;  %v3554_v21 = vmax.f32 %v3462_v3, 0.0  ;;  %v4119_v23 = vsel %vm2611_vm13, %v7103_v39, 0 }
 0x470   : > { %v3457_v25 = vadd.f32 %v6980_v40, %v3456_v0  ;;  %v3552_v41 = vmax.f32 %v3454_v1, 0.0 }
 0x471   : > { %v3555_v16 = vmax.f32 %v3465_v37, 0.0 }
 0x472   : > { %v3553_v61 = vmax.f32 %v3457_v25, 0.0  ;;  %v5001_v48 = vpop.f32.mrb[80].mxu1 }
 0x473   : > { %v3591_v32 = vpack.c.bf16 %v3555_v16, %v3554_v21  ;;  %v3821_v54 = vadd.f32 %v5001_v48, %v7081_v12  ;;  %v3812_v18 = vpop.f32.mrb[81].mxu1 }
 0x474   : > { %v3590_v56 = vpack.c.bf16 %v3553_v61, %v3552_v41  ;;  %v3813_v19 = vadd.f32 %v7081_v12, %v3812_v18  ;;  %v5002_v53 = vpop.f32.mrb[82].mxu1 }
 0x475   : > { %v3824_v49 = vadd.f32 %v5002_v53, %v7081_v12  ;;  %v3815_v11 = vpop.f32.mrb[83].mxu1  ;;  %v4021_v33 = vmax.f32 %v3821_v54, 0.0 }
 0x476   : > { %v3816_v47 = vadd.f32 %v7081_v12, %v3815_v11  ;;  %5035 = vmatprep.mubr.msk.bf16.mxu1 %vm2611_vm13, %v3590_v56  ;;  %v4019_v63 = vmax.f32 %v3813_v19, 0.0 }
 0x477   : > { %v4022_v7 = vmax.f32 %v3824_v49, 0.0  ;;  %5036 = vmatmul.mubr.msk.bf16.gmra.mrb[116].mxu1 %vm2611_vm13, %v3591_v32 }
 0x478   : > { %v4020_v17 = vmax.f32 %v3816_v47, 0.0 }
 0x479   : > { %v4077_v26 = vpack.c.bf16 %v4022_v7, %v4021_v33 }
 0x47a   : > { %v4076_v59 = vpack.c.bf16 %v4020_v17, %v4019_v63 }
 0x47c   : > { %5048 = vmatprep.subr.msk.bf16.mxu0 %vm2611_vm13, %v4076_v59 }
 0x47d   : > { %4740 = vmatpush3.bf16.xpose.msra.mxu0 %v4110_v6 }
 0x47e   : > { %5049 = vmatprep.subr.msk.bf16.mxu0 %vm2611_vm13, %v4077_v26 }
 0x484   : > { %v4973_v24 = vpop.f32.mrb[120].mxu0 }
 0x485   : > { %v3478_v28 = vadd.f32 %v4973_v24, %v6980_v40  ;;  %v3469_v58 = vpop.f32.mrb[121].mxu0  ;;  %4742 = vmatpush3.bf16.xpose.msra.mxu0 %v4113_v42  ;;  %v4122_v24 = vsel %vm2611_vm13, %v7119_v60, 0  ;;  %v4125_v42 = vsel %vm2611_vm13, %v7117_v35, 0  ;;  %v4128_v35 = vsel %vm2611_vm13, %v7133_v2, 0 }
 0x486   : > { %v3470_v27 = vadd.f32 %v6980_v40, %v3469_v58  ;;  %v4974_v45 = vpop.f32.mrb[122].mxu0 }
 0x487   : > { %v3481_v8 = vadd.f32 %v4974_v45, %v6980_v40  ;;  %v3472_v52 = vpop.f32.mrb[123].mxu0  ;;  %v3558_v29 = vmax.f32 %v3478_v28, 0.0 }
 0x488   : > { %v3473_v22 = vadd.f32 %v6980_v40, %v3472_v52  ;;  %v3556_v51 = vmax.f32 %v3470_v27, 0.0 }
 0x489   : > { %v3559_v31 = vmax.f32 %v3481_v8, 0.0 }
 0x48a   : > { %v3557_v46 = vmax.f32 %v3473_v22, 0.0  ;;  %v5005_v57 = vpop.f32.mrb[84].mxu1 }
 0x48b   : > { %v3593_v13 = vpack.c.bf16 %v3559_v31, %v3558_v29  ;;  %v3837_v14 = vadd.f32 %v5005_v57, %v7081_v12  ;;  %v3828_v20 = vpop.f32.mrb[85].mxu1 }
 0x48c   : > { %v3592_v4 = vpack.c.bf16 %v3557_v46, %v3556_v51  ;;  %v3829_v30 = vadd.f32 %v7081_v12, %v3828_v20  ;;  %v5006_v38 = vpop.f32.mrb[86].mxu1 }
 0x48d   : > { %v3840_v62 = vadd.f32 %v5006_v38, %v7081_v12  ;;  %v3831_v44 = vpop.f32.mrb[87].mxu1  ;;  %v4025_v5 = vmax.f32 %v3837_v14, 0.0  ;;  %v4131_v14 = vsel %vm2611_vm13, %v7131_v34, 0 }
 0x48e   : > { %v3832_v15 = vadd.f32 %v7081_v12, %v3831_v44  ;;  %5039 = vmatprep.mubr.msk.bf16.mxu1 %vm2611_vm13, %v3592_v4  ;;  %v4023_v55 = vmax.f32 %v3829_v30, 0.0 }
 0x48f   : > { %v4026_v36 = vmax.f32 %v3840_v62, 0.0  ;;  %5040 = vmatmul.mubr.msk.bf16.gmra.mrb[120].mxu1 %vm2611_vm13, %v3593_v13 }
 0x490   : > { %v4024_v10 = vmax.f32 %v3832_v15, 0.0 }
 0x491   : > { %v4079_v50 = vpack.c.bf16 %v4026_v36, %v4025_v5 }
 0x492   : > { %v4078_v3 = vpack.c.bf16 %v4024_v10, %v4023_v55 }
 0x494   : > { %5050 = vmatprep.subr.msk.bf16.mxu0 %vm2611_vm13, %v4078_v3 }
 0x495   : > { %4744 = vmatpush3.bf16.xpose.msra.mxu0 %v4116_v9 }
 0x496   : > { %5051 = vmatprep.subr.msk.bf16.mxu0 %vm2611_vm13, %v4079_v50 }
 0x49c   : > { %v4977_v1 = vpop.f32.mrb[124].mxu0 }
 0x49d   : > { %v3494_v37 = vadd.f32 %v4977_v1, %v6980_v40  ;;  %v3485_v0 = vpop.f32.mrb[125].mxu0  ;;  %4746 = vmatpush3.bf16.xpose.msra.mxu0 %v4119_v23 }
 0x49e   : > { %v3486_v25 = vadd.f32 %v6980_v40, %v3485_v0  ;;  %v4978_v21 = vpop.f32.mrb[126].mxu0 }
 0x49f   : > { %v3497_v16 = vadd.f32 %v4978_v21, %v6980_v40  ;;  %v3488_v41 = vpop.f32.mrb[127].mxu0  ;;  %v3562_v43 = vmax.f32 %v3494_v37, 0.0 }
 0x4a0   : > { %v3489_v61 = vadd.f32 %v6980_v40, %v3488_v41  ;;  %v3560_v32 = vmax.f32 %v3486_v25, 0.0 }
 0x4a1   : > { %v3563_v48 = vmax.f32 %v3497_v16, 0.0 }
 0x4a2   : > { %v3561_v54 = vmax.f32 %v3489_v61, 0.0  ;;  %v5009_v18 = vpop.f32.mrb[88].mxu1 }
 0x4a3   : > { %v3595_v56 = vpack.c.bf16 %v3563_v48, %v3562_v43  ;;  %v3853_v39 = vadd.f32 %v5009_v18, %v7081_v12  ;;  %v3844_v19 = vpop.f32.mrb[89].mxu1 }
 0x4a4   : > { %v3594_v53 = vpack.c.bf16 %v3561_v54, %v3560_v32  ;;  %v3845_v49 = vadd.f32 %v7081_v12, %v3844_v19  ;;  %v5010_v11 = vpop.f32.mrb[90].mxu1 }
 0x4a5   : > { %v3856_v47 = vadd.f32 %v5010_v11, %v7081_v12  ;;  %v3847_v33 = vpop.f32.mrb[91].mxu1  ;;  %v4029_v40 = vmax.f32 %v3853_v39, 0.0 }
 0x4a6   : > { %v3848_v7 = vadd.f32 %v7081_v12, %v3847_v33  ;;  %5043 = vmatprep.mubr.msk.bf16.mxu1 %vm2611_vm13, %v3594_v53  ;;  %v4027_v17 = vmax.f32 %v3845_v49, 0.0 }
 0x4a7   : > { %v4030_v63 = vmax.f32 %v3856_v47, 0.0  ;;  %5044 = vmatmul.mubr.msk.bf16.gmra.mrb[124].mxu1 %vm2611_vm13, %v3595_v56 }
 0x4a8   : > { %v4028_v26 = vmax.f32 %v3848_v7, 0.0 }
 0x4a9   : > { %v4081_v59 = vpack.c.bf16 %v4030_v63, %v4029_v40 }
 0x4aa   : > { %v4080_v6 = vpack.c.bf16 %v4028_v26, %v4027_v17  ;;  %v7220_v26 = vld [vmem:[%s7307_s6] sm:$0x3] }
 0x4ab   : > { %4755 = vmatprep.mubr.msk.bf16.mxu0 %vm2611_vm13, %v7220_v26  ;;  %4773 = vmatprep.mubr.msk.bf16.mxu1 %vm2611_vm13, %v7220_v26 }
 0x4ac   : > { %5052 = vmatprep.subr.msk.bf16.mxu0 %vm2611_vm13, %v4080_v6  ;;  %v5208_v6 = vmov 0  }
 0x4ad   : > { %4748 = vmatpush3.bf16.xpose.msra.mxu0 %v4122_v24  ;;  %5112 = vset.pattern.permute.xlu0 %v5208_v6 }
 0x4ae   : > { %5053 = vmatprep.subr.msk.bf16.mxu0 %vm2611_vm13, %v4081_v59  ;;  %v4100_v59 = vld [vmem:[%s7308_s7] sm:$0x7] }
 0x4af   : > { %4103 = vperm.xlu0 %5112, %v4100_v59  }
 0x4b5   : > { %4750 = vmatpush3.bf16.xpose.msra.mxu0 %v4125_v42 }
 0x4ba   : > { %v5013_v28 = vpop.f32.mrb[92].mxu1 }
 0x4bb   : > { %v3869_v58 = vadd.f32 %v5013_v28, %v7081_v12  ;;  %v3860_v27 = vpop.f32.mrb[93].mxu1 }
 0x4bc   : > { %v3861_v45 = vadd.f32 %v7081_v12, %v3860_v27  ;;  %v5014_v8 = vpop.f32.mrb[94].mxu1 }
 0x4bd   : > { %v3872_v52 = vadd.f32 %v5014_v8, %v7081_v12  ;;  %v3863_v22 = vpop.f32.mrb[95].mxu1  ;;  %v4033_v60 = vmax.f32 %v3869_v58, 0.0 }
 0x4be   : > { %v3864_v29 = vadd.f32 %v7081_v12, %v3863_v22  ;;  %v4031_v51 = vmax.f32 %v3861_v45, 0.0 }
 0x4bf   : > { %v4034_v31 = vmax.f32 %v3872_v52, 0.0 }
 0x4c0   : > { %v4032_v46 = vmax.f32 %v3864_v29, 0.0 }
 0x4c1   : > { %v4083_v57 = vpack.c.bf16 %v4034_v31, %v4033_v60 }
 0x4c2   : > { %v4082_v13 = vpack.c.bf16 %v4032_v46, %v4031_v51 }
 0x4c4   : > { %5054 = vmatprep.subr.msk.bf16.mxu0 %vm2611_vm13, %v4082_v13 }
 0x4c5   : > { %4752 = vmatpush3.bf16.xpose.msra.mxu0 %v4128_v35 }
 0x4c6   : > { %5055 = vmatprep.subr.msk.bf16.mxu0 %vm2611_vm13, %v4083_v57 }
 0x4cd   : > { %4754 = vmatpush3.bf16.xpose.msra.mxu0 %v4131_v14 }
 0x4d2   : > { %v5017_v20 = vpop.f32.mrb[96].mxu1 }
 0x4d3   : > { %v3885_v4 = vadd.f32 %v5017_v20, %v7081_v12  ;;  %v3876_v30 = vpop.f32.mrb[97].mxu1 }
 0x4d4   : > { %v3877_v38 = vadd.f32 %v7081_v12, %v3876_v30  ;;  %v5018_v62 = vpop.f32.mrb[98].mxu1  ;;  %4756 = vmatmul.mubr.msk.bf16.vlgmr.msra.gmra.mrb[128].mxu0 %vm2611_vm13, %v7220_v26 }
 0x4d5   : > { %v3888_v44 = vadd.f32 %v5018_v62, %v7081_v12  ;;  %v3879_v15 = vpop.f32.mrb[99].mxu1  ;;  %v4037_v2 = vmax.f32 %v3885_v4, 0.0 }
 0x4d6   : > { %v3880_v5 = vadd.f32 %v7081_v12, %v3879_v15  ;;  %v4035_v55 = vmax.f32 %v3877_v38, 0.0 }
 0x4d7   : > { %v4038_v36 = vmax.f32 %v3888_v44, 0.0 }
 0x4d8   : > { %v4036_v10 = vmax.f32 %v3880_v5, 0.0 }
 0x4d9   : > { %v7197_v50 = vpack.c.bf16 %v4038_v36, %v4037_v2 }
 0x4da   : > { %v7199_v34 = vpack.c.bf16 %v4036_v10, %v4035_v55 }
 0x4db   : > { %v4161_v10 = vsel %vm2611_vm13, %v7197_v50, 0 }
 0x4dc   : > { %v4158_v55 = vsel %vm2611_vm13, %v7199_v34, 0 }
 0x4ea   : > { %v5021_v3 = vpop.f32.mrb[100].mxu1 }
 0x4eb   : > { %v3901_v9 = vadd.f32 %v5021_v3, %v7081_v12  ;;  %v3892_v1 = vpop.f32.mrb[101].mxu1 }
 0x4ec   : > { %v3893_v23 = vadd.f32 %v7081_v12, %v3892_v1  ;;  %v5022_v37 = vpop.f32.mrb[102].mxu1 }
 0x4ed   : > { %v3904_v0 = vadd.f32 %v5022_v37, %v7081_v12  ;;  %v3895_v25 = vpop.f32.mrb[103].mxu1  ;;  %v4041_v16 = vmax.f32 %v3901_v9, 0.0 }
 0x4ee   : > { %v3896_v21 = vadd.f32 %v7081_v12, %v3895_v25  ;;  %v4039_v61 = vmax.f32 %v3893_v23, 0.0 }
 0x4ef   : > { %v4042_v41 = vmax.f32 %v3904_v0, 0.0 }
 0x4f0   : > { %v4040_v43 = vmax.f32 %v3896_v21, 0.0 }
 0x4f1   : > { %v7205_v48 = vpack.c.bf16 %v4042_v41, %v4041_v16 }
 0x4f2   : > { %v7207_v32 = vpack.c.bf16 %v4040_v43, %v4039_v61 }
 0x4f4   : > { %v4164_v50 = vsel %vm2611_vm13, %v7207_v32, 0 }
 0x502   : > { %v5025_v54 = vpop.f32.mrb[104].mxu1 }
 0x503   : > { %v3917_v18 = vadd.f32 %v5025_v54, %v7081_v12  ;;  %v3908_v56 = vpop.f32.mrb[105].mxu1 }
 0x504   : > { %v3909_v39 = vadd.f32 %v7081_v12, %v3908_v56  ;;  %v5026_v19 = vpop.f32.mrb[106].mxu1 }
 0x505   : > { %v3920_v53 = vadd.f32 %v5026_v19, %v7081_v12  ;;  %v3911_v49 = vpop.f32.mrb[107].mxu1  ;;  %v4045_v47 = vmax.f32 %v3917_v18, 0.0  ;;  %v4167_v18 = vsel %vm2611_vm13, %v7205_v48, 0 }
 0x506   : > { %v3912_v11 = vadd.f32 %v7081_v12, %v3911_v49  ;;  %v4043_v7 = vmax.f32 %v3909_v39, 0.0 }
 0x507   : > { %v4046_v33 = vmax.f32 %v3920_v53, 0.0 }
 0x508   : > { %v4044_v40 = vmax.f32 %v3912_v11, 0.0 }
 0x509   : > { %v7213_v63 = vpack.c.bf16 %v4046_v33, %v4045_v47 }
 0x50a   : > { %v7215_v17 = vpack.c.bf16 %v4044_v40, %v4043_v7 }
 0x50c   : > { %v4170_v48 = vsel %vm2611_vm13, %v7215_v17, 0 }
 0x51a   : > { %v5029_v24 = vpop.f32.mrb[108].mxu1 }
 0x51b   : > { %v3933_v42 = vadd.f32 %v5029_v24, %v7081_v12  ;;  %v3924_v28 = vpop.f32.mrb[109].mxu1 }
 0x51c   : > { %v3925_v58 = vadd.f32 %v7081_v12, %v3924_v28  ;;  %v5030_v27 = vpop.f32.mrb[110].mxu1 }
 0x51d   : > { %v3936_v45 = vadd.f32 %v5030_v27, %v7081_v12  ;;  %v3927_v8 = vpop.f32.mrb[111].mxu1  ;;  %v4049_v22 = vmax.f32 %v3933_v42, 0.0  ;;  %v4173_v42 = vsel %vm2611_vm13, %v7213_v63, 0 }
 0x51e   : > { %v3928_v52 = vadd.f32 %v7081_v12, %v3927_v8  ;;  %v4047_v60 = vmax.f32 %v3925_v58, 0.0 }
 0x51f   : > { %v4050_v29 = vmax.f32 %v3936_v45, 0.0 }
 0x520   : > { %v4048_v31 = vmax.f32 %v3928_v52, 0.0 }
 0x521   : > { %v7235_v51 = vpack.c.bf16 %v4050_v29, %v4049_v22 }
 0x522   : > { %v7237_v46 = vpack.c.bf16 %v4048_v31, %v4047_v60 }
 0x532   : > { %v5033_v57 = vpop.f32.mrb[112].mxu1 }
 0x533   : > { %v3949_v13 = vadd.f32 %v5033_v57, %v7081_v12  ;;  %v3940_v35 = vpop.f32.mrb[113].mxu1 }
 0x534   : > { %v3941_v14 = vadd.f32 %v7081_v12, %v3940_v35  ;;  %v5034_v20 = vpop.f32.mrb[114].mxu1  ;;  %v4176_v35 = vsel %vm2611_vm13, %v7237_v46, 0 }
 0x535   : > { %v3952_v4 = vadd.f32 %v5034_v20, %v7081_v12  ;;  %v3943_v30 = vpop.f32.mrb[115].mxu1  ;;  %v4053_v62 = vmax.f32 %v3949_v13, 0.0 }
 0x536   : > { %v3944_v38 = vadd.f32 %v7081_v12, %v3943_v30  ;;  %v4051_v15 = vmax.f32 %v3941_v14, 0.0  ;;  %v4179_v14 = vsel %vm2611_vm13, %v7235_v51, 0 }
 0x537   : > { %v4054_v44 = vmax.f32 %v3952_v4, 0.0 }
 0x538   : > { %v4052_v5 = vmax.f32 %v3944_v38, 0.0  ;;  %v4104_v38 = vpop.permute.xlu0 %4103 }
 0x539   : > { %v4093_v2 = vpack.c.bf16 %v4054_v44, %v4053_v62 }
 0x53a   : > { %v4092_v36 = vpack.c.bf16 %v4052_v5, %v4051_v15 }
 0x53c   : > { %5056 = vmatprep.subr.msk.bf16.mxu1 %vm2611_vm13, %v4092_v36 }
 0x53d   : > { %4758 = vmatpush3.bf16.xpose.msra.mxu1 %v4158_v55 }
 0x53e   : > { %5057 = vmatprep.subr.msk.bf16.mxu1 %vm2611_vm13, %v4093_v2 }
 0x545   : > { %4760 = vmatpush3.bf16.xpose.msra.mxu1 %v4161_v10 }
 0x54a   : > { %v5037_v3 = vpop.f32.mrb[116].mxu1 }
 0x54b   : > { %v3965_v9 = vadd.f32 %v5037_v3, %v7081_v12  ;;  %v3956_v1 = vpop.f32.mrb[117].mxu1 }
 0x54c   : > { %v3957_v23 = vadd.f32 %v7081_v12, %v3956_v1  ;;  %v5038_v37 = vpop.f32.mrb[118].mxu1 }
 0x54d   : > { %v3968_v0 = vadd.f32 %v5038_v37, %v7081_v12  ;;  %v3959_v25 = vpop.f32.mrb[119].mxu1  ;;  %v4057_v34 = vmax.f32 %v3965_v9, 0.0 }
 0x54e   : > { %v3960_v21 = vadd.f32 %v7081_v12, %v3959_v25  ;;  %v4055_v41 = vmax.f32 %v3957_v23, 0.0 }
 0x54f   : > { %v4058_v16 = vmax.f32 %v3968_v0, 0.0 }
 0x550   : > { %v4056_v61 = vmax.f32 %v3960_v21, 0.0 }
 0x551   : > { %v4095_v43 = vpack.c.bf16 %v4058_v16, %v4057_v34 }
 0x552   : > { %v4094_v54 = vpack.c.bf16 %v4056_v61, %v4055_v41 }
 0x554   : > { %5058 = vmatprep.subr.msk.bf16.mxu1 %vm2611_vm13, %v4094_v54 }
 0x555   : > { %4762 = vmatpush3.bf16.xpose.msra.mxu1 %v4164_v50 }
 0x556   : > { %5059 = vmatprep.subr.msk.bf16.mxu1 %vm2611_vm13, %v4095_v43 }
 0x55d   : > { %4764 = vmatpush3.bf16.xpose.msra.mxu1 %v4167_v18 }
 0x562   : > { %v5041_v56 = vpop.f32.mrb[120].mxu1 }
 0x563   : > { %v3981_v39 = vadd.f32 %v5041_v56, %v7081_v12  ;;  %v3972_v19 = vpop.f32.mrb[121].mxu1 }
 0x564   : > { %v3973_v53 = vadd.f32 %v7081_v12, %v3972_v19  ;;  %v5042_v49 = vpop.f32.mrb[122].mxu1 }
 0x565   : > { %v3984_v11 = vadd.f32 %v5042_v49, %v7081_v12  ;;  %v3975_v47 = vpop.f32.mrb[123].mxu1  ;;  %v4061_v32 = vmax.f32 %v3981_v39, 0.0 }
 0x566   : > { %v3976_v33 = vadd.f32 %v7081_v12, %v3975_v47  ;;  %v4059_v40 = vmax.f32 %v3973_v53, 0.0 }
 0x567   : > { %v4062_v7 = vmax.f32 %v3984_v11, 0.0 }
 0x568   : > { %v4060_v59 = vmax.f32 %v3976_v33, 0.0 }
 0x569   : > { %v4097_v6 = vpack.c.bf16 %v4062_v7, %v4061_v32 }
 0x56a   : > { %v4096_v24 = vpack.c.bf16 %v4060_v59, %v4059_v40 }
 0x56c   : > { %5060 = vmatprep.subr.msk.bf16.mxu1 %vm2611_vm13, %v4096_v24 }
 0x56d   : > { %4766 = vmatpush3.bf16.xpose.msra.mxu1 %v4170_v48 }
 0x56e   : > { %5061 = vmatprep.subr.msk.bf16.mxu1 %vm2611_vm13, %v4097_v6 }
 0x575   : > { %4768 = vmatpush3.bf16.xpose.msra.mxu1 %v4173_v42 }
 0x57a   : > { %v5045_v28 = vpop.f32.mrb[124].mxu1 }
 0x57b   : > { %v3997_v58 = vadd.f32 %v5045_v28, %v7081_v12  ;;  %v3988_v27 = vpop.f32.mrb[125].mxu1 }
 0x57c   : > { %v3989_v45 = vadd.f32 %v7081_v12, %v3988_v27  ;;  %v5046_v8 = vpop.f32.mrb[126].mxu1 }
 0x57d   : > { %v4000_v52 = vadd.f32 %v5046_v8, %v7081_v12  ;;  %v3991_v22 = vpop.f32.mrb[127].mxu1  ;;  %v4065_v29 = vmax.f32 %v3997_v58, 0.0 }
 0x57e   : > { %v3992_v17 = vadd.f32 %v7081_v12, %v3991_v22  ;;  %v4063_v31 = vmax.f32 %v3989_v45, 0.0 }
 0x57f   : > { %v4066_v60 = vmax.f32 %v4000_v52, 0.0 }
 0x580   : > { %v4064_v57 = vmax.f32 %v3992_v17, 0.0 }
 0x581   : > { %v4099_v13 = vpack.c.bf16 %v4066_v60, %v4065_v29 }
 0x582   : > { %v4098_v63 = vpack.c.bf16 %v4064_v57, %v4063_v31 }
 0x584   : > { %5062 = vmatprep.subr.msk.bf16.mxu1 %vm2611_vm13, %v4098_v63 }
 0x585   : > { %4770 = vmatpush3.bf16.xpose.msra.mxu1 %v4176_v35 }
 0x586   : > { %5063 = vmatprep.subr.msk.bf16.mxu1 %vm2611_vm13, %v4099_v13 }
 0x58d   : > { %4772 = vmatpush3.bf16.xpose.msra.mxu1 %v4179_v14 }
 0x594   : > { %4774 = vmatmul.mubr.msk.bf16.vlgmr.msra.gmra.mrb[128].mxu1 %vm2611_vm13, %v7220_v26 }
 0x5a7   : > { %v4239_v12 = vpop.f32.mrb[128].mxu0 }
 0x5a8   : > { %v4241_v20 = vpop.f32.mrb[129].mxu0  ;;  %v4240_v46 = vadd.f32 %v4239_v12, %v4104_v38 }
 0x5a9   : > { %v4243_v4 = vpop.f32.mrb[130].mxu0  ;;  %v4242_v62 = vadd.f32 %v4241_v20, %v4104_v38 }
 0x5aa   : > { %v4244_v30 = vpop.f32.mrb[131].mxu0 }
 0x5ab   : > { %v4291_v44 = vcombine.low %v4240_v46, %v4242_v62 }
 0x5ad   : > { %4295 = vst [vmem:[%s386_s18] sm:$0x77] %v4291_v44 }
 0x667   : > { %v4280_v26 = vpop.f32.mrb[128].mxu1 }
 0x668   : > { %v4282_v51 = vpop.f32.mrb[129].mxu1  ;;  %v4281_v15 = vadd.f32 %v4280_v26, %v4104_v38 }
 0x669   : > { %v4284_v5 = vpop.f32.mrb[130].mxu1  ;;  %v4283_v2 = vadd.f32 %v4282_v51, %v4104_v38 }
 0x66a   : > { %v4285_v36 = vpop.f32.mrb[131].mxu1 }
 0x66b   : > { %v4292_v55 = vcombine.low %v4281_v15, %v4283_v2 }
 0x66d   : > { %4296 = vst [vmem:[%s386_s18 + $0x8] sm:$0x77] %v4292_v55 }
 0x66e PF: > { %s18_s9 = sadd.s32 1, %s5200_s9   ;;  %s7311_s27 = smov %s5192_s29 }
 0x66f   : > { %p15_p9 = scmp.ge.s32.totalorder %s18_s9, 6   ;;  %s7312_s28 = smov %s5196_s30 }
 0x670   : > { %s7313_s29 = smov %s7316_s10  ;;  %s7314_s30 = smov %s7320_s11 }
 0x671   :  { %17 = sbr.rel (!%p15_p9) target bundleno = 3 (0x3), region = 87 }

</bundles_post_ra>
